<compile_context>
chip_gen: v7x
topology: tpu7x:2x2x1
jax: 0.10.0
libtpu: 0.0.40
codegen_flags: <defaults>
</compile_context>

<pallas_src>
import math
from functools import partial

import jax
import jax.numpy as jnp
from jax import lax
from jax.experimental import pallas as pl
from jax.experimental.pallas import tpu as pltpu


# -----------------------------------------------------------------------------
# In-kernel helpers
# -----------------------------------------------------------------------------
def _layer_norm(x, g, b, eps=1e-5):
    # Fused single reduction pass: var = E[x^2] - E[x]^2.
    mu = jnp.mean(x, axis=-1, keepdims=True)
    ms = jnp.mean(x * x, axis=-1, keepdims=True)
    var = jnp.maximum(ms - mu * mu, 0.0)
    return (x - mu) * lax.rsqrt(var + eps) * g + b


# -----------------------------------------------------------------------------
# Fused stage kernel.  grid = (batch_chunks,), everything else lives in-kernel.
# -----------------------------------------------------------------------------
def stage_kernel(x_ref, pos_ref, slab_ref, bqkv_ref, bfc1_ref,
                 wqkv_ref, wproj_ref, wfc1_ref, wfc2_ref,
                 o_ref, pool_ref,
                 *, num_heads, n_out, n_pad, pool_kernel_size, pool_stride, b_chunk):
    f32, bf16 = jnp.float32, jnp.bfloat16
    N = x_ref.shape[1]
    D = x_ref.shape[2]
    L = wqkv_ref.shape[0]
    hd = D // num_heads
    scale = 1.0 / math.sqrt(hd)
    n_ext = pool_ref.shape[0]

    def run_layer(l, x2, T, attn_bias):
        """Pre-norm ViT encoder block on folded rows x2: (b_chunk*T, D) f32."""
        slab = slab_ref[l]                                  # (8, D)  f32
        ln1_g, ln1_b = slab[0], slab[1]
        ln2_g, ln2_b = slab[2], slab[3]
        bproj, bfc2 = slab[4], slab[5]
        bqkv = bqkv_ref[l]                                  # (3*NH, hd) f32
        bfc1 = bfc1_ref[l]                                  # (H,)       f32
        wqkv = wqkv_ref[l]                                  # (3*NH, D, hd) bf16
        wproj = wproj_ref[l]                                # (NH, hd, D)   bf16
        wfc1 = wfc1_ref[l]                                  # (D, H)        bf16
        wfc2 = wfc2_ref[l]                                  # (H, D)        bf16

        # ---- multi-head self attention (pre-norm) ----
        hb = _layer_norm(x2, ln1_g, ln1_b).astype(bf16)     # (rows, D) bf16
        attn = jnp.zeros_like(x2)                           # f32 accumulator
        for h in range(num_heads):                          # static unroll (NH small)
            # Per-head q/k/v via leading-axis weight slices (no lane extraction).
            q = jnp.dot(hb, wqkv[h], preferred_element_type=f32) + bqkv[h]
            k = jnp.dot(hb, wqkv[num_heads + h], preferred_element_type=f32) \
                + bqkv[num_heads + h]
            v = jnp.dot(hb, wqkv[2 * num_heads + h], preferred_element_type=f32) \
                + bqkv[2 * num_heads + h]
            outs = []
            for b in range(b_chunk):                        # static unroll
                sl = slice(b * T, (b + 1) * T)
                s = lax.dot_general(q[sl].astype(bf16), k[sl].astype(bf16),
                                    (((1,), (1,)), ((), ())),
                                    preferred_element_type=f32) * scale   # (T, T)
                if attn_bias is not None:
                    s = s + attn_bias                       # mask padded key column
                s = s - jnp.max(s, axis=-1, keepdims=True)
                p = jnp.exp(s)
                p = p * pl.reciprocal(jnp.sum(p, axis=-1, keepdims=True), approx=True)
                outs.append(jnp.dot(p.astype(bf16), v[sl].astype(bf16),
                                    preferred_element_type=f32))          # (T, hd)
            oh = outs[0] if b_chunk == 1 else jnp.concatenate(outs, axis=0)
            # Project this head's output with its own W_proj slice (no concat of heads).
            attn = attn + jnp.dot(oh.astype(bf16), wproj[h],
                                  preferred_element_type=f32)
        x2 = x2 + attn + bproj

        # ---- MLP (pre-norm) ----
        u = _layer_norm(x2, ln2_g, ln2_b)
        u = jnp.dot(u.astype(bf16), wfc1, preferred_element_type=f32) + bfc1
        # TODO(synk): PyTorch nn.GELU default is exact erf; tanh approximation used (~1e-3 diff).
        u = jax.nn.gelu(u, approximate=True)
        u = jnp.dot(u.astype(bf16), wfc2, preferred_element_type=f32) + bfc2
        return x2 + u

    # ------------- layer 0: full-length block -------------
    x2 = x_ref[...].reshape(b_chunk * N, D).astype(f32)     # fold batch into rows
    y2 = run_layer(0, x2, N, None)                          # (b_chunk*N, D)

    # ------------- MaxPool1d(k, s) over tokens + pos_embed -------------
    # Pad rows beyond N with a finite filler so window reads for the (masked) padded
    # output token stay in bounds; real output rows never touch these rows.
    if n_ext > N:
        pool_ref[N:n_ext, :] = jnp.zeros((n_ext - N, D), f32)
    posv = pos_ref[0].astype(f32)                           # (n_pad, D)
    acts = []
    for b in range(b_chunk):                                # static unroll
        pool_ref[0:N, :] = y2[b * N:(b + 1) * N]
        pooled = pool_ref[pl.ds(0, n_pad, stride=pool_stride), :]
        for j in range(1, pool_kernel_size):                # static unroll (k=3)
            pooled = jnp.maximum(pooled,
                                 pool_ref[pl.ds(j, n_pad, stride=pool_stride), :])
        acts.append(pooled + posv)
    act = acts[0] if b_chunk == 1 else jnp.concatenate(acts, axis=0)   # (b_chunk*n_pad, D)

    # ------------- layers 1..L-1 on the pooled (padded) sequence -------------
    col = lax.broadcasted_iota(jnp.int32, (1, n_pad), 1)
    attn_bias = jnp.where(col < n_out, jnp.float32(0.0), jnp.float32(-1e30))

    act = lax.fori_loop(1, L, lambda l, a: run_layer(l, a, n_pad, attn_bias),
                        act, unroll=True)

    o_ref[...] = act.reshape(b_chunk, n_pad, D).astype(o_ref.dtype)


# -----------------------------------------------------------------------------
# Host wrapper
# -----------------------------------------------------------------------------
def stage_forward(x, params, pos_embed, *, num_heads, pool_kernel_size, pool_stride,
                  batch_chunks=None):
    B, N, D = x.shape
    assert D % num_heads == 0
    L = params["wqkv"].shape[0]
    n_out = (N - (pool_kernel_size - 1) - 1) // pool_stride + 1
    n_pad = ((n_out + 7) // 8) * 8                     # sublane-aligned pooled length

    if batch_chunks is None:
        # >=2 parallel grid blocks keep both v7x TensorCores busy; no-op on v5e/v6e.
        batch_chunks = 2 if (B % 2 == 0 and B >= 2) else 1
    assert B % batch_chunks == 0
    b_chunk = B // batch_chunks

    # Rows the pooling windows may touch (sublane-aligned pooling scratch).
    need = (pool_kernel_size - 1) + pool_stride * (n_pad - 1) + 1
    n_ext = ((max(N, need) + 7) // 8) * 8

    # Pad pos_embed to n_pad tokens (pad rows are zero; the padded token is masked).
    pos_p = jnp.zeros((1, n_pad, D), jnp.float32).at[:, :n_out, :].set(
        pos_embed.astype(jnp.float32))

    def full(arr):
        # Whole-array, VMEM-resident input: constant index map -> DMA'd once.
        zeros = (0,) * arr.ndim
        def imap(c):
            return zeros
        return pl.BlockSpec(arr.shape, imap)

    kernel = partial(stage_kernel, num_heads=num_heads, n_out=n_out, n_pad=n_pad,
                     pool_kernel_size=pool_kernel_size, pool_stride=pool_stride,
                     b_chunk=b_chunk)

    out_padded = pl.pallas_call(
        kernel,
        out_shape=jax.ShapeDtypeStruct((B, n_pad, D), x.dtype),
        grid=(batch_chunks,),
        in_specs=[
            pl.BlockSpec((b_chunk, N, D), lambda c: (c, 0, 0)),   # x (per batch chunk)
            full(pos_p),                                          # pos_embed (padded)
            full(params["slab"]),                                 # LN gamma/beta + small biases
            full(params["bqkv"]),                                 # per-head qkv biases
            full(params["bfc1"]),                                 # fc1 bias
            full(params["wqkv"]),                                 # per-head qkv weights
            full(params["wproj"]),                                # per-head proj weights
            full(params["wfc1"]),
            full(params["wfc2"]),
        ],
        out_specs=pl.BlockSpec((b_chunk, n_pad, D), lambda c: (c, 0, 0)),
        scratch_shapes=[pltpu.VMEM((n_ext, D), jnp.float32)],     # pooling scratch
        compiler_params=pltpu.CompilerParams(
            dimension_semantics=("parallel",),
            vmem_limit_bytes=32 * 1024 * 1024),
    )(x, pos_p, params["slab"], params["bqkv"], params["bfc1"],
      params["wqkv"], params["wproj"], params["wfc1"], params["wfc2"])

    return out_padded[:, :n_out, :]


# -----------------------------------------------------------------------------
# Deterministic parameter init in the packed / per-head layout used by the kernel.
# Matmul weights are bf16 (MXU operands), biases / LN params f32, stacked over L.
#   wqkv[l, j*NH + h]  (D, hd)  with j in {0:q, 1:k, 2:v}
#   wproj[l, h]        (hd, D)
#   slab[l]            rows: ln1_g, ln1_b, ln2_g, ln2_b, b_proj, b_fc2, pad, pad
# -----------------------------------------------------------------------------
def init_stage_params(key, num_layers, D, H, num_heads):
    f32, bf16 = jnp.float32, jnp.bfloat16
    hd = D // num_heads
    s = 0.02
    L, NH = num_layers, num_heads
    kq, kp, k1, k2 = jax.random.split(key, 4)

    wqkv = (jax.random.normal(kq, (L, 3 * NH, D, hd)) * s).astype(bf16)
    bqkv = jnp.zeros((L, 3 * NH, hd), f32)
    wproj = (jax.random.normal(kp, (L, NH, hd, D)) * s).astype(bf16)
    wfc1 = (jax.random.normal(k1, (L, D, H)) * s).astype(bf16)
    bfc1 = jnp.zeros((L, H), f32)
    wfc2 = (jax.random.normal(k2, (L, H, D)) * s).astype(bf16)

    slab = jnp.zeros((L, 8, D), f32)
    slab = slab.at[:, 0, :].set(1.0)    # ln1 gamma
    slab = slab.at[:, 2, :].set(1.0)    # ln2 gamma
    return dict(slab=slab, bqkv=bqkv, bfc1=bfc1,
                wqkv=wqkv, wproj=wproj, wfc1=wfc1, wfc2=wfc2)


if __name__ == "__main__":
    # Small, module-consistent shapes.
    B, N, D = 2, 16, 32
    num_heads = 4
    mlp_ratio = 4
    pool_k, pool_s = 3, 2
    num_transformers = 4
    H = mlp_ratio * D
    n_out = (N - (pool_k - 1) - 1) // pool_s + 1   # same formula as the module's n.append(...)

    key = jax.random.PRNGKey(0)
    kx, kp = jax.random.split(key)
    x = jax.random.normal(kx, (B, N, D), jnp.float32)
    params = init_stage_params(kp, num_transformers, D, H, num_heads)
    # pos_embed is initialized to zeros in the PyTorch module (nn.Parameter(torch.zeros(...))).
    pos_embed = jnp.zeros((1, n_out, D), jnp.float32)

    out = stage_forward(x, params, pos_embed, num_heads=num_heads,
                        pool_kernel_size=pool_k, pool_stride=pool_s)
    out = jax.block_until_ready(out)
    assert out.shape == (B, n_out, D), out.shape
    assert bool(jnp.all(jnp.isfinite(out)))
    print("KERNEL_OK")
</pallas_src>

<mosaic_0001>
module attributes {stable_mosaic.version = 11 : i64} {
  func.func @stage_kernel(%arg0: i32, %arg1: memref<1x16x32xf32, #tpu.memory_space<vmem>>, %arg2: memref<1x8x32xf32, #tpu.memory_space<vmem>>, %arg3: memref<4x8x32xf32, #tpu.memory_space<vmem>>, %arg4: memref<4x12x8xf32, #tpu.memory_space<vmem>>, %arg5: memref<4x128xf32, #tpu.memory_space<vmem>>, %arg6: memref<4x12x32x8xbf16, #tpu.memory_space<vmem>>, %arg7: memref<4x4x8x32xbf16, #tpu.memory_space<vmem>>, %arg8: memref<4x32x128xbf16, #tpu.memory_space<vmem>>, %arg9: memref<4x128x32xbf16, #tpu.memory_space<vmem>>, %arg10: memref<1x8x32xf32, #tpu.memory_space<vmem>>, %arg11: memref<24x32xf32, #tpu.memory_space<vmem>>) attributes {dimension_semantics = [#tpu.dimension_semantics<parallel>], iteration_bounds = array<i64: 2>, scalar_prefetch = 0 : i64, scratch_operands = 1 : i64, tpu.core_type = #tpu.core_type<tc>, window_params = [{transform_indices = @transform_0, window_bounds = array<i64: 1, 16, 32>}, {pipeline_mode = #tpu.pipeline_mode<synchronous>, transform_indices = @transform_1, window_bounds = array<i64: 1, 8, 32>}, {pipeline_mode = #tpu.pipeline_mode<synchronous>, transform_indices = @transform_2, window_bounds = array<i64: 4, 8, 32>}, {pipeline_mode = #tpu.pipeline_mode<synchronous>, transform_indices = @transform_3, window_bounds = array<i64: 4, 12, 8>}, {pipeline_mode = #tpu.pipeline_mode<synchronous>, transform_indices = @transform_4, window_bounds = array<i64: 4, 128>}, {pipeline_mode = #tpu.pipeline_mode<synchronous>, transform_indices = @transform_5, window_bounds = array<i64: 4, 12, 32, 8>}, {pipeline_mode = #tpu.pipeline_mode<synchronous>, transform_indices = @transform_6, window_bounds = array<i64: 4, 4, 8, 32>}, {pipeline_mode = #tpu.pipeline_mode<synchronous>, transform_indices = @transform_7, window_bounds = array<i64: 4, 32, 128>}, {pipeline_mode = #tpu.pipeline_mode<synchronous>, transform_indices = @transform_8, window_bounds = array<i64: 4, 128, 32>}, {transform_indices = @transform_9, window_bounds = array<i64: 1, 8, 32>}]} {
    %c0 = arith.constant 0 : index
    %c0_0 = arith.constant 0 : index
    %c0_1 = arith.constant 0 : index
    %0 = vector.load %arg1[%c0, %c0_0, %c0_1] : memref<1x16x32xf32, #tpu.memory_space<vmem>>, vector<1x16x32xf32>
    %1 = vector.shape_cast %0 : vector<1x16x32xf32> to vector<16x32xf32>
    %c0_2 = arith.constant 0 : index
    %c0_3 = arith.constant 0 : index
    %c0_4 = arith.constant 0 : index
    %2 = vector.load %arg3[%c0_2, %c0_3, %c0_4] : memref<4x8x32xf32, #tpu.memory_space<vmem>>, vector<1x8x32xf32>
    %3 = vector.shape_cast %2 : vector<1x8x32xf32> to vector<8x32xf32>
    %4 = vector.extract_strided_slice %3 {offsets = [0, 0], sizes = [1, 32], strides = [1, 1]} : vector<8x32xf32> to vector<1x32xf32>
    %5 = vector.shape_cast %4 : vector<1x32xf32> to vector<32xf32>
    %6 = vector.extract_strided_slice %3 {offsets = [1, 0], sizes = [1, 32], strides = [1, 1]} : vector<8x32xf32> to vector<1x32xf32>
    %7 = vector.shape_cast %6 : vector<1x32xf32> to vector<32xf32>
    %8 = vector.extract_strided_slice %3 {offsets = [2, 0], sizes = [1, 32], strides = [1, 1]} : vector<8x32xf32> to vector<1x32xf32>
    %9 = vector.shape_cast %8 : vector<1x32xf32> to vector<32xf32>
    %10 = vector.extract_strided_slice %3 {offsets = [3, 0], sizes = [1, 32], strides = [1, 1]} : vector<8x32xf32> to vector<1x32xf32>
    %11 = vector.shape_cast %10 : vector<1x32xf32> to vector<32xf32>
    %12 = vector.extract_strided_slice %3 {offsets = [4, 0], sizes = [1, 32], strides = [1, 1]} : vector<8x32xf32> to vector<1x32xf32>
    %13 = vector.shape_cast %12 : vector<1x32xf32> to vector<32xf32>
    %14 = vector.extract_strided_slice %3 {offsets = [5, 0], sizes = [1, 32], strides = [1, 1]} : vector<8x32xf32> to vector<1x32xf32>
    %15 = vector.shape_cast %14 : vector<1x32xf32> to vector<32xf32>
    %c0_5 = arith.constant 0 : index
    %c0_6 = arith.constant 0 : index
    %c0_7 = arith.constant 0 : index
    %16 = vector.load %arg4[%c0_5, %c0_6, %c0_7] : memref<4x12x8xf32, #tpu.memory_space<vmem>>, vector<1x12x8xf32>
    %17 = vector.shape_cast %16 : vector<1x12x8xf32> to vector<12x8xf32>
    %c0_8 = arith.constant 0 : index
    %c0_9 = arith.constant 0 : index
    %18 = vector.load %arg5[%c0_8, %c0_9] : memref<4x128xf32, #tpu.memory_space<vmem>>, vector<1x128xf32>
    %19 = vector.shape_cast %18 : vector<1x128xf32> to vector<128xf32>
    %c0_10 = arith.constant 0 : index
    %c0_11 = arith.constant 0 : index
    %c0_12 = arith.constant 0 : index
    %c0_13 = arith.constant 0 : index
    %20 = vector.load %arg6[%c0_10, %c0_11, %c0_12, %c0_13] : memref<4x12x32x8xbf16, #tpu.memory_space<vmem>>, vector<1x12x32x8xbf16>
    %21 = vector.shape_cast %20 : vector<1x12x32x8xbf16> to vector<12x32x8xbf16>
    %c0_14 = arith.constant 0 : index
    %c0_15 = arith.constant 0 : index
    %c0_16 = arith.constant 0 : index
    %c0_17 = arith.constant 0 : index
    %22 = vector.load %arg7[%c0_14, %c0_15, %c0_16, %c0_17] : memref<4x4x8x32xbf16, #tpu.memory_space<vmem>>, vector<1x4x8x32xbf16>
    %23 = vector.shape_cast %22 : vector<1x4x8x32xbf16> to vector<4x8x32xbf16>
    %c0_18 = arith.constant 0 : index
    %c0_19 = arith.constant 0 : index
    %c0_20 = arith.constant 0 : index
    %24 = vector.load %arg8[%c0_18, %c0_19, %c0_20] : memref<4x32x128xbf16, #tpu.memory_space<vmem>>, vector<1x32x128xbf16>
    %25 = vector.shape_cast %24 : vector<1x32x128xbf16> to vector<32x128xbf16>
    %c0_21 = arith.constant 0 : index
    %c0_22 = arith.constant 0 : index
    %c0_23 = arith.constant 0 : index
    %26 = vector.load %arg9[%c0_21, %c0_22, %c0_23] : memref<4x128x32xbf16, #tpu.memory_space<vmem>>, vector<1x128x32xbf16>
    %27 = vector.shape_cast %26 : vector<1x128x32xbf16> to vector<128x32xbf16>
    %cst = arith.constant dense<0.000000e+00> : vector<16xf32>
    %28 = vector.multi_reduction <add>, %1, %cst [1] : vector<16x32xf32> to vector<16xf32>
    %29 = vector.shape_cast %28 : vector<16xf32> to vector<16x1xf32>
    %cst_24 = arith.constant 3.200000e+01 : f32
    %30 = vector.broadcast %cst_24 : f32 to vector<16x1xf32>
    %31 = arith.divf %29, %30 : vector<16x1xf32>
    %32 = arith.mulf %1, %1 : vector<16x32xf32>
    %cst_25 = arith.constant dense<0.000000e+00> : vector<16xf32>
    %33 = vector.multi_reduction <add>, %32, %cst_25 [1] : vector<16x32xf32> to vector<16xf32>
    %34 = vector.shape_cast %33 : vector<16xf32> to vector<16x1xf32>
    %cst_26 = arith.constant 3.200000e+01 : f32
    %35 = vector.broadcast %cst_26 : f32 to vector<16x1xf32>
    %36 = arith.divf %34, %35 : vector<16x1xf32>
    %37 = arith.mulf %31, %31 : vector<16x1xf32>
    %38 = arith.subf %36, %37 : vector<16x1xf32>
    %cst_27 = arith.constant 0.000000e+00 : f32
    %39 = vector.broadcast %cst_27 : f32 to vector<16x1xf32>
    %40 = arith.maximumf %38, %39 : vector<16x1xf32>
    %41 = vector.broadcast %31 : vector<16x1xf32> to vector<16x32xf32>
    %42 = arith.subf %1, %41 : vector<16x32xf32>
    %cst_28 = arith.constant 9.99999974E-6 : f32
    %43 = vector.broadcast %cst_28 : f32 to vector<16x1xf32>
    %44 = arith.addf %40, %43 : vector<16x1xf32>
    %45 = math.rsqrt %44 : vector<16x1xf32>
    %46 = vector.broadcast %45 : vector<16x1xf32> to vector<16x32xf32>
    %47 = arith.mulf %42, %46 : vector<16x32xf32>
    %48 = vector.shape_cast %5 : vector<32xf32> to vector<1x32xf32>
    %49 = vector.broadcast %48 : vector<1x32xf32> to vector<16x32xf32>
    %50 = arith.mulf %47, %49 : vector<16x32xf32>
    %51 = vector.shape_cast %7 : vector<32xf32> to vector<1x32xf32>
    %52 = vector.broadcast %51 : vector<1x32xf32> to vector<16x32xf32>
    %53 = arith.addf %50, %52 : vector<16x32xf32>
    %54 = arith.truncf %53 : vector<16x32xf32> to vector<16x32xbf16>
    %cst_29 = arith.constant 0.000000e+00 : f32
    %55 = vector.broadcast %cst_29 : f32 to vector<16x32xf32>
    %56 = vector.extract_strided_slice %21 {offsets = [0, 0, 0], sizes = [1, 32, 8], strides = [1, 1, 1]} : vector<12x32x8xbf16> to vector<1x32x8xbf16>
    %57 = vector.shape_cast %56 : vector<1x32x8xbf16> to vector<32x8xbf16>
    %cst_30 = arith.constant dense<0.000000e+00> : vector<16x8xf32>
    %58 = tpu.matmul %54, %57, %cst_30 {dimension_numbers = #tpu.dot_dimension_numbers<[1], [0], [0], [1], [0, 0, 1, 1], [], []>} : vector<16x32xbf16>, vector<32x8xbf16>, vector<16x8xf32> -> vector<16x8xf32>
    %59 = vector.extract_strided_slice %17 {offsets = [0, 0], sizes = [1, 8], strides = [1, 1]} : vector<12x8xf32> to vector<1x8xf32>
    %60 = vector.shape_cast %59 : vector<1x8xf32> to vector<8xf32>
    %61 = vector.shape_cast %60 : vector<8xf32> to vector<1x8xf32>
    %62 = vector.broadcast %61 : vector<1x8xf32> to vector<16x8xf32>
    %63 = arith.addf %58, %62 : vector<16x8xf32>
    %64 = vector.extract_strided_slice %21 {offsets = [4, 0, 0], sizes = [1, 32, 8], strides = [1, 1, 1]} : vector<12x32x8xbf16> to vector<1x32x8xbf16>
    %65 = vector.shape_cast %64 : vector<1x32x8xbf16> to vector<32x8xbf16>
    %cst_31 = arith.constant dense<0.000000e+00> : vector<16x8xf32>
    %66 = tpu.matmul %54, %65, %cst_31 {dimension_numbers = #tpu.dot_dimension_numbers<[1], [0], [0], [1], [0, 0, 1, 1], [], []>} : vector<16x32xbf16>, vector<32x8xbf16>, vector<16x8xf32> -> vector<16x8xf32>
    %67 = vector.extract_strided_slice %17 {offsets = [4, 0], sizes = [1, 8], strides = [1, 1]} : vector<12x8xf32> to vector<1x8xf32>
    %68 = vector.shape_cast %67 : vector<1x8xf32> to vector<8xf32>
    %69 = vector.shape_cast %68 : vector<8xf32> to vector<1x8xf32>
    %70 = vector.broadcast %69 : vector<1x8xf32> to vector<16x8xf32>
    %71 = arith.addf %66, %70 : vector<16x8xf32>
    %72 = vector.extract_strided_slice %21 {offsets = [8, 0, 0], sizes = [1, 32, 8], strides = [1, 1, 1]} : vector<12x32x8xbf16> to vector<1x32x8xbf16>
    %73 = vector.shape_cast %72 : vector<1x32x8xbf16> to vector<32x8xbf16>
    %cst_32 = arith.constant dense<0.000000e+00> : vector<16x8xf32>
    %74 = tpu.matmul %54, %73, %cst_32 {dimension_numbers = #tpu.dot_dimension_numbers<[1], [0], [0], [1], [0, 0, 1, 1], [], []>} : vector<16x32xbf16>, vector<32x8xbf16>, vector<16x8xf32> -> vector<16x8xf32>
    %75 = vector.extract_strided_slice %17 {offsets = [8, 0], sizes = [1, 8], strides = [1, 1]} : vector<12x8xf32> to vector<1x8xf32>
    %76 = vector.shape_cast %75 : vector<1x8xf32> to vector<8xf32>
    %77 = vector.shape_cast %76 : vector<8xf32> to vector<1x8xf32>
    %78 = vector.broadcast %77 : vector<1x8xf32> to vector<16x8xf32>
    %79 = arith.addf %74, %78 : vector<16x8xf32>
    %80 = arith.truncf %63 : vector<16x8xf32> to vector<16x8xbf16>
    %81 = arith.truncf %71 : vector<16x8xf32> to vector<16x8xbf16>
    %cst_33 = arith.constant dense<0.000000e+00> : vector<16x16xf32>
    %82 = tpu.matmul %80, %81, %cst_33 {dimension_numbers = #tpu.dot_dimension_numbers<[1], [1], [0], [0], [0, 0, 1, 0], [], []>} : vector<16x8xbf16>, vector<16x8xbf16>, vector<16x16xf32> -> vector<16x16xf32>
    %cst_34 = arith.constant 0.353553385 : f32
    %83 = vector.broadcast %cst_34 : f32 to vector<16x16xf32>
    %84 = arith.mulf %82, %83 : vector<16x16xf32>
    %cst_35 = arith.constant dense<0xFF800000> : vector<16xf32>
    %85 = vector.multi_reduction <maximumf>, %84, %cst_35 [1] : vector<16x16xf32> to vector<16xf32>
    %86 = vector.shape_cast %85 : vector<16xf32> to vector<16x1xf32>
    %87 = vector.broadcast %86 : vector<16x1xf32> to vector<16x16xf32>
    %88 = arith.subf %84, %87 : vector<16x16xf32>
    %89 = math.exp %88 : vector<16x16xf32>
    %cst_36 = arith.constant dense<0.000000e+00> : vector<16xf32>
    %90 = vector.multi_reduction <add>, %89, %cst_36 [1] : vector<16x16xf32> to vector<16xf32>
    %91 = vector.shape_cast %90 : vector<16xf32> to vector<16x1xf32>
    %92 = tpu.reciprocal %91 {approx = true} : vector<16x1xf32> -> vector<16x1xf32>
    %93 = vector.broadcast %92 : vector<16x1xf32> to vector<16x16xf32>
    %94 = arith.mulf %89, %93 : vector<16x16xf32>
    %95 = arith.truncf %94 : vector<16x16xf32> to vector<16x16xbf16>
    %96 = arith.truncf %79 : vector<16x8xf32> to vector<16x8xbf16>
    %cst_37 = arith.constant dense<0.000000e+00> : vector<16x8xf32>
    %97 = tpu.matmul %95, %96, %cst_37 {dimension_numbers = #tpu.dot_dimension_numbers<[1], [0], [0], [1], [0, 0, 1, 1], [], []>} : vector<16x16xbf16>, vector<16x8xbf16>, vector<16x8xf32> -> vector<16x8xf32>
    %98 = arith.truncf %97 : vector<16x8xf32> to vector<16x8xbf16>
    %99 = vector.extract_strided_slice %23 {offsets = [0, 0, 0], sizes = [1, 8, 32], strides = [1, 1, 1]} : vector<4x8x32xbf16> to vector<1x8x32xbf16>
    %100 = vector.shape_cast %99 : vector<1x8x32xbf16> to vector<8x32xbf16>
    %cst_38 = arith.constant dense<0.000000e+00> : vector<16x32xf32>
    %101 = tpu.matmul %98, %100, %cst_38 {dimension_numbers = #tpu.dot_dimension_numbers<[1], [0], [0], [1], [0, 0, 1, 1], [], []>} : vector<16x8xbf16>, vector<8x32xbf16>, vector<16x32xf32> -> vector<16x32xf32>
    %102 = arith.addf %55, %101 : vector<16x32xf32>
    %103 = vector.extract_strided_slice %21 {offsets = [1, 0, 0], sizes = [1, 32, 8], strides = [1, 1, 1]} : vector<12x32x8xbf16> to vector<1x32x8xbf16>
    %104 = vector.shape_cast %103 : vector<1x32x8xbf16> to vector<32x8xbf16>
    %cst_39 = arith.constant dense<0.000000e+00> : vector<16x8xf32>
    %105 = tpu.matmul %54, %104, %cst_39 {dimension_numbers = #tpu.dot_dimension_numbers<[1], [0], [0], [1], [0, 0, 1, 1], [], []>} : vector<16x32xbf16>, vector<32x8xbf16>, vector<16x8xf32> -> vector<16x8xf32>
    %106 = vector.extract_strided_slice %17 {offsets = [1, 0], sizes = [1, 8], strides = [1, 1]} : vector<12x8xf32> to vector<1x8xf32>
    %107 = vector.shape_cast %106 : vector<1x8xf32> to vector<8xf32>
    %108 = vector.shape_cast %107 : vector<8xf32> to vector<1x8xf32>
    %109 = vector.broadcast %108 : vector<1x8xf32> to vector<16x8xf32>
    %110 = arith.addf %105, %109 : vector<16x8xf32>
    %111 = vector.extract_strided_slice %21 {offsets = [5, 0, 0], sizes = [1, 32, 8], strides = [1, 1, 1]} : vector<12x32x8xbf16> to vector<1x32x8xbf16>
    %112 = vector.shape_cast %111 : vector<1x32x8xbf16> to vector<32x8xbf16>
    %cst_40 = arith.constant dense<0.000000e+00> : vector<16x8xf32>
    %113 = tpu.matmul %54, %112, %cst_40 {dimension_numbers = #tpu.dot_dimension_numbers<[1], [0], [0], [1], [0, 0, 1, 1], [], []>} : vector<16x32xbf16>, vector<32x8xbf16>, vector<16x8xf32> -> vector<16x8xf32>
    %114 = vector.extract_strided_slice %17 {offsets = [5, 0], sizes = [1, 8], strides = [1, 1]} : vector<12x8xf32> to vector<1x8xf32>
    %115 = vector.shape_cast %114 : vector<1x8xf32> to vector<8xf32>
    %116 = vector.shape_cast %115 : vector<8xf32> to vector<1x8xf32>
    %117 = vector.broadcast %116 : vector<1x8xf32> to vector<16x8xf32>
    %118 = arith.addf %113, %117 : vector<16x8xf32>
    %119 = vector.extract_strided_slice %21 {offsets = [9, 0, 0], sizes = [1, 32, 8], strides = [1, 1, 1]} : vector<12x32x8xbf16> to vector<1x32x8xbf16>
    %120 = vector.shape_cast %119 : vector<1x32x8xbf16> to vector<32x8xbf16>
    %cst_41 = arith.constant dense<0.000000e+00> : vector<16x8xf32>
    %121 = tpu.matmul %54, %120, %cst_41 {dimension_numbers = #tpu.dot_dimension_numbers<[1], [0], [0], [1], [0, 0, 1, 1], [], []>} : vector<16x32xbf16>, vector<32x8xbf16>, vector<16x8xf32> -> vector<16x8xf32>
    %122 = vector.extract_strided_slice %17 {offsets = [9, 0], sizes = [1, 8], strides = [1, 1]} : vector<12x8xf32> to vector<1x8xf32>
    %123 = vector.shape_cast %122 : vector<1x8xf32> to vector<8xf32>
    %124 = vector.shape_cast %123 : vector<8xf32> to vector<1x8xf32>
    %125 = vector.broadcast %124 : vector<1x8xf32> to vector<16x8xf32>
    %126 = arith.addf %121, %125 : vector<16x8xf32>
    %127 = arith.truncf %110 : vector<16x8xf32> to vector<16x8xbf16>
    %128 = arith.truncf %118 : vector<16x8xf32> to vector<16x8xbf16>
    %cst_42 = arith.constant dense<0.000000e+00> : vector<16x16xf32>
    %129 = tpu.matmul %127, %128, %cst_42 {dimension_numbers = #tpu.dot_dimension_numbers<[1], [1], [0], [0], [0, 0, 1, 0], [], []>} : vector<16x8xbf16>, vector<16x8xbf16>, vector<16x16xf32> -> vector<16x16xf32>
    %cst_43 = arith.constant 0.353553385 : f32
    %130 = vector.broadcast %cst_43 : f32 to vector<16x16xf32>
    %131 = arith.mulf %129, %130 : vector<16x16xf32>
    %cst_44 = arith.constant dense<0xFF800000> : vector<16xf32>
    %132 = vector.multi_reduction <maximumf>, %131, %cst_44 [1] : vector<16x16xf32> to vector<16xf32>
    %133 = vector.shape_cast %132 : vector<16xf32> to vector<16x1xf32>
    %134 = vector.broadcast %133 : vector<16x1xf32> to vector<16x16xf32>
    %135 = arith.subf %131, %134 : vector<16x16xf32>
    %136 = math.exp %135 : vector<16x16xf32>
    %cst_45 = arith.constant dense<0.000000e+00> : vector<16xf32>
    %137 = vector.multi_reduction <add>, %136, %cst_45 [1] : vector<16x16xf32> to vector<16xf32>
    %138 = vector.shape_cast %137 : vector<16xf32> to vector<16x1xf32>
    %139 = tpu.reciprocal %138 {approx = true} : vector<16x1xf32> -> vector<16x1xf32>
    %140 = vector.broadcast %139 : vector<16x1xf32> to vector<16x16xf32>
    %141 = arith.mulf %136, %140 : vector<16x16xf32>
    %142 = arith.truncf %141 : vector<16x16xf32> to vector<16x16xbf16>
    %143 = arith.truncf %126 : vector<16x8xf32> to vector<16x8xbf16>
    %cst_46 = arith.constant dense<0.000000e+00> : vector<16x8xf32>
    %144 = tpu.matmul %142, %143, %cst_46 {dimension_numbers = #tpu.dot_dimension_numbers<[1], [0], [0], [1], [0, 0, 1, 1], [], []>} : vector<16x16xbf16>, vector<16x8xbf16>, vector<16x8xf32> -> vector<16x8xf32>
    %145 = arith.truncf %144 : vector<16x8xf32> to vector<16x8xbf16>
    %146 = vector.extract_strided_slice %23 {offsets = [1, 0, 0], sizes = [1, 8, 32], strides = [1, 1, 1]} : vector<4x8x32xbf16> to vector<1x8x32xbf16>
    %147 = vector.shape_cast %146 : vector<1x8x32xbf16> to vector<8x32xbf16>
    %cst_47 = arith.constant dense<0.000000e+00> : vector<16x32xf32>
    %148 = tpu.matmul %145, %147, %cst_47 {dimension_numbers = #tpu.dot_dimension_numbers<[1], [0], [0], [1], [0, 0, 1, 1], [], []>} : vector<16x8xbf16>, vector<8x32xbf16>, vector<16x32xf32> -> vector<16x32xf32>
    %149 = arith.addf %102, %148 : vector<16x32xf32>
    %150 = vector.extract_strided_slice %21 {offsets = [2, 0, 0], sizes = [1, 32, 8], strides = [1, 1, 1]} : vector<12x32x8xbf16> to vector<1x32x8xbf16>
    %151 = vector.shape_cast %150 : vector<1x32x8xbf16> to vector<32x8xbf16>
    %cst_48 = arith.constant dense<0.000000e+00> : vector<16x8xf32>
    %152 = tpu.matmul %54, %151, %cst_48 {dimension_numbers = #tpu.dot_dimension_numbers<[1], [0], [0], [1], [0, 0, 1, 1], [], []>} : vector<16x32xbf16>, vector<32x8xbf16>, vector<16x8xf32> -> vector<16x8xf32>
    %153 = vector.extract_strided_slice %17 {offsets = [2, 0], sizes = [1, 8], strides = [1, 1]} : vector<12x8xf32> to vector<1x8xf32>
    %154 = vector.shape_cast %153 : vector<1x8xf32> to vector<8xf32>
    %155 = vector.shape_cast %154 : vector<8xf32> to vector<1x8xf32>
    %156 = vector.broadcast %155 : vector<1x8xf32> to vector<16x8xf32>
    %157 = arith.addf %152, %156 : vector<16x8xf32>
    %158 = vector.extract_strided_slice %21 {offsets = [6, 0, 0], sizes = [1, 32, 8], strides = [1, 1, 1]} : vector<12x32x8xbf16> to vector<1x32x8xbf16>
    %159 = vector.shape_cast %158 : vector<1x32x8xbf16> to vector<32x8xbf16>
    %cst_49 = arith.constant dense<0.000000e+00> : vector<16x8xf32>
    %160 = tpu.matmul %54, %159, %cst_49 {dimension_numbers = #tpu.dot_dimension_numbers<[1], [0], [0], [1], [0, 0, 1, 1], [], []>} : vector<16x32xbf16>, vector<32x8xbf16>, vector<16x8xf32> -> vector<16x8xf32>
    %161 = vector.extract_strided_slice %17 {offsets = [6, 0], sizes = [1, 8], strides = [1, 1]} : vector<12x8xf32> to vector<1x8xf32>
    %162 = vector.shape_cast %161 : vector<1x8xf32> to vector<8xf32>
    %163 = vector.shape_cast %162 : vector<8xf32> to vector<1x8xf32>
    %164 = vector.broadcast %163 : vector<1x8xf32> to vector<16x8xf32>
    %165 = arith.addf %160, %164 : vector<16x8xf32>
    %166 = vector.extract_strided_slice %21 {offsets = [10, 0, 0], sizes = [1, 32, 8], strides = [1, 1, 1]} : vector<12x32x8xbf16> to vector<1x32x8xbf16>
    %167 = vector.shape_cast %166 : vector<1x32x8xbf16> to vector<32x8xbf16>
    %cst_50 = arith.constant dense<0.000000e+00> : vector<16x8xf32>
    %168 = tpu.matmul %54, %167, %cst_50 {dimension_numbers = #tpu.dot_dimension_numbers<[1], [0], [0], [1], [0, 0, 1, 1], [], []>} : vector<16x32xbf16>, vector<32x8xbf16>, vector<16x8xf32> -> vector<16x8xf32>
    %169 = vector.extract_strided_slice %17 {offsets = [10, 0], sizes = [1, 8], strides = [1, 1]} : vector<12x8xf32> to vector<1x8xf32>
    %170 = vector.shape_cast %169 : vector<1x8xf32> to vector<8xf32>
    %171 = vector.shape_cast %170 : vector<8xf32> to vector<1x8xf32>
    %172 = vector.broadcast %171 : vector<1x8xf32> to vector<16x8xf32>
    %173 = arith.addf %168, %172 : vector<16x8xf32>
    %174 = arith.truncf %157 : vector<16x8xf32> to vector<16x8xbf16>
    %175 = arith.truncf %165 : vector<16x8xf32> to vector<16x8xbf16>
    %cst_51 = arith.constant dense<0.000000e+00> : vector<16x16xf32>
    %176 = tpu.matmul %174, %175, %cst_51 {dimension_numbers = #tpu.dot_dimension_numbers<[1], [1], [0], [0], [0, 0, 1, 0], [], []>} : vector<16x8xbf16>, vector<16x8xbf16>, vector<16x16xf32> -> vector<16x16xf32>
    %cst_52 = arith.constant 0.353553385 : f32
    %177 = vector.broadcast %cst_52 : f32 to vector<16x16xf32>
    %178 = arith.mulf %176, %177 : vector<16x16xf32>
    %cst_53 = arith.constant dense<0xFF800000> : vector<16xf32>
    %179 = vector.multi_reduction <maximumf>, %178, %cst_53 [1] : vector<16x16xf32> to vector<16xf32>
    %180 = vector.shape_cast %179 : vector<16xf32> to vector<16x1xf32>
    %181 = vector.broadcast %180 : vector<16x1xf32> to vector<16x16xf32>
    %182 = arith.subf %178, %181 : vector<16x16xf32>
    %183 = math.exp %182 : vector<16x16xf32>
    %cst_54 = arith.constant dense<0.000000e+00> : vector<16xf32>
    %184 = vector.multi_reduction <add>, %183, %cst_54 [1] : vector<16x16xf32> to vector<16xf32>
    %185 = vector.shape_cast %184 : vector<16xf32> to vector<16x1xf32>
    %186 = tpu.reciprocal %185 {approx = true} : vector<16x1xf32> -> vector<16x1xf32>
    %187 = vector.broadcast %186 : vector<16x1xf32> to vector<16x16xf32>
    %188 = arith.mulf %183, %187 : vector<16x16xf32>
    %189 = arith.truncf %188 : vector<16x16xf32> to vector<16x16xbf16>
    %190 = arith.truncf %173 : vector<16x8xf32> to vector<16x8xbf16>
    %cst_55 = arith.constant dense<0.000000e+00> : vector<16x8xf32>
    %191 = tpu.matmul %189, %190, %cst_55 {dimension_numbers = #tpu.dot_dimension_numbers<[1], [0], [0], [1], [0, 0, 1, 1], [], []>} : vector<16x16xbf16>, vector<16x8xbf16>, vector<16x8xf32> -> vector<16x8xf32>
    %192 = arith.truncf %191 : vector<16x8xf32> to vector<16x8xbf16>
    %193 = vector.extract_strided_slice %23 {offsets = [2, 0, 0], sizes = [1, 8, 32], strides = [1, 1, 1]} : vector<4x8x32xbf16> to vector<1x8x32xbf16>
    %194 = vector.shape_cast %193 : vector<1x8x32xbf16> to vector<8x32xbf16>
    %cst_56 = arith.constant dense<0.000000e+00> : vector<16x32xf32>
    %195 = tpu.matmul %192, %194, %cst_56 {dimension_numbers = #tpu.dot_dimension_numbers<[1], [0], [0], [1], [0, 0, 1, 1], [], []>} : vector<16x8xbf16>, vector<8x32xbf16>, vector<16x32xf32> -> vector<16x32xf32>
    %196 = arith.addf %149, %195 : vector<16x32xf32>
    %197 = vector.extract_strided_slice %21 {offsets = [3, 0, 0], sizes = [1, 32, 8], strides = [1, 1, 1]} : vector<12x32x8xbf16> to vector<1x32x8xbf16>
    %198 = vector.shape_cast %197 : vector<1x32x8xbf16> to vector<32x8xbf16>
    %cst_57 = arith.constant dense<0.000000e+00> : vector<16x8xf32>
    %199 = tpu.matmul %54, %198, %cst_57 {dimension_numbers = #tpu.dot_dimension_numbers<[1], [0], [0], [1], [0, 0, 1, 1], [], []>} : vector<16x32xbf16>, vector<32x8xbf16>, vector<16x8xf32> -> vector<16x8xf32>
    %200 = vector.extract_strided_slice %17 {offsets = [3, 0], sizes = [1, 8], strides = [1, 1]} : vector<12x8xf32> to vector<1x8xf32>
    %201 = vector.shape_cast %200 : vector<1x8xf32> to vector<8xf32>
    %202 = vector.shape_cast %201 : vector<8xf32> to vector<1x8xf32>
    %203 = vector.broadcast %202 : vector<1x8xf32> to vector<16x8xf32>
    %204 = arith.addf %199, %203 : vector<16x8xf32>
    %205 = vector.extract_strided_slice %21 {offsets = [7, 0, 0], sizes = [1, 32, 8], strides = [1, 1, 1]} : vector<12x32x8xbf16> to vector<1x32x8xbf16>
    %206 = vector.shape_cast %205 : vector<1x32x8xbf16> to vector<32x8xbf16>
    %cst_58 = arith.constant dense<0.000000e+00> : vector<16x8xf32>
    %207 = tpu.matmul %54, %206, %cst_58 {dimension_numbers = #tpu.dot_dimension_numbers<[1], [0], [0], [1], [0, 0, 1, 1], [], []>} : vector<16x32xbf16>, vector<32x8xbf16>, vector<16x8xf32> -> vector<16x8xf32>
    %208 = vector.extract_strided_slice %17 {offsets = [7, 0], sizes = [1, 8], strides = [1, 1]} : vector<12x8xf32> to vector<1x8xf32>
    %209 = vector.shape_cast %208 : vector<1x8xf32> to vector<8xf32>
    %210 = vector.shape_cast %209 : vector<8xf32> to vector<1x8xf32>
    %211 = vector.broadcast %210 : vector<1x8xf32> to vector<16x8xf32>
    %212 = arith.addf %207, %211 : vector<16x8xf32>
    %213 = vector.extract_strided_slice %21 {offsets = [11, 0, 0], sizes = [1, 32, 8], strides = [1, 1, 1]} : vector<12x32x8xbf16> to vector<1x32x8xbf16>
    %214 = vector.shape_cast %213 : vector<1x32x8xbf16> to vector<32x8xbf16>
    %cst_59 = arith.constant dense<0.000000e+00> : vector<16x8xf32>
    %215 = tpu.matmul %54, %214, %cst_59 {dimension_numbers = #tpu.dot_dimension_numbers<[1], [0], [0], [1], [0, 0, 1, 1], [], []>} : vector<16x32xbf16>, vector<32x8xbf16>, vector<16x8xf32> -> vector<16x8xf32>
    %216 = vector.extract_strided_slice %17 {offsets = [11, 0], sizes = [1, 8], strides = [1, 1]} : vector<12x8xf32> to vector<1x8xf32>
    %217 = vector.shape_cast %216 : vector<1x8xf32> to vector<8xf32>
    %218 = vector.shape_cast %217 : vector<8xf32> to vector<1x8xf32>
    %219 = vector.broadcast %218 : vector<1x8xf32> to vector<16x8xf32>
    %220 = arith.addf %215, %219 : vector<16x8xf32>
    %221 = arith.truncf %204 : vector<16x8xf32> to vector<16x8xbf16>
    %222 = arith.truncf %212 : vector<16x8xf32> to vector<16x8xbf16>
    %cst_60 = arith.constant dense<0.000000e+00> : vector<16x16xf32>
    %223 = tpu.matmul %221, %222, %cst_60 {dimension_numbers = #tpu.dot_dimension_numbers<[1], [1], [0], [0], [0, 0, 1, 0], [], []>} : vector<16x8xbf16>, vector<16x8xbf16>, vector<16x16xf32> -> vector<16x16xf32>
    %cst_61 = arith.constant 0.353553385 : f32
    %224 = vector.broadcast %cst_61 : f32 to vector<16x16xf32>
    %225 = arith.mulf %223, %224 : vector<16x16xf32>
    %cst_62 = arith.constant dense<0xFF800000> : vector<16xf32>
    %226 = vector.multi_reduction <maximumf>, %225, %cst_62 [1] : vector<16x16xf32> to vector<16xf32>
    %227 = vector.shape_cast %226 : vector<16xf32> to vector<16x1xf32>
    %228 = vector.broadcast %227 : vector<16x1xf32> to vector<16x16xf32>
    %229 = arith.subf %225, %228 : vector<16x16xf32>
    %230 = math.exp %229 : vector<16x16xf32>
    %cst_63 = arith.constant dense<0.000000e+00> : vector<16xf32>
    %231 = vector.multi_reduction <add>, %230, %cst_63 [1] : vector<16x16xf32> to vector<16xf32>
    %232 = vector.shape_cast %231 : vector<16xf32> to vector<16x1xf32>
    %233 = tpu.reciprocal %232 {approx = true} : vector<16x1xf32> -> vector<16x1xf32>
    %234 = vector.broadcast %233 : vector<16x1xf32> to vector<16x16xf32>
    %235 = arith.mulf %230, %234 : vector<16x16xf32>
    %236 = arith.truncf %235 : vector<16x16xf32> to vector<16x16xbf16>
    %237 = arith.truncf %220 : vector<16x8xf32> to vector<16x8xbf16>
    %cst_64 = arith.constant dense<0.000000e+00> : vector<16x8xf32>
    %238 = tpu.matmul %236, %237, %cst_64 {dimension_numbers = #tpu.dot_dimension_numbers<[1], [0], [0], [1], [0, 0, 1, 1], [], []>} : vector<16x16xbf16>, vector<16x8xbf16>, vector<16x8xf32> -> vector<16x8xf32>
    %239 = arith.truncf %238 : vector<16x8xf32> to vector<16x8xbf16>
    %240 = vector.extract_strided_slice %23 {offsets = [3, 0, 0], sizes = [1, 8, 32], strides = [1, 1, 1]} : vector<4x8x32xbf16> to vector<1x8x32xbf16>
    %241 = vector.shape_cast %240 : vector<1x8x32xbf16> to vector<8x32xbf16>
    %cst_65 = arith.constant dense<0.000000e+00> : vector<16x32xf32>
    %242 = tpu.matmul %239, %241, %cst_65 {dimension_numbers = #tpu.dot_dimension_numbers<[1], [0], [0], [1], [0, 0, 1, 1], [], []>} : vector<16x8xbf16>, vector<8x32xbf16>, vector<16x32xf32> -> vector<16x32xf32>
    %243 = arith.addf %196, %242 : vector<16x32xf32>
    %244 = arith.addf %1, %243 : vector<16x32xf32>
    %245 = vector.shape_cast %13 : vector<32xf32> to vector<1x32xf32>
    %246 = vector.broadcast %245 : vector<1x32xf32> to vector<16x32xf32>
    %247 = arith.addf %244, %246 : vector<16x32xf32>
    %cst_66 = arith.constant dense<0.000000e+00> : vector<16xf32>
    %248 = vector.multi_reduction <add>, %247, %cst_66 [1] : vector<16x32xf32> to vector<16xf32>
    %249 = vector.shape_cast %248 : vector<16xf32> to vector<16x1xf32>
    %cst_67 = arith.constant 3.200000e+01 : f32
    %250 = vector.broadcast %cst_67 : f32 to vector<16x1xf32>
    %251 = arith.divf %249, %250 : vector<16x1xf32>
    %252 = arith.mulf %247, %247 : vector<16x32xf32>
    %cst_68 = arith.constant dense<0.000000e+00> : vector<16xf32>
    %253 = vector.multi_reduction <add>, %252, %cst_68 [1] : vector<16x32xf32> to vector<16xf32>
    %254 = vector.shape_cast %253 : vector<16xf32> to vector<16x1xf32>
    %cst_69 = arith.constant 3.200000e+01 : f32
    %255 = vector.broadcast %cst_69 : f32 to vector<16x1xf32>
    %256 = arith.divf %254, %255 : vector<16x1xf32>
    %257 = arith.mulf %251, %251 : vector<16x1xf32>
    %258 = arith.subf %256, %257 : vector<16x1xf32>
    %cst_70 = arith.constant 0.000000e+00 : f32
    %259 = vector.broadcast %cst_70 : f32 to vector<16x1xf32>
    %260 = arith.maximumf %258, %259 : vector<16x1xf32>
    %261 = vector.broadcast %251 : vector<16x1xf32> to vector<16x32xf32>
    %262 = arith.subf %247, %261 : vector<16x32xf32>
    %cst_71 = arith.constant 9.99999974E-6 : f32
    %263 = vector.broadcast %cst_71 : f32 to vector<16x1xf32>
    %264 = arith.addf %260, %263 : vector<16x1xf32>
    %265 = math.rsqrt %264 : vector<16x1xf32>
    %266 = vector.broadcast %265 : vector<16x1xf32> to vector<16x32xf32>
    %267 = arith.mulf %262, %266 : vector<16x32xf32>
    %268 = vector.shape_cast %9 : vector<32xf32> to vector<1x32xf32>
    %269 = vector.broadcast %268 : vector<1x32xf32> to vector<16x32xf32>
    %270 = arith.mulf %267, %269 : vector<16x32xf32>
    %271 = vector.shape_cast %11 : vector<32xf32> to vector<1x32xf32>
    %272 = vector.broadcast %271 : vector<1x32xf32> to vector<16x32xf32>
    %273 = arith.addf %270, %272 : vector<16x32xf32>
    %274 = arith.truncf %273 : vector<16x32xf32> to vector<16x32xbf16>
    %cst_72 = arith.constant dense<0.000000e+00> : vector<16x128xf32>
    %275 = tpu.matmul %274, %25, %cst_72 {dimension_numbers = #tpu.dot_dimension_numbers<[1], [0], [0], [1], [0, 0, 1, 1], [], []>} : vector<16x32xbf16>, vector<32x128xbf16>, vector<16x128xf32> -> vector<16x128xf32>
    %276 = vector.shape_cast %19 : vector<128xf32> to vector<1x128xf32>
    %277 = vector.broadcast %276 : vector<1x128xf32> to vector<16x128xf32>
    %278 = arith.addf %275, %277 : vector<16x128xf32>
    %279 = arith.mulf %278, %278 : vector<16x128xf32>
    %280 = arith.mulf %278, %279 : vector<16x128xf32>
    %cst_73 = arith.constant 4.471500e-02 : f32
    %281 = vector.broadcast %cst_73 : f32 to vector<16x128xf32>
    %282 = arith.mulf %281, %280 : vector<16x128xf32>
    %283 = arith.addf %278, %282 : vector<16x128xf32>
    %cst_74 = arith.constant 0.797884583 : f32
    %284 = vector.broadcast %cst_74 : f32 to vector<16x128xf32>
    %285 = arith.mulf %284, %283 : vector<16x128xf32>
    %286 = math.tanh %285 : vector<16x128xf32>
    %cst_75 = arith.constant 1.000000e+00 : f32
    %287 = vector.broadcast %cst_75 : f32 to vector<16x128xf32>
    %288 = arith.addf %287, %286 : vector<16x128xf32>
    %cst_76 = arith.constant 5.000000e-01 : f32
    %289 = vector.broadcast %cst_76 : f32 to vector<16x128xf32>
    %290 = arith.mulf %289, %288 : vector<16x128xf32>
    %291 = arith.mulf %278, %290 : vector<16x128xf32>
    %292 = arith.truncf %291 : vector<16x128xf32> to vector<16x128xbf16>
    %cst_77 = arith.constant dense<0.000000e+00> : vector<16x32xf32>
    %293 = tpu.matmul %292, %27, %cst_77 {dimension_numbers = #tpu.dot_dimension_numbers<[1], [0], [0], [1], [0, 0, 1, 1], [], []>} : vector<16x128xbf16>, vector<128x32xbf16>, vector<16x32xf32> -> vector<16x32xf32>
    %294 = vector.shape_cast %15 : vector<32xf32> to vector<1x32xf32>
    %295 = vector.broadcast %294 : vector<1x32xf32> to vector<16x32xf32>
    %296 = arith.addf %293, %295 : vector<16x32xf32>
    %297 = arith.addf %247, %296 : vector<16x32xf32>
    %cst_78 = arith.constant 0.000000e+00 : f32
    %298 = vector.broadcast %cst_78 : f32 to vector<8x32xf32>
    %c16 = arith.constant 16 : index
    %c0_79 = arith.constant 0 : index
    %299 = vector.load %arg11[%c16, %c0_79] : memref<24x32xf32, #tpu.memory_space<vmem>>, vector<8x32xf32>
    tpu.vector_store %arg11[%c16, %c0_79], %298 {strides = array<i32>} : memref<24x32xf32, #tpu.memory_space<vmem>>, vector<8x32xf32>,
    %c0_80 = arith.constant 0 : index
    %c0_81 = arith.constant 0 : index
    %c0_82 = arith.constant 0 : index
    %300 = vector.load %arg2[%c0_80, %c0_81, %c0_82] : memref<1x8x32xf32, #tpu.memory_space<vmem>>, vector<1x8x32xf32>
    %301 = vector.shape_cast %300 : vector<1x8x32xf32> to vector<8x32xf32>
    %c0_83 = arith.constant 0 : index
    %c0_84 = arith.constant 0 : index
    %302 = vector.load %arg11[%c0_83, %c0_84] : memref<24x32xf32, #tpu.memory_space<vmem>>, vector<16x32xf32>
    tpu.vector_store %arg11[%c0_83, %c0_84], %297 {strides = array<i32>} : memref<24x32xf32, #tpu.memory_space<vmem>>, vector<16x32xf32>,
    %c0_85 = arith.constant 0 : index
    %c0_86 = arith.constant 0 : index
    %303 = tpu.strided_load %arg11[%c0_85, %c0_86] {strides = array<i32: 2, 1>} : memref<24x32xf32, #tpu.memory_space<vmem>>, vector<8x32xf32>
    %c1 = arith.constant 1 : index
    %c0_87 = arith.constant 0 : index
    %304 = tpu.strided_load %arg11[%c1, %c0_87] {strides = array<i32: 2, 1>} : memref<24x32xf32, #tpu.memory_space<vmem>>, vector<8x32xf32>
    %305 = arith.maximumf %303, %304 : vector<8x32xf32>
    %c2 = arith.constant 2 : index
    %c0_88 = arith.constant 0 : index
    %306 = tpu.strided_load %arg11[%c2, %c0_88] {strides = array<i32: 2, 1>} : memref<24x32xf32, #tpu.memory_space<vmem>>, vector<8x32xf32>
    %307 = arith.maximumf %305, %306 : vector<8x32xf32>
    %308 = arith.addf %307, %301 : vector<8x32xf32>
    %309 = tpu.iota {dimensions = array<i32: 1>} : vector<1x8xi32>
    %c7_i32 = arith.constant 7 : i32
    %310 = vector.broadcast %c7_i32 : i32 to vector<1x8xi32>
    %311 = arith.cmpi slt, %309, %310 : vector<1x8xi32>
    %cst_89 = arith.constant 0.000000e+00 : f32
    %cst_90 = arith.constant -1.000000e+30 : f32
    %312 = vector.broadcast %cst_89 : f32 to vector<1x8xf32>
    %313 = vector.broadcast %cst_90 : f32 to vector<1x8xf32>
    %314 = arith.select %311, %312, %313 : vector<1x8xi1>, vector<1x8xf32>
    %c1_i32 = arith.constant 1 : i32
    %315 = arith.index_cast %c1_i32 : i32 to index
    %c0_91 = arith.constant 0 : index
    %c0_92 = arith.constant 0 : index
    %316 = vector.load %arg3[%315, %c0_91, %c0_92] : memref<4x8x32xf32, #tpu.memory_space<vmem>>, vector<1x8x32xf32>
    %317 = vector.shape_cast %316 : vector<1x8x32xf32> to vector<8x32xf32>
    %318 = vector.extract_strided_slice %317 {offsets = [0, 0], sizes = [1, 32], strides = [1, 1]} : vector<8x32xf32> to vector<1x32xf32>
    %319 = vector.shape_cast %318 : vector<1x32xf32> to vector<32xf32>
    %320 = vector.extract_strided_slice %317 {offsets = [1, 0], sizes = [1, 32], strides = [1, 1]} : vector<8x32xf32> to vector<1x32xf32>
    %321 = vector.shape_cast %320 : vector<1x32xf32> to vector<32xf32>
    %322 = vector.extract_strided_slice %317 {offsets = [2, 0], sizes = [1, 32], strides = [1, 1]} : vector<8x32xf32> to vector<1x32xf32>
    %323 = vector.shape_cast %322 : vector<1x32xf32> to vector<32xf32>
    %324 = vector.extract_strided_slice %317 {offsets = [3, 0], sizes = [1, 32], strides = [1, 1]} : vector<8x32xf32> to vector<1x32xf32>
    %325 = vector.shape_cast %324 : vector<1x32xf32> to vector<32xf32>
    %326 = vector.extract_strided_slice %317 {offsets = [4, 0], sizes = [1, 32], strides = [1, 1]} : vector<8x32xf32> to vector<1x32xf32>
    %327 = vector.shape_cast %326 : vector<1x32xf32> to vector<32xf32>
    %328 = vector.extract_strided_slice %317 {offsets = [5, 0], sizes = [1, 32], strides = [1, 1]} : vector<8x32xf32> to vector<1x32xf32>
    %329 = vector.shape_cast %328 : vector<1x32xf32> to vector<32xf32>
    %330 = arith.index_cast %c1_i32 : i32 to index
    %c0_93 = arith.constant 0 : index
    %c0_94 = arith.constant 0 : index
    %331 = vector.load %arg4[%330, %c0_93, %c0_94] : memref<4x12x8xf32, #tpu.memory_space<vmem>>, vector<1x12x8xf32>
    %332 = vector.shape_cast %331 : vector<1x12x8xf32> to vector<12x8xf32>
    %333 = arith.index_cast %c1_i32 : i32 to index
    %c0_95 = arith.constant 0 : index
    %334 = vector.load %arg5[%333, %c0_95] : memref<4x128xf32, #tpu.memory_space<vmem>>, vector<1x128xf32>
    %335 = vector.shape_cast %334 : vector<1x128xf32> to vector<128xf32>
    %336 = arith.index_cast %c1_i32 : i32 to index
    %c0_96 = arith.constant 0 : index
    %c0_97 = arith.constant 0 : index
    %c0_98 = arith.constant 0 : index
    %337 = vector.load %arg6[%336, %c0_96, %c0_97, %c0_98] : memref<4x12x32x8xbf16, #tpu.memory_space<vmem>>, vector<1x12x32x8xbf16>
    %338 = vector.shape_cast %337 : vector<1x12x32x8xbf16> to vector<12x32x8xbf16>
    %339 = arith.index_cast %c1_i32 : i32 to index
    %c0_99 = arith.constant 0 : index
    %c0_100 = arith.constant 0 : index
    %c0_101 = arith.constant 0 : index
    %340 = vector.load %arg7[%339, %c0_99, %c0_100, %c0_101] : memref<4x4x8x32xbf16, #tpu.memory_space<vmem>>, vector<1x4x8x32xbf16>
    %341 = vector.shape_cast %340 : vector<1x4x8x32xbf16> to vector<4x8x32xbf16>
    %342 = arith.index_cast %c1_i32 : i32 to index
    %c0_102 = arith.constant 0 : index
    %c0_103 = arith.constant 0 : index
    %343 = vector.load %arg8[%342, %c0_102, %c0_103] : memref<4x32x128xbf16, #tpu.memory_space<vmem>>, vector<1x32x128xbf16>
    %344 = vector.shape_cast %343 : vector<1x32x128xbf16> to vector<32x128xbf16>
    %345 = arith.index_cast %c1_i32 : i32 to index
    %c0_104 = arith.constant 0 : index
    %c0_105 = arith.constant 0 : index
    %346 = vector.load %arg9[%345, %c0_104, %c0_105] : memref<4x128x32xbf16, #tpu.memory_space<vmem>>, vector<1x128x32xbf16>
    %347 = vector.shape_cast %346 : vector<1x128x32xbf16> to vector<128x32xbf16>
    %cst_106 = arith.constant dense<0.000000e+00> : vector<8xf32>
    %348 = vector.multi_reduction <add>, %308, %cst_106 [1] : vector<8x32xf32> to vector<8xf32>
    %349 = vector.shape_cast %348 : vector<8xf32> to vector<8x1xf32>
    %cst_107 = arith.constant 3.200000e+01 : f32
    %350 = vector.broadcast %cst_107 : f32 to vector<8x1xf32>
    %351 = arith.divf %349, %350 : vector<8x1xf32>
    %352 = arith.mulf %308, %308 : vector<8x32xf32>
    %cst_108 = arith.constant dense<0.000000e+00> : vector<8xf32>
    %353 = vector.multi_reduction <add>, %352, %cst_108 [1] : vector<8x32xf32> to vector<8xf32>
    %354 = vector.shape_cast %353 : vector<8xf32> to vector<8x1xf32>
    %cst_109 = arith.constant 3.200000e+01 : f32
    %355 = vector.broadcast %cst_109 : f32 to vector<8x1xf32>
    %356 = arith.divf %354, %355 : vector<8x1xf32>
    %357 = arith.mulf %351, %351 : vector<8x1xf32>
    %358 = arith.subf %356, %357 : vector<8x1xf32>
    %cst_110 = arith.constant 0.000000e+00 : f32
    %359 = vector.broadcast %cst_110 : f32 to vector<8x1xf32>
    %360 = arith.maximumf %358, %359 : vector<8x1xf32>
    %361 = vector.broadcast %351 : vector<8x1xf32> to vector<8x32xf32>
    %362 = arith.subf %308, %361 : vector<8x32xf32>
    %cst_111 = arith.constant 9.99999974E-6 : f32
    %363 = vector.broadcast %cst_111 : f32 to vector<8x1xf32>
    %364 = arith.addf %360, %363 : vector<8x1xf32>
    %365 = math.rsqrt %364 : vector<8x1xf32>
    %366 = vector.broadcast %365 : vector<8x1xf32> to vector<8x32xf32>
    %367 = arith.mulf %362, %366 : vector<8x32xf32>
    %368 = vector.shape_cast %319 : vector<32xf32> to vector<1x32xf32>
    %369 = vector.broadcast %368 : vector<1x32xf32> to vector<8x32xf32>
    %370 = arith.mulf %367, %369 : vector<8x32xf32>
    %371 = vector.shape_cast %321 : vector<32xf32> to vector<1x32xf32>
    %372 = vector.broadcast %371 : vector<1x32xf32> to vector<8x32xf32>
    %373 = arith.addf %370, %372 : vector<8x32xf32>
    %374 = arith.truncf %373 : vector<8x32xf32> to vector<8x32xbf16>
    %cst_112 = arith.constant 0.000000e+00 : f32
    %375 = vector.broadcast %cst_112 : f32 to vector<8x32xf32>
    %376 = vector.extract_strided_slice %338 {offsets = [0, 0, 0], sizes = [1, 32, 8], strides = [1, 1, 1]} : vector<12x32x8xbf16> to vector<1x32x8xbf16>
    %377 = vector.shape_cast %376 : vector<1x32x8xbf16> to vector<32x8xbf16>
    %cst_113 = arith.constant dense<0.000000e+00> : vector<8x8xf32>
    %378 = tpu.matmul %374, %377, %cst_113 {dimension_numbers = #tpu.dot_dimension_numbers<[1], [0], [0], [1], [0, 0, 1, 1], [], []>} : vector<8x32xbf16>, vector<32x8xbf16>, vector<8x8xf32> -> vector<8x8xf32>
    %379 = vector.extract_strided_slice %332 {offsets = [0, 0], sizes = [1, 8], strides = [1, 1]} : vector<12x8xf32> to vector<1x8xf32>
    %380 = vector.shape_cast %379 : vector<1x8xf32> to vector<8xf32>
    %381 = vector.shape_cast %380 : vector<8xf32> to vector<1x8xf32>
    %382 = vector.broadcast %381 : vector<1x8xf32> to vector<8x8xf32>
    %383 = arith.addf %378, %382 : vector<8x8xf32>
    %384 = vector.extract_strided_slice %338 {offsets = [4, 0, 0], sizes = [1, 32, 8], strides = [1, 1, 1]} : vector<12x32x8xbf16> to vector<1x32x8xbf16>
    %385 = vector.shape_cast %384 : vector<1x32x8xbf16> to vector<32x8xbf16>
    %cst_114 = arith.constant dense<0.000000e+00> : vector<8x8xf32>
    %386 = tpu.matmul %374, %385, %cst_114 {dimension_numbers = #tpu.dot_dimension_numbers<[1], [0], [0], [1], [0, 0, 1, 1], [], []>} : vector<8x32xbf16>, vector<32x8xbf16>, vector<8x8xf32> -> vector<8x8xf32>
    %387 = vector.extract_strided_slice %332 {offsets = [4, 0], sizes = [1, 8], strides = [1, 1]} : vector<12x8xf32> to vector<1x8xf32>
    %388 = vector.shape_cast %387 : vector<1x8xf32> to vector<8xf32>
    %389 = vector.shape_cast %388 : vector<8xf32> to vector<1x8xf32>
    %390 = vector.broadcast %389 : vector<1x8xf32> to vector<8x8xf32>
    %391 = arith.addf %386, %390 : vector<8x8xf32>
    %392 = vector.extract_strided_slice %338 {offsets = [8, 0, 0], sizes = [1, 32, 8], strides = [1, 1, 1]} : vector<12x32x8xbf16> to vector<1x32x8xbf16>
    %393 = vector.shape_cast %392 : vector<1x32x8xbf16> to vector<32x8xbf16>
    %cst_115 = arith.constant dense<0.000000e+00> : vector<8x8xf32>
    %394 = tpu.matmul %374, %393, %cst_115 {dimension_numbers = #tpu.dot_dimension_numbers<[1], [0], [0], [1], [0, 0, 1, 1], [], []>} : vector<8x32xbf16>, vector<32x8xbf16>, vector<8x8xf32> -> vector<8x8xf32>
    %395 = vector.extract_strided_slice %332 {offsets = [8, 0], sizes = [1, 8], strides = [1, 1]} : vector<12x8xf32> to vector<1x8xf32>
    %396 = vector.shape_cast %395 : vector<1x8xf32> to vector<8xf32>
    %397 = vector.shape_cast %396 : vector<8xf32> to vector<1x8xf32>
    %398 = vector.broadcast %397 : vector<1x8xf32> to vector<8x8xf32>
    %399 = arith.addf %394, %398 : vector<8x8xf32>
    %400 = arith.truncf %383 : vector<8x8xf32> to vector<8x8xbf16>
    %401 = arith.truncf %391 : vector<8x8xf32> to vector<8x8xbf16>
    %cst_116 = arith.constant dense<0.000000e+00> : vector<8x8xf32>
    %402 = tpu.matmul %400, %401, %cst_116 {dimension_numbers = #tpu.dot_dimension_numbers<[1], [1], [0], [0], [0, 0, 1, 0], [], []>} : vector<8x8xbf16>, vector<8x8xbf16>, vector<8x8xf32> -> vector<8x8xf32>
    %cst_117 = arith.constant 0.353553385 : f32
    %403 = vector.broadcast %cst_117 : f32 to vector<8x8xf32>
    %404 = arith.mulf %402, %403 : vector<8x8xf32>
    %405 = vector.broadcast %314 : vector<1x8xf32> to vector<8x8xf32>
    %406 = arith.addf %404, %405 : vector<8x8xf32>
    %cst_118 = arith.constant dense<0xFF800000> : vector<8xf32>
    %407 = vector.multi_reduction <maximumf>, %406, %cst_118 [1] : vector<8x8xf32> to vector<8xf32>
    %408 = vector.shape_cast %407 : vector<8xf32> to vector<8x1xf32>
    %409 = vector.broadcast %408 : vector<8x1xf32> to vector<8x8xf32>
    %410 = arith.subf %406, %409 : vector<8x8xf32>
    %411 = math.exp %410 : vector<8x8xf32>
    %cst_119 = arith.constant dense<0.000000e+00> : vector<8xf32>
    %412 = vector.multi_reduction <add>, %411, %cst_119 [1] : vector<8x8xf32> to vector<8xf32>
    %413 = vector.shape_cast %412 : vector<8xf32> to vector<8x1xf32>
    %414 = tpu.reciprocal %413 {approx = true} : vector<8x1xf32> -> vector<8x1xf32>
    %415 = vector.broadcast %414 : vector<8x1xf32> to vector<8x8xf32>
    %416 = arith.mulf %411, %415 : vector<8x8xf32>
    %417 = arith.truncf %416 : vector<8x8xf32> to vector<8x8xbf16>
    %418 = arith.truncf %399 : vector<8x8xf32> to vector<8x8xbf16>
    %cst_120 = arith.constant dense<0.000000e+00> : vector<8x8xf32>
    %419 = tpu.matmul %417, %418, %cst_120 {dimension_numbers = #tpu.dot_dimension_numbers<[1], [0], [0], [1], [0, 0, 1, 1], [], []>} : vector<8x8xbf16>, vector<8x8xbf16>, vector<8x8xf32> -> vector<8x8xf32>
    %420 = arith.truncf %419 : vector<8x8xf32> to vector<8x8xbf16>
    %421 = vector.extract_strided_slice %341 {offsets = [0, 0, 0], sizes = [1, 8, 32], strides = [1, 1, 1]} : vector<4x8x32xbf16> to vector<1x8x32xbf16>
    %422 = vector.shape_cast %421 : vector<1x8x32xbf16> to vector<8x32xbf16>
    %cst_121 = arith.constant dense<0.000000e+00> : vector<8x32xf32>
    %423 = tpu.matmul %420, %422, %cst_121 {dimension_numbers = #tpu.dot_dimension_numbers<[1], [0], [0], [1], [0, 0, 1, 1], [], []>} : vector<8x8xbf16>, vector<8x32xbf16>, vector<8x32xf32> -> vector<8x32xf32>
    %424 = arith.addf %375, %423 : vector<8x32xf32>
    %425 = vector.extract_strided_slice %338 {offsets = [1, 0, 0], sizes = [1, 32, 8], strides = [1, 1, 1]} : vector<12x32x8xbf16> to vector<1x32x8xbf16>
    %426 = vector.shape_cast %425 : vector<1x32x8xbf16> to vector<32x8xbf16>
    %cst_122 = arith.constant dense<0.000000e+00> : vector<8x8xf32>
    %427 = tpu.matmul %374, %426, %cst_122 {dimension_numbers = #tpu.dot_dimension_numbers<[1], [0], [0], [1], [0, 0, 1, 1], [], []>} : vector<8x32xbf16>, vector<32x8xbf16>, vector<8x8xf32> -> vector<8x8xf32>
    %428 = vector.extract_strided_slice %332 {offsets = [1, 0], sizes = [1, 8], strides = [1, 1]} : vector<12x8xf32> to vector<1x8xf32>
    %429 = vector.shape_cast %428 : vector<1x8xf32> to vector<8xf32>
    %430 = vector.shape_cast %429 : vector<8xf32> to vector<1x8xf32>
    %431 = vector.broadcast %430 : vector<1x8xf32> to vector<8x8xf32>
    %432 = arith.addf %427, %431 : vector<8x8xf32>
    %433 = vector.extract_strided_slice %338 {offsets = [5, 0, 0], sizes = [1, 32, 8], strides = [1, 1, 1]} : vector<12x32x8xbf16> to vector<1x32x8xbf16>
    %434 = vector.shape_cast %433 : vector<1x32x8xbf16> to vector<32x8xbf16>
    %cst_123 = arith.constant dense<0.000000e+00> : vector<8x8xf32>
    %435 = tpu.matmul %374, %434, %cst_123 {dimension_numbers = #tpu.dot_dimension_numbers<[1], [0], [0], [1], [0, 0, 1, 1], [], []>} : vector<8x32xbf16>, vector<32x8xbf16>, vector<8x8xf32> -> vector<8x8xf32>
    %436 = vector.extract_strided_slice %332 {offsets = [5, 0], sizes = [1, 8], strides = [1, 1]} : vector<12x8xf32> to vector<1x8xf32>
    %437 = vector.shape_cast %436 : vector<1x8xf32> to vector<8xf32>
    %438 = vector.shape_cast %437 : vector<8xf32> to vector<1x8xf32>
    %439 = vector.broadcast %438 : vector<1x8xf32> to vector<8x8xf32>
    %440 = arith.addf %435, %439 : vector<8x8xf32>
    %441 = vector.extract_strided_slice %338 {offsets = [9, 0, 0], sizes = [1, 32, 8], strides = [1, 1, 1]} : vector<12x32x8xbf16> to vector<1x32x8xbf16>
    %442 = vector.shape_cast %441 : vector<1x32x8xbf16> to vector<32x8xbf16>
    %cst_124 = arith.constant dense<0.000000e+00> : vector<8x8xf32>
    %443 = tpu.matmul %374, %442, %cst_124 {dimension_numbers = #tpu.dot_dimension_numbers<[1], [0], [0], [1], [0, 0, 1, 1], [], []>} : vector<8x32xbf16>, vector<32x8xbf16>, vector<8x8xf32> -> vector<8x8xf32>
    %444 = vector.extract_strided_slice %332 {offsets = [9, 0], sizes = [1, 8], strides = [1, 1]} : vector<12x8xf32> to vector<1x8xf32>
    %445 = vector.shape_cast %444 : vector<1x8xf32> to vector<8xf32>
    %446 = vector.shape_cast %445 : vector<8xf32> to vector<1x8xf32>
    %447 = vector.broadcast %446 : vector<1x8xf32> to vector<8x8xf32>
    %448 = arith.addf %443, %447 : vector<8x8xf32>
    %449 = arith.truncf %432 : vector<8x8xf32> to vector<8x8xbf16>
    %450 = arith.truncf %440 : vector<8x8xf32> to vector<8x8xbf16>
    %cst_125 = arith.constant dense<0.000000e+00> : vector<8x8xf32>
    %451 = tpu.matmul %449, %450, %cst_125 {dimension_numbers = #tpu.dot_dimension_numbers<[1], [1], [0], [0], [0, 0, 1, 0], [], []>} : vector<8x8xbf16>, vector<8x8xbf16>, vector<8x8xf32> -> vector<8x8xf32>
    %cst_126 = arith.constant 0.353553385 : f32
    %452 = vector.broadcast %cst_126 : f32 to vector<8x8xf32>
    %453 = arith.mulf %451, %452 : vector<8x8xf32>
    %454 = vector.broadcast %314 : vector<1x8xf32> to vector<8x8xf32>
    %455 = arith.addf %453, %454 : vector<8x8xf32>
    %cst_127 = arith.constant dense<0xFF800000> : vector<8xf32>
    %456 = vector.multi_reduction <maximumf>, %455, %cst_127 [1] : vector<8x8xf32> to vector<8xf32>
    %457 = vector.shape_cast %456 : vector<8xf32> to vector<8x1xf32>
    %458 = vector.broadcast %457 : vector<8x1xf32> to vector<8x8xf32>
    %459 = arith.subf %455, %458 : vector<8x8xf32>
    %460 = math.exp %459 : vector<8x8xf32>
    %cst_128 = arith.constant dense<0.000000e+00> : vector<8xf32>
    %461 = vector.multi_reduction <add>, %460, %cst_128 [1] : vector<8x8xf32> to vector<8xf32>
    %462 = vector.shape_cast %461 : vector<8xf32> to vector<8x1xf32>
    %463 = tpu.reciprocal %462 {approx = true} : vector<8x1xf32> -> vector<8x1xf32>
    %464 = vector.broadcast %463 : vector<8x1xf32> to vector<8x8xf32>
    %465 = arith.mulf %460, %464 : vector<8x8xf32>
    %466 = arith.truncf %465 : vector<8x8xf32> to vector<8x8xbf16>
    %467 = arith.truncf %448 : vector<8x8xf32> to vector<8x8xbf16>
    %cst_129 = arith.constant dense<0.000000e+00> : vector<8x8xf32>
    %468 = tpu.matmul %466, %467, %cst_129 {dimension_numbers = #tpu.dot_dimension_numbers<[1], [0], [0], [1], [0, 0, 1, 1], [], []>} : vector<8x8xbf16>, vector<8x8xbf16>, vector<8x8xf32> -> vector<8x8xf32>
    %469 = arith.truncf %468 : vector<8x8xf32> to vector<8x8xbf16>
    %470 = vector.extract_strided_slice %341 {offsets = [1, 0, 0], sizes = [1, 8, 32], strides = [1, 1, 1]} : vector<4x8x32xbf16> to vector<1x8x32xbf16>
    %471 = vector.shape_cast %470 : vector<1x8x32xbf16> to vector<8x32xbf16>
    %cst_130 = arith.constant dense<0.000000e+00> : vector<8x32xf32>
    %472 = tpu.matmul %469, %471, %cst_130 {dimension_numbers = #tpu.dot_dimension_numbers<[1], [0], [0], [1], [0, 0, 1, 1], [], []>} : vector<8x8xbf16>, vector<8x32xbf16>, vector<8x32xf32> -> vector<8x32xf32>
    %473 = arith.addf %424, %472 : vector<8x32xf32>
    %474 = vector.extract_strided_slice %338 {offsets = [2, 0, 0], sizes = [1, 32, 8], strides = [1, 1, 1]} : vector<12x32x8xbf16> to vector<1x32x8xbf16>
    %475 = vector.shape_cast %474 : vector<1x32x8xbf16> to vector<32x8xbf16>
    %cst_131 = arith.constant dense<0.000000e+00> : vector<8x8xf32>
    %476 = tpu.matmul %374, %475, %cst_131 {dimension_numbers = #tpu.dot_dimension_numbers<[1], [0], [0], [1], [0, 0, 1, 1], [], []>} : vector<8x32xbf16>, vector<32x8xbf16>, vector<8x8xf32> -> vector<8x8xf32>
    %477 = vector.extract_strided_slice %332 {offsets = [2, 0], sizes = [1, 8], strides = [1, 1]} : vector<12x8xf32> to vector<1x8xf32>
    %478 = vector.shape_cast %477 : vector<1x8xf32> to vector<8xf32>
    %479 = vector.shape_cast %478 : vector<8xf32> to vector<1x8xf32>
    %480 = vector.broadcast %479 : vector<1x8xf32> to vector<8x8xf32>
    %481 = arith.addf %476, %480 : vector<8x8xf32>
    %482 = vector.extract_strided_slice %338 {offsets = [6, 0, 0], sizes = [1, 32, 8], strides = [1, 1, 1]} : vector<12x32x8xbf16> to vector<1x32x8xbf16>
    %483 = vector.shape_cast %482 : vector<1x32x8xbf16> to vector<32x8xbf16>
    %cst_132 = arith.constant dense<0.000000e+00> : vector<8x8xf32>
    %484 = tpu.matmul %374, %483, %cst_132 {dimension_numbers = #tpu.dot_dimension_numbers<[1], [0], [0], [1], [0, 0, 1, 1], [], []>} : vector<8x32xbf16>, vector<32x8xbf16>, vector<8x8xf32> -> vector<8x8xf32>
    %485 = vector.extract_strided_slice %332 {offsets = [6, 0], sizes = [1, 8], strides = [1, 1]} : vector<12x8xf32> to vector<1x8xf32>
    %486 = vector.shape_cast %485 : vector<1x8xf32> to vector<8xf32>
    %487 = vector.shape_cast %486 : vector<8xf32> to vector<1x8xf32>
    %488 = vector.broadcast %487 : vector<1x8xf32> to vector<8x8xf32>
    %489 = arith.addf %484, %488 : vector<8x8xf32>
    %490 = vector.extract_strided_slice %338 {offsets = [10, 0, 0], sizes = [1, 32, 8], strides = [1, 1, 1]} : vector<12x32x8xbf16> to vector<1x32x8xbf16>
    %491 = vector.shape_cast %490 : vector<1x32x8xbf16> to vector<32x8xbf16>
    %cst_133 = arith.constant dense<0.000000e+00> : vector<8x8xf32>
    %492 = tpu.matmul %374, %491, %cst_133 {dimension_numbers = #tpu.dot_dimension_numbers<[1], [0], [0], [1], [0, 0, 1, 1], [], []>} : vector<8x32xbf16>, vector<32x8xbf16>, vector<8x8xf32> -> vector<8x8xf32>
    %493 = vector.extract_strided_slice %332 {offsets = [10, 0], sizes = [1, 8], strides = [1, 1]} : vector<12x8xf32> to vector<1x8xf32>
    %494 = vector.shape_cast %493 : vector<1x8xf32> to vector<8xf32>
    %495 = vector.shape_cast %494 : vector<8xf32> to vector<1x8xf32>
    %496 = vector.broadcast %495 : vector<1x8xf32> to vector<8x8xf32>
    %497 = arith.addf %492, %496 : vector<8x8xf32>
    %498 = arith.truncf %481 : vector<8x8xf32> to vector<8x8xbf16>
    %499 = arith.truncf %489 : vector<8x8xf32> to vector<8x8xbf16>
    %cst_134 = arith.constant dense<0.000000e+00> : vector<8x8xf32>
    %500 = tpu.matmul %498, %499, %cst_134 {dimension_numbers = #tpu.dot_dimension_numbers<[1], [1], [0], [0], [0, 0, 1, 0], [], []>} : vector<8x8xbf16>, vector<8x8xbf16>, vector<8x8xf32> -> vector<8x8xf32>
    %cst_135 = arith.constant 0.353553385 : f32
    %501 = vector.broadcast %cst_135 : f32 to vector<8x8xf32>
    %502 = arith.mulf %500, %501 : vector<8x8xf32>
    %503 = vector.broadcast %314 : vector<1x8xf32> to vector<8x8xf32>
    %504 = arith.addf %502, %503 : vector<8x8xf32>
    %cst_136 = arith.constant dense<0xFF800000> : vector<8xf32>
    %505 = vector.multi_reduction <maximumf>, %504, %cst_136 [1] : vector<8x8xf32> to vector<8xf32>
    %506 = vector.shape_cast %505 : vector<8xf32> to vector<8x1xf32>
    %507 = vector.broadcast %506 : vector<8x1xf32> to vector<8x8xf32>
    %508 = arith.subf %504, %507 : vector<8x8xf32>
    %509 = math.exp %508 : vector<8x8xf32>
    %cst_137 = arith.constant dense<0.000000e+00> : vector<8xf32>
    %510 = vector.multi_reduction <add>, %509, %cst_137 [1] : vector<8x8xf32> to vector<8xf32>
    %511 = vector.shape_cast %510 : vector<8xf32> to vector<8x1xf32>
    %512 = tpu.reciprocal %511 {approx = true} : vector<8x1xf32> -> vector<8x1xf32>
    %513 = vector.broadcast %512 : vector<8x1xf32> to vector<8x8xf32>
    %514 = arith.mulf %509, %513 : vector<8x8xf32>
    %515 = arith.truncf %514 : vector<8x8xf32> to vector<8x8xbf16>
    %516 = arith.truncf %497 : vector<8x8xf32> to vector<8x8xbf16>
    %cst_138 = arith.constant dense<0.000000e+00> : vector<8x8xf32>
    %517 = tpu.matmul %515, %516, %cst_138 {dimension_numbers = #tpu.dot_dimension_numbers<[1], [0], [0], [1], [0, 0, 1, 1], [], []>} : vector<8x8xbf16>, vector<8x8xbf16>, vector<8x8xf32> -> vector<8x8xf32>
    %518 = arith.truncf %517 : vector<8x8xf32> to vector<8x8xbf16>
    %519 = vector.extract_strided_slice %341 {offsets = [2, 0, 0], sizes = [1, 8, 32], strides = [1, 1, 1]} : vector<4x8x32xbf16> to vector<1x8x32xbf16>
    %520 = vector.shape_cast %519 : vector<1x8x32xbf16> to vector<8x32xbf16>
    %cst_139 = arith.constant dense<0.000000e+00> : vector<8x32xf32>
    %521 = tpu.matmul %518, %520, %cst_139 {dimension_numbers = #tpu.dot_dimension_numbers<[1], [0], [0], [1], [0, 0, 1, 1], [], []>} : vector<8x8xbf16>, vector<8x32xbf16>, vector<8x32xf32> -> vector<8x32xf32>
    %522 = arith.addf %473, %521 : vector<8x32xf32>
    %523 = vector.extract_strided_slice %338 {offsets = [3, 0, 0], sizes = [1, 32, 8], strides = [1, 1, 1]} : vector<12x32x8xbf16> to vector<1x32x8xbf16>
    %524 = vector.shape_cast %523 : vector<1x32x8xbf16> to vector<32x8xbf16>
    %cst_140 = arith.constant dense<0.000000e+00> : vector<8x8xf32>
    %525 = tpu.matmul %374, %524, %cst_140 {dimension_numbers = #tpu.dot_dimension_numbers<[1], [0], [0], [1], [0, 0, 1, 1], [], []>} : vector<8x32xbf16>, vector<32x8xbf16>, vector<8x8xf32> -> vector<8x8xf32>
    %526 = vector.extract_strided_slice %332 {offsets = [3, 0], sizes = [1, 8], strides = [1, 1]} : vector<12x8xf32> to vector<1x8xf32>
    %527 = vector.shape_cast %526 : vector<1x8xf32> to vector<8xf32>
    %528 = vector.shape_cast %527 : vector<8xf32> to vector<1x8xf32>
    %529 = vector.broadcast %528 : vector<1x8xf32> to vector<8x8xf32>
    %530 = arith.addf %525, %529 : vector<8x8xf32>
    %531 = vector.extract_strided_slice %338 {offsets = [7, 0, 0], sizes = [1, 32, 8], strides = [1, 1, 1]} : vector<12x32x8xbf16> to vector<1x32x8xbf16>
    %532 = vector.shape_cast %531 : vector<1x32x8xbf16> to vector<32x8xbf16>
    %cst_141 = arith.constant dense<0.000000e+00> : vector<8x8xf32>
    %533 = tpu.matmul %374, %532, %cst_141 {dimension_numbers = #tpu.dot_dimension_numbers<[1], [0], [0], [1], [0, 0, 1, 1], [], []>} : vector<8x32xbf16>, vector<32x8xbf16>, vector<8x8xf32> -> vector<8x8xf32>
    %534 = vector.extract_strided_slice %332 {offsets = [7, 0], sizes = [1, 8], strides = [1, 1]} : vector<12x8xf32> to vector<1x8xf32>
    %535 = vector.shape_cast %534 : vector<1x8xf32> to vector<8xf32>
    %536 = vector.shape_cast %535 : vector<8xf32> to vector<1x8xf32>
    %537 = vector.broadcast %536 : vector<1x8xf32> to vector<8x8xf32>
    %538 = arith.addf %533, %537 : vector<8x8xf32>
    %539 = vector.extract_strided_slice %338 {offsets = [11, 0, 0], sizes = [1, 32, 8], strides = [1, 1, 1]} : vector<12x32x8xbf16> to vector<1x32x8xbf16>
    %540 = vector.shape_cast %539 : vector<1x32x8xbf16> to vector<32x8xbf16>
    %cst_142 = arith.constant dense<0.000000e+00> : vector<8x8xf32>
    %541 = tpu.matmul %374, %540, %cst_142 {dimension_numbers = #tpu.dot_dimension_numbers<[1], [0], [0], [1], [0, 0, 1, 1], [], []>} : vector<8x32xbf16>, vector<32x8xbf16>, vector<8x8xf32> -> vector<8x8xf32>
    %542 = vector.extract_strided_slice %332 {offsets = [11, 0], sizes = [1, 8], strides = [1, 1]} : vector<12x8xf32> to vector<1x8xf32>
    %543 = vector.shape_cast %542 : vector<1x8xf32> to vector<8xf32>
    %544 = vector.shape_cast %543 : vector<8xf32> to vector<1x8xf32>
    %545 = vector.broadcast %544 : vector<1x8xf32> to vector<8x8xf32>
    %546 = arith.addf %541, %545 : vector<8x8xf32>
    %547 = arith.truncf %530 : vector<8x8xf32> to vector<8x8xbf16>
    %548 = arith.truncf %538 : vector<8x8xf32> to vector<8x8xbf16>
    %cst_143 = arith.constant dense<0.000000e+00> : vector<8x8xf32>
    %549 = tpu.matmul %547, %548, %cst_143 {dimension_numbers = #tpu.dot_dimension_numbers<[1], [1], [0], [0], [0, 0, 1, 0], [], []>} : vector<8x8xbf16>, vector<8x8xbf16>, vector<8x8xf32> -> vector<8x8xf32>
    %cst_144 = arith.constant 0.353553385 : f32
    %550 = vector.broadcast %cst_144 : f32 to vector<8x8xf32>
    %551 = arith.mulf %549, %550 : vector<8x8xf32>
    %552 = vector.broadcast %314 : vector<1x8xf32> to vector<8x8xf32>
    %553 = arith.addf %551, %552 : vector<8x8xf32>
    %cst_145 = arith.constant dense<0xFF800000> : vector<8xf32>
    %554 = vector.multi_reduction <maximumf>, %553, %cst_145 [1] : vector<8x8xf32> to vector<8xf32>
    %555 = vector.shape_cast %554 : vector<8xf32> to vector<8x1xf32>
    %556 = vector.broadcast %555 : vector<8x1xf32> to vector<8x8xf32>
    %557 = arith.subf %553, %556 : vector<8x8xf32>
    %558 = math.exp %557 : vector<8x8xf32>
    %cst_146 = arith.constant dense<0.000000e+00> : vector<8xf32>
    %559 = vector.multi_reduction <add>, %558, %cst_146 [1] : vector<8x8xf32> to vector<8xf32>
    %560 = vector.shape_cast %559 : vector<8xf32> to vector<8x1xf32>
    %561 = tpu.reciprocal %560 {approx = true} : vector<8x1xf32> -> vector<8x1xf32>
    %562 = vector.broadcast %561 : vector<8x1xf32> to vector<8x8xf32>
    %563 = arith.mulf %558, %562 : vector<8x8xf32>
    %564 = arith.truncf %563 : vector<8x8xf32> to vector<8x8xbf16>
    %565 = arith.truncf %546 : vector<8x8xf32> to vector<8x8xbf16>
    %cst_147 = arith.constant dense<0.000000e+00> : vector<8x8xf32>
    %566 = tpu.matmul %564, %565, %cst_147 {dimension_numbers = #tpu.dot_dimension_numbers<[1], [0], [0], [1], [0, 0, 1, 1], [], []>} : vector<8x8xbf16>, vector<8x8xbf16>, vector<8x8xf32> -> vector<8x8xf32>
    %567 = arith.truncf %566 : vector<8x8xf32> to vector<8x8xbf16>
    %568 = vector.extract_strided_slice %341 {offsets = [3, 0, 0], sizes = [1, 8, 32], strides = [1, 1, 1]} : vector<4x8x32xbf16> to vector<1x8x32xbf16>
    %569 = vector.shape_cast %568 : vector<1x8x32xbf16> to vector<8x32xbf16>
    %cst_148 = arith.constant dense<0.000000e+00> : vector<8x32xf32>
    %570 = tpu.matmul %567, %569, %cst_148 {dimension_numbers = #tpu.dot_dimension_numbers<[1], [0], [0], [1], [0, 0, 1, 1], [], []>} : vector<8x8xbf16>, vector<8x32xbf16>, vector<8x32xf32> -> vector<8x32xf32>
    %571 = arith.addf %522, %570 : vector<8x32xf32>
    %572 = arith.addf %308, %571 : vector<8x32xf32>
    %573 = vector.shape_cast %327 : vector<32xf32> to vector<1x32xf32>
    %574 = vector.broadcast %573 : vector<1x32xf32> to vector<8x32xf32>
    %575 = arith.addf %572, %574 : vector<8x32xf32>
    %cst_149 = arith.constant dense<0.000000e+00> : vector<8xf32>
    %576 = vector.multi_reduction <add>, %575, %cst_149 [1] : vector<8x32xf32> to vector<8xf32>
    %577 = vector.shape_cast %576 : vector<8xf32> to vector<8x1xf32>
    %cst_150 = arith.constant 3.200000e+01 : f32
    %578 = vector.broadcast %cst_150 : f32 to vector<8x1xf32>
    %579 = arith.divf %577, %578 : vector<8x1xf32>
    %580 = arith.mulf %575, %575 : vector<8x32xf32>
    %cst_151 = arith.constant dense<0.000000e+00> : vector<8xf32>
    %581 = vector.multi_reduction <add>, %580, %cst_151 [1] : vector<8x32xf32> to vector<8xf32>
    %582 = vector.shape_cast %581 : vector<8xf32> to vector<8x1xf32>
    %cst_152 = arith.constant 3.200000e+01 : f32
    %583 = vector.broadcast %cst_152 : f32 to vector<8x1xf32>
    %584 = arith.divf %582, %583 : vector<8x1xf32>
    %585 = arith.mulf %579, %579 : vector<8x1xf32>
    %586 = arith.subf %584, %585 : vector<8x1xf32>
    %cst_153 = arith.constant 0.000000e+00 : f32
    %587 = vector.broadcast %cst_153 : f32 to vector<8x1xf32>
    %588 = arith.maximumf %586, %587 : vector<8x1xf32>
    %589 = vector.broadcast %579 : vector<8x1xf32> to vector<8x32xf32>
    %590 = arith.subf %575, %589 : vector<8x32xf32>
    %cst_154 = arith.constant 9.99999974E-6 : f32
    %591 = vector.broadcast %cst_154 : f32 to vector<8x1xf32>
    %592 = arith.addf %588, %591 : vector<8x1xf32>
    %593 = math.rsqrt %592 : vector<8x1xf32>
    %594 = vector.broadcast %593 : vector<8x1xf32> to vector<8x32xf32>
    %595 = arith.mulf %590, %594 : vector<8x32xf32>
    %596 = vector.shape_cast %323 : vector<32xf32> to vector<1x32xf32>
    %597 = vector.broadcast %596 : vector<1x32xf32> to vector<8x32xf32>
    %598 = arith.mulf %595, %597 : vector<8x32xf32>
    %599 = vector.shape_cast %325 : vector<32xf32> to vector<1x32xf32>
    %600 = vector.broadcast %599 : vector<1x32xf32> to vector<8x32xf32>
    %601 = arith.addf %598, %600 : vector<8x32xf32>
    %602 = arith.truncf %601 : vector<8x32xf32> to vector<8x32xbf16>
    %cst_155 = arith.constant dense<0.000000e+00> : vector<8x128xf32>
    %603 = tpu.matmul %602, %344, %cst_155 {dimension_numbers = #tpu.dot_dimension_numbers<[1], [0], [0], [1], [0, 0, 1, 1], [], []>} : vector<8x32xbf16>, vector<32x128xbf16>, vector<8x128xf32> -> vector<8x128xf32>
    %604 = vector.shape_cast %335 : vector<128xf32> to vector<1x128xf32>
    %605 = vector.broadcast %604 : vector<1x128xf32> to vector<8x128xf32>
    %606 = arith.addf %603, %605 : vector<8x128xf32>
    %607 = arith.mulf %606, %606 : vector<8x128xf32>
    %608 = arith.mulf %606, %607 : vector<8x128xf32>
    %cst_156 = arith.constant 4.471500e-02 : f32
    %609 = vector.broadcast %cst_156 : f32 to vector<8x128xf32>
    %610 = arith.mulf %609, %608 : vector<8x128xf32>
    %611 = arith.addf %606, %610 : vector<8x128xf32>
    %cst_157 = arith.constant 0.797884583 : f32
    %612 = vector.broadcast %cst_157 : f32 to vector<8x128xf32>
    %613 = arith.mulf %612, %611 : vector<8x128xf32>
    %614 = math.tanh %613 : vector<8x128xf32>
    %cst_158 = arith.constant 1.000000e+00 : f32
    %615 = vector.broadcast %cst_158 : f32 to vector<8x128xf32>
    %616 = arith.addf %615, %614 : vector<8x128xf32>
    %cst_159 = arith.constant 5.000000e-01 : f32
    %617 = vector.broadcast %cst_159 : f32 to vector<8x128xf32>
    %618 = arith.mulf %617, %616 : vector<8x128xf32>
    %619 = arith.mulf %606, %618 : vector<8x128xf32>
    %620 = arith.truncf %619 : vector<8x128xf32> to vector<8x128xbf16>
    %cst_160 = arith.constant dense<0.000000e+00> : vector<8x32xf32>
    %621 = tpu.matmul %620, %347, %cst_160 {dimension_numbers = #tpu.dot_dimension_numbers<[1], [0], [0], [1], [0, 0, 1, 1], [], []>} : vector<8x128xbf16>, vector<128x32xbf16>, vector<8x32xf32> -> vector<8x32xf32>
    %622 = vector.shape_cast %329 : vector<32xf32> to vector<1x32xf32>
    %623 = vector.broadcast %622 : vector<1x32xf32> to vector<8x32xf32>
    %624 = arith.addf %621, %623 : vector<8x32xf32>
    %625 = arith.addf %575, %624 : vector<8x32xf32>
    %c2_i32 = arith.constant 2 : i32
    %626 = arith.index_cast %c2_i32 : i32 to index
    %c0_161 = arith.constant 0 : index
    %c0_162 = arith.constant 0 : index
    %627 = vector.load %arg3[%626, %c0_161, %c0_162] : memref<4x8x32xf32, #tpu.memory_space<vmem>>, vector<1x8x32xf32>
    %628 = vector.shape_cast %627 : vector<1x8x32xf32> to vector<8x32xf32>
    %629 = vector.extract_strided_slice %628 {offsets = [0, 0], sizes = [1, 32], strides = [1, 1]} : vector<8x32xf32> to vector<1x32xf32>
    %630 = vector.shape_cast %629 : vector<1x32xf32> to vector<32xf32>
    %631 = vector.extract_strided_slice %628 {offsets = [1, 0], sizes = [1, 32], strides = [1, 1]} : vector<8x32xf32> to vector<1x32xf32>
    %632 = vector.shape_cast %631 : vector<1x32xf32> to vector<32xf32>
    %633 = vector.extract_strided_slice %628 {offsets = [2, 0], sizes = [1, 32], strides = [1, 1]} : vector<8x32xf32> to vector<1x32xf32>
    %634 = vector.shape_cast %633 : vector<1x32xf32> to vector<32xf32>
    %635 = vector.extract_strided_slice %628 {offsets = [3, 0], sizes = [1, 32], strides = [1, 1]} : vector<8x32xf32> to vector<1x32xf32>
    %636 = vector.shape_cast %635 : vector<1x32xf32> to vector<32xf32>
    %637 = vector.extract_strided_slice %628 {offsets = [4, 0], sizes = [1, 32], strides = [1, 1]} : vector<8x32xf32> to vector<1x32xf32>
    %638 = vector.shape_cast %637 : vector<1x32xf32> to vector<32xf32>
    %639 = vector.extract_strided_slice %628 {offsets = [5, 0], sizes = [1, 32], strides = [1, 1]} : vector<8x32xf32> to vector<1x32xf32>
    %640 = vector.shape_cast %639 : vector<1x32xf32> to vector<32xf32>
    %641 = arith.index_cast %c2_i32 : i32 to index
    %c0_163 = arith.constant 0 : index
    %c0_164 = arith.constant 0 : index
    %642 = vector.load %arg4[%641, %c0_163, %c0_164] : memref<4x12x8xf32, #tpu.memory_space<vmem>>, vector<1x12x8xf32>
    %643 = vector.shape_cast %642 : vector<1x12x8xf32> to vector<12x8xf32>
    %644 = arith.index_cast %c2_i32 : i32 to index
    %c0_165 = arith.constant 0 : index
    %645 = vector.load %arg5[%644, %c0_165] : memref<4x128xf32, #tpu.memory_space<vmem>>, vector<1x128xf32>
    %646 = vector.shape_cast %645 : vector<1x128xf32> to vector<128xf32>
    %647 = arith.index_cast %c2_i32 : i32 to index
    %c0_166 = arith.constant 0 : index
    %c0_167 = arith.constant 0 : index
    %c0_168 = arith.constant 0 : index
    %648 = vector.load %arg6[%647, %c0_166, %c0_167, %c0_168] : memref<4x12x32x8xbf16, #tpu.memory_space<vmem>>, vector<1x12x32x8xbf16>
    %649 = vector.shape_cast %648 : vector<1x12x32x8xbf16> to vector<12x32x8xbf16>
    %650 = arith.index_cast %c2_i32 : i32 to index
    %c0_169 = arith.constant 0 : index
    %c0_170 = arith.constant 0 : index
    %c0_171 = arith.constant 0 : index
    %651 = vector.load %arg7[%650, %c0_169, %c0_170, %c0_171] : memref<4x4x8x32xbf16, #tpu.memory_space<vmem>>, vector<1x4x8x32xbf16>
    %652 = vector.shape_cast %651 : vector<1x4x8x32xbf16> to vector<4x8x32xbf16>
    %653 = arith.index_cast %c2_i32 : i32 to index
    %c0_172 = arith.constant 0 : index
    %c0_173 = arith.constant 0 : index
    %654 = vector.load %arg8[%653, %c0_172, %c0_173] : memref<4x32x128xbf16, #tpu.memory_space<vmem>>, vector<1x32x128xbf16>
    %655 = vector.shape_cast %654 : vector<1x32x128xbf16> to vector<32x128xbf16>
    %656 = arith.index_cast %c2_i32 : i32 to index
    %c0_174 = arith.constant 0 : index
    %c0_175 = arith.constant 0 : index
    %657 = vector.load %arg9[%656, %c0_174, %c0_175] : memref<4x128x32xbf16, #tpu.memory_space<vmem>>, vector<1x128x32xbf16>
    %658 = vector.shape_cast %657 : vector<1x128x32xbf16> to vector<128x32xbf16>
    %cst_176 = arith.constant dense<0.000000e+00> : vector<8xf32>
    %659 = vector.multi_reduction <add>, %625, %cst_176 [1] : vector<8x32xf32> to vector<8xf32>
    %660 = vector.shape_cast %659 : vector<8xf32> to vector<8x1xf32>
    %cst_177 = arith.constant 3.200000e+01 : f32
    %661 = vector.broadcast %cst_177 : f32 to vector<8x1xf32>
    %662 = arith.divf %660, %661 : vector<8x1xf32>
    %663 = arith.mulf %625, %625 : vector<8x32xf32>
    %cst_178 = arith.constant dense<0.000000e+00> : vector<8xf32>
    %664 = vector.multi_reduction <add>, %663, %cst_178 [1] : vector<8x32xf32> to vector<8xf32>
    %665 = vector.shape_cast %664 : vector<8xf32> to vector<8x1xf32>
    %cst_179 = arith.constant 3.200000e+01 : f32
    %666 = vector.broadcast %cst_179 : f32 to vector<8x1xf32>
    %667 = arith.divf %665, %666 : vector<8x1xf32>
    %668 = arith.mulf %662, %662 : vector<8x1xf32>
    %669 = arith.subf %667, %668 : vector<8x1xf32>
    %cst_180 = arith.constant 0.000000e+00 : f32
    %670 = vector.broadcast %cst_180 : f32 to vector<8x1xf32>
    %671 = arith.maximumf %669, %670 : vector<8x1xf32>
    %672 = vector.broadcast %662 : vector<8x1xf32> to vector<8x32xf32>
    %673 = arith.subf %625, %672 : vector<8x32xf32>
    %cst_181 = arith.constant 9.99999974E-6 : f32
    %674 = vector.broadcast %cst_181 : f32 to vector<8x1xf32>
    %675 = arith.addf %671, %674 : vector<8x1xf32>
    %676 = math.rsqrt %675 : vector<8x1xf32>
    %677 = vector.broadcast %676 : vector<8x1xf32> to vector<8x32xf32>
    %678 = arith.mulf %673, %677 : vector<8x32xf32>
    %679 = vector.shape_cast %630 : vector<32xf32> to vector<1x32xf32>
    %680 = vector.broadcast %679 : vector<1x32xf32> to vector<8x32xf32>
    %681 = arith.mulf %678, %680 : vector<8x32xf32>
    %682 = vector.shape_cast %632 : vector<32xf32> to vector<1x32xf32>
    %683 = vector.broadcast %682 : vector<1x32xf32> to vector<8x32xf32>
    %684 = arith.addf %681, %683 : vector<8x32xf32>
    %685 = arith.truncf %684 : vector<8x32xf32> to vector<8x32xbf16>
    %cst_182 = arith.constant 0.000000e+00 : f32
    %686 = vector.broadcast %cst_182 : f32 to vector<8x32xf32>
    %687 = vector.extract_strided_slice %649 {offsets = [0, 0, 0], sizes = [1, 32, 8], strides = [1, 1, 1]} : vector<12x32x8xbf16> to vector<1x32x8xbf16>
    %688 = vector.shape_cast %687 : vector<1x32x8xbf16> to vector<32x8xbf16>
    %cst_183 = arith.constant dense<0.000000e+00> : vector<8x8xf32>
    %689 = tpu.matmul %685, %688, %cst_183 {dimension_numbers = #tpu.dot_dimension_numbers<[1], [0], [0], [1], [0, 0, 1, 1], [], []>} : vector<8x32xbf16>, vector<32x8xbf16>, vector<8x8xf32> -> vector<8x8xf32>
    %690 = vector.extract_strided_slice %643 {offsets = [0, 0], sizes = [1, 8], strides = [1, 1]} : vector<12x8xf32> to vector<1x8xf32>
    %691 = vector.shape_cast %690 : vector<1x8xf32> to vector<8xf32>
    %692 = vector.shape_cast %691 : vector<8xf32> to vector<1x8xf32>
    %693 = vector.broadcast %692 : vector<1x8xf32> to vector<8x8xf32>
    %694 = arith.addf %689, %693 : vector<8x8xf32>
    %695 = vector.extract_strided_slice %649 {offsets = [4, 0, 0], sizes = [1, 32, 8], strides = [1, 1, 1]} : vector<12x32x8xbf16> to vector<1x32x8xbf16>
    %696 = vector.shape_cast %695 : vector<1x32x8xbf16> to vector<32x8xbf16>
    %cst_184 = arith.constant dense<0.000000e+00> : vector<8x8xf32>
    %697 = tpu.matmul %685, %696, %cst_184 {dimension_numbers = #tpu.dot_dimension_numbers<[1], [0], [0], [1], [0, 0, 1, 1], [], []>} : vector<8x32xbf16>, vector<32x8xbf16>, vector<8x8xf32> -> vector<8x8xf32>
    %698 = vector.extract_strided_slice %643 {offsets = [4, 0], sizes = [1, 8], strides = [1, 1]} : vector<12x8xf32> to vector<1x8xf32>
    %699 = vector.shape_cast %698 : vector<1x8xf32> to vector<8xf32>
    %700 = vector.shape_cast %699 : vector<8xf32> to vector<1x8xf32>
    %701 = vector.broadcast %700 : vector<1x8xf32> to vector<8x8xf32>
    %702 = arith.addf %697, %701 : vector<8x8xf32>
    %703 = vector.extract_strided_slice %649 {offsets = [8, 0, 0], sizes = [1, 32, 8], strides = [1, 1, 1]} : vector<12x32x8xbf16> to vector<1x32x8xbf16>
    %704 = vector.shape_cast %703 : vector<1x32x8xbf16> to vector<32x8xbf16>
    %cst_185 = arith.constant dense<0.000000e+00> : vector<8x8xf32>
    %705 = tpu.matmul %685, %704, %cst_185 {dimension_numbers = #tpu.dot_dimension_numbers<[1], [0], [0], [1], [0, 0, 1, 1], [], []>} : vector<8x32xbf16>, vector<32x8xbf16>, vector<8x8xf32> -> vector<8x8xf32>
    %706 = vector.extract_strided_slice %643 {offsets = [8, 0], sizes = [1, 8], strides = [1, 1]} : vector<12x8xf32> to vector<1x8xf32>
    %707 = vector.shape_cast %706 : vector<1x8xf32> to vector<8xf32>
    %708 = vector.shape_cast %707 : vector<8xf32> to vector<1x8xf32>
    %709 = vector.broadcast %708 : vector<1x8xf32> to vector<8x8xf32>
    %710 = arith.addf %705, %709 : vector<8x8xf32>
    %711 = arith.truncf %694 : vector<8x8xf32> to vector<8x8xbf16>
    %712 = arith.truncf %702 : vector<8x8xf32> to vector<8x8xbf16>
    %cst_186 = arith.constant dense<0.000000e+00> : vector<8x8xf32>
    %713 = tpu.matmul %711, %712, %cst_186 {dimension_numbers = #tpu.dot_dimension_numbers<[1], [1], [0], [0], [0, 0, 1, 0], [], []>} : vector<8x8xbf16>, vector<8x8xbf16>, vector<8x8xf32> -> vector<8x8xf32>
    %cst_187 = arith.constant 0.353553385 : f32
    %714 = vector.broadcast %cst_187 : f32 to vector<8x8xf32>
    %715 = arith.mulf %713, %714 : vector<8x8xf32>
    %716 = vector.broadcast %314 : vector<1x8xf32> to vector<8x8xf32>
    %717 = arith.addf %715, %716 : vector<8x8xf32>
    %cst_188 = arith.constant dense<0xFF800000> : vector<8xf32>
    %718 = vector.multi_reduction <maximumf>, %717, %cst_188 [1] : vector<8x8xf32> to vector<8xf32>
    %719 = vector.shape_cast %718 : vector<8xf32> to vector<8x1xf32>
    %720 = vector.broadcast %719 : vector<8x1xf32> to vector<8x8xf32>
    %721 = arith.subf %717, %720 : vector<8x8xf32>
    %722 = math.exp %721 : vector<8x8xf32>
    %cst_189 = arith.constant dense<0.000000e+00> : vector<8xf32>
    %723 = vector.multi_reduction <add>, %722, %cst_189 [1] : vector<8x8xf32> to vector<8xf32>
    %724 = vector.shape_cast %723 : vector<8xf32> to vector<8x1xf32>
    %725 = tpu.reciprocal %724 {approx = true} : vector<8x1xf32> -> vector<8x1xf32>
    %726 = vector.broadcast %725 : vector<8x1xf32> to vector<8x8xf32>
    %727 = arith.mulf %722, %726 : vector<8x8xf32>
    %728 = arith.truncf %727 : vector<8x8xf32> to vector<8x8xbf16>
    %729 = arith.truncf %710 : vector<8x8xf32> to vector<8x8xbf16>
    %cst_190 = arith.constant dense<0.000000e+00> : vector<8x8xf32>
    %730 = tpu.matmul %728, %729, %cst_190 {dimension_numbers = #tpu.dot_dimension_numbers<[1], [0], [0], [1], [0, 0, 1, 1], [], []>} : vector<8x8xbf16>, vector<8x8xbf16>, vector<8x8xf32> -> vector<8x8xf32>
    %731 = arith.truncf %730 : vector<8x8xf32> to vector<8x8xbf16>
    %732 = vector.extract_strided_slice %652 {offsets = [0, 0, 0], sizes = [1, 8, 32], strides = [1, 1, 1]} : vector<4x8x32xbf16> to vector<1x8x32xbf16>
    %733 = vector.shape_cast %732 : vector<1x8x32xbf16> to vector<8x32xbf16>
    %cst_191 = arith.constant dense<0.000000e+00> : vector<8x32xf32>
    %734 = tpu.matmul %731, %733, %cst_191 {dimension_numbers = #tpu.dot_dimension_numbers<[1], [0], [0], [1], [0, 0, 1, 1], [], []>} : vector<8x8xbf16>, vector<8x32xbf16>, vector<8x32xf32> -> vector<8x32xf32>
    %735 = arith.addf %686, %734 : vector<8x32xf32>
    %736 = vector.extract_strided_slice %649 {offsets = [1, 0, 0], sizes = [1, 32, 8], strides = [1, 1, 1]} : vector<12x32x8xbf16> to vector<1x32x8xbf16>
    %737 = vector.shape_cast %736 : vector<1x32x8xbf16> to vector<32x8xbf16>
    %cst_192 = arith.constant dense<0.000000e+00> : vector<8x8xf32>
    %738 = tpu.matmul %685, %737, %cst_192 {dimension_numbers = #tpu.dot_dimension_numbers<[1], [0], [0], [1], [0, 0, 1, 1], [], []>} : vector<8x32xbf16>, vector<32x8xbf16>, vector<8x8xf32> -> vector<8x8xf32>
    %739 = vector.extract_strided_slice %643 {offsets = [1, 0], sizes = [1, 8], strides = [1, 1]} : vector<12x8xf32> to vector<1x8xf32>
    %740 = vector.shape_cast %739 : vector<1x8xf32> to vector<8xf32>
    %741 = vector.shape_cast %740 : vector<8xf32> to vector<1x8xf32>
    %742 = vector.broadcast %741 : vector<1x8xf32> to vector<8x8xf32>
    %743 = arith.addf %738, %742 : vector<8x8xf32>
    %744 = vector.extract_strided_slice %649 {offsets = [5, 0, 0], sizes = [1, 32, 8], strides = [1, 1, 1]} : vector<12x32x8xbf16> to vector<1x32x8xbf16>
    %745 = vector.shape_cast %744 : vector<1x32x8xbf16> to vector<32x8xbf16>
    %cst_193 = arith.constant dense<0.000000e+00> : vector<8x8xf32>
    %746 = tpu.matmul %685, %745, %cst_193 {dimension_numbers = #tpu.dot_dimension_numbers<[1], [0], [0], [1], [0, 0, 1, 1], [], []>} : vector<8x32xbf16>, vector<32x8xbf16>, vector<8x8xf32> -> vector<8x8xf32>
    %747 = vector.extract_strided_slice %643 {offsets = [5, 0], sizes = [1, 8], strides = [1, 1]} : vector<12x8xf32> to vector<1x8xf32>
    %748 = vector.shape_cast %747 : vector<1x8xf32> to vector<8xf32>
    %749 = vector.shape_cast %748 : vector<8xf32> to vector<1x8xf32>
    %750 = vector.broadcast %749 : vector<1x8xf32> to vector<8x8xf32>
    %751 = arith.addf %746, %750 : vector<8x8xf32>
    %752 = vector.extract_strided_slice %649 {offsets = [9, 0, 0], sizes = [1, 32, 8], strides = [1, 1, 1]} : vector<12x32x8xbf16> to vector<1x32x8xbf16>
    %753 = vector.shape_cast %752 : vector<1x32x8xbf16> to vector<32x8xbf16>
    %cst_194 = arith.constant dense<0.000000e+00> : vector<8x8xf32>
    %754 = tpu.matmul %685, %753, %cst_194 {dimension_numbers = #tpu.dot_dimension_numbers<[1], [0], [0], [1], [0, 0, 1, 1], [], []>} : vector<8x32xbf16>, vector<32x8xbf16>, vector<8x8xf32> -> vector<8x8xf32>
    %755 = vector.extract_strided_slice %643 {offsets = [9, 0], sizes = [1, 8], strides = [1, 1]} : vector<12x8xf32> to vector<1x8xf32>
    %756 = vector.shape_cast %755 : vector<1x8xf32> to vector<8xf32>
    %757 = vector.shape_cast %756 : vector<8xf32> to vector<1x8xf32>
    %758 = vector.broadcast %757 : vector<1x8xf32> to vector<8x8xf32>
    %759 = arith.addf %754, %758 : vector<8x8xf32>
    %760 = arith.truncf %743 : vector<8x8xf32> to vector<8x8xbf16>
    %761 = arith.truncf %751 : vector<8x8xf32> to vector<8x8xbf16>
    %cst_195 = arith.constant dense<0.000000e+00> : vector<8x8xf32>
    %762 = tpu.matmul %760, %761, %cst_195 {dimension_numbers = #tpu.dot_dimension_numbers<[1], [1], [0], [0], [0, 0, 1, 0], [], []>} : vector<8x8xbf16>, vector<8x8xbf16>, vector<8x8xf32> -> vector<8x8xf32>
    %cst_196 = arith.constant 0.353553385 : f32
    %763 = vector.broadcast %cst_196 : f32 to vector<8x8xf32>
    %764 = arith.mulf %762, %763 : vector<8x8xf32>
    %765 = vector.broadcast %314 : vector<1x8xf32> to vector<8x8xf32>
    %766 = arith.addf %764, %765 : vector<8x8xf32>
    %cst_197 = arith.constant dense<0xFF800000> : vector<8xf32>
    %767 = vector.multi_reduction <maximumf>, %766, %cst_197 [1] : vector<8x8xf32> to vector<8xf32>
    %768 = vector.shape_cast %767 : vector<8xf32> to vector<8x1xf32>
    %769 = vector.broadcast %768 : vector<8x1xf32> to vector<8x8xf32>
    %770 = arith.subf %766, %769 : vector<8x8xf32>
    %771 = math.exp %770 : vector<8x8xf32>
    %cst_198 = arith.constant dense<0.000000e+00> : vector<8xf32>
    %772 = vector.multi_reduction <add>, %771, %cst_198 [1] : vector<8x8xf32> to vector<8xf32>
    %773 = vector.shape_cast %772 : vector<8xf32> to vector<8x1xf32>
    %774 = tpu.reciprocal %773 {approx = true} : vector<8x1xf32> -> vector<8x1xf32>
    %775 = vector.broadcast %774 : vector<8x1xf32> to vector<8x8xf32>
    %776 = arith.mulf %771, %775 : vector<8x8xf32>
    %777 = arith.truncf %776 : vector<8x8xf32> to vector<8x8xbf16>
    %778 = arith.truncf %759 : vector<8x8xf32> to vector<8x8xbf16>
    %cst_199 = arith.constant dense<0.000000e+00> : vector<8x8xf32>
    %779 = tpu.matmul %777, %778, %cst_199 {dimension_numbers = #tpu.dot_dimension_numbers<[1], [0], [0], [1], [0, 0, 1, 1], [], []>} : vector<8x8xbf16>, vector<8x8xbf16>, vector<8x8xf32> -> vector<8x8xf32>
    %780 = arith.truncf %779 : vector<8x8xf32> to vector<8x8xbf16>
    %781 = vector.extract_strided_slice %652 {offsets = [1, 0, 0], sizes = [1, 8, 32], strides = [1, 1, 1]} : vector<4x8x32xbf16> to vector<1x8x32xbf16>
    %782 = vector.shape_cast %781 : vector<1x8x32xbf16> to vector<8x32xbf16>
    %cst_200 = arith.constant dense<0.000000e+00> : vector<8x32xf32>
    %783 = tpu.matmul %780, %782, %cst_200 {dimension_numbers = #tpu.dot_dimension_numbers<[1], [0], [0], [1], [0, 0, 1, 1], [], []>} : vector<8x8xbf16>, vector<8x32xbf16>, vector<8x32xf32> -> vector<8x32xf32>
    %784 = arith.addf %735, %783 : vector<8x32xf32>
    %785 = vector.extract_strided_slice %649 {offsets = [2, 0, 0], sizes = [1, 32, 8], strides = [1, 1, 1]} : vector<12x32x8xbf16> to vector<1x32x8xbf16>
    %786 = vector.shape_cast %785 : vector<1x32x8xbf16> to vector<32x8xbf16>
    %cst_201 = arith.constant dense<0.000000e+00> : vector<8x8xf32>
    %787 = tpu.matmul %685, %786, %cst_201 {dimension_numbers = #tpu.dot_dimension_numbers<[1], [0], [0], [1], [0, 0, 1, 1], [], []>} : vector<8x32xbf16>, vector<32x8xbf16>, vector<8x8xf32> -> vector<8x8xf32>
    %788 = vector.extract_strided_slice %643 {offsets = [2, 0], sizes = [1, 8], strides = [1, 1]} : vector<12x8xf32> to vector<1x8xf32>
    %789 = vector.shape_cast %788 : vector<1x8xf32> to vector<8xf32>
    %790 = vector.shape_cast %789 : vector<8xf32> to vector<1x8xf32>
    %791 = vector.broadcast %790 : vector<1x8xf32> to vector<8x8xf32>
    %792 = arith.addf %787, %791 : vector<8x8xf32>
    %793 = vector.extract_strided_slice %649 {offsets = [6, 0, 0], sizes = [1, 32, 8], strides = [1, 1, 1]} : vector<12x32x8xbf16> to vector<1x32x8xbf16>
    %794 = vector.shape_cast %793 : vector<1x32x8xbf16> to vector<32x8xbf16>
    %cst_202 = arith.constant dense<0.000000e+00> : vector<8x8xf32>
    %795 = tpu.matmul %685, %794, %cst_202 {dimension_numbers = #tpu.dot_dimension_numbers<[1], [0], [0], [1], [0, 0, 1, 1], [], []>} : vector<8x32xbf16>, vector<32x8xbf16>, vector<8x8xf32> -> vector<8x8xf32>
    %796 = vector.extract_strided_slice %643 {offsets = [6, 0], sizes = [1, 8], strides = [1, 1]} : vector<12x8xf32> to vector<1x8xf32>
    %797 = vector.shape_cast %796 : vector<1x8xf32> to vector<8xf32>
    %798 = vector.shape_cast %797 : vector<8xf32> to vector<1x8xf32>
    %799 = vector.broadcast %798 : vector<1x8xf32> to vector<8x8xf32>
    %800 = arith.addf %795, %799 : vector<8x8xf32>
    %801 = vector.extract_strided_slice %649 {offsets = [10, 0, 0], sizes = [1, 32, 8], strides = [1, 1, 1]} : vector<12x32x8xbf16> to vector<1x32x8xbf16>
    %802 = vector.shape_cast %801 : vector<1x32x8xbf16> to vector<32x8xbf16>
    %cst_203 = arith.constant dense<0.000000e+00> : vector<8x8xf32>
    %803 = tpu.matmul %685, %802, %cst_203 {dimension_numbers = #tpu.dot_dimension_numbers<[1], [0], [0], [1], [0, 0, 1, 1], [], []>} : vector<8x32xbf16>, vector<32x8xbf16>, vector<8x8xf32> -> vector<8x8xf32>
    %804 = vector.extract_strided_slice %643 {offsets = [10, 0], sizes = [1, 8], strides = [1, 1]} : vector<12x8xf32> to vector<1x8xf32>
    %805 = vector.shape_cast %804 : vector<1x8xf32> to vector<8xf32>
    %806 = vector.shape_cast %805 : vector<8xf32> to vector<1x8xf32>
    %807 = vector.broadcast %806 : vector<1x8xf32> to vector<8x8xf32>
    %808 = arith.addf %803, %807 : vector<8x8xf32>
    %809 = arith.truncf %792 : vector<8x8xf32> to vector<8x8xbf16>
    %810 = arith.truncf %800 : vector<8x8xf32> to vector<8x8xbf16>
    %cst_204 = arith.constant dense<0.000000e+00> : vector<8x8xf32>
    %811 = tpu.matmul %809, %810, %cst_204 {dimension_numbers = #tpu.dot_dimension_numbers<[1], [1], [0], [0], [0, 0, 1, 0], [], []>} : vector<8x8xbf16>, vector<8x8xbf16>, vector<8x8xf32> -> vector<8x8xf32>
    %cst_205 = arith.constant 0.353553385 : f32
    %812 = vector.broadcast %cst_205 : f32 to vector<8x8xf32>
    %813 = arith.mulf %811, %812 : vector<8x8xf32>
    %814 = vector.broadcast %314 : vector<1x8xf32> to vector<8x8xf32>
    %815 = arith.addf %813, %814 : vector<8x8xf32>
    %cst_206 = arith.constant dense<0xFF800000> : vector<8xf32>
    %816 = vector.multi_reduction <maximumf>, %815, %cst_206 [1] : vector<8x8xf32> to vector<8xf32>
    %817 = vector.shape_cast %816 : vector<8xf32> to vector<8x1xf32>
    %818 = vector.broadcast %817 : vector<8x1xf32> to vector<8x8xf32>
    %819 = arith.subf %815, %818 : vector<8x8xf32>
    %820 = math.exp %819 : vector<8x8xf32>
    %cst_207 = arith.constant dense<0.000000e+00> : vector<8xf32>
    %821 = vector.multi_reduction <add>, %820, %cst_207 [1] : vector<8x8xf32> to vector<8xf32>
    %822 = vector.shape_cast %821 : vector<8xf32> to vector<8x1xf32>
    %823 = tpu.reciprocal %822 {approx = true} : vector<8x1xf32> -> vector<8x1xf32>
    %824 = vector.broadcast %823 : vector<8x1xf32> to vector<8x8xf32>
    %825 = arith.mulf %820, %824 : vector<8x8xf32>
    %826 = arith.truncf %825 : vector<8x8xf32> to vector<8x8xbf16>
    %827 = arith.truncf %808 : vector<8x8xf32> to vector<8x8xbf16>
    %cst_208 = arith.constant dense<0.000000e+00> : vector<8x8xf32>
    %828 = tpu.matmul %826, %827, %cst_208 {dimension_numbers = #tpu.dot_dimension_numbers<[1], [0], [0], [1], [0, 0, 1, 1], [], []>} : vector<8x8xbf16>, vector<8x8xbf16>, vector<8x8xf32> -> vector<8x8xf32>
    %829 = arith.truncf %828 : vector<8x8xf32> to vector<8x8xbf16>
    %830 = vector.extract_strided_slice %652 {offsets = [2, 0, 0], sizes = [1, 8, 32], strides = [1, 1, 1]} : vector<4x8x32xbf16> to vector<1x8x32xbf16>
    %831 = vector.shape_cast %830 : vector<1x8x32xbf16> to vector<8x32xbf16>
    %cst_209 = arith.constant dense<0.000000e+00> : vector<8x32xf32>
    %832 = tpu.matmul %829, %831, %cst_209 {dimension_numbers = #tpu.dot_dimension_numbers<[1], [0], [0], [1], [0, 0, 1, 1], [], []>} : vector<8x8xbf16>, vector<8x32xbf16>, vector<8x32xf32> -> vector<8x32xf32>
    %833 = arith.addf %784, %832 : vector<8x32xf32>
    %834 = vector.extract_strided_slice %649 {offsets = [3, 0, 0], sizes = [1, 32, 8], strides = [1, 1, 1]} : vector<12x32x8xbf16> to vector<1x32x8xbf16>
    %835 = vector.shape_cast %834 : vector<1x32x8xbf16> to vector<32x8xbf16>
    %cst_210 = arith.constant dense<0.000000e+00> : vector<8x8xf32>
    %836 = tpu.matmul %685, %835, %cst_210 {dimension_numbers = #tpu.dot_dimension_numbers<[1], [0], [0], [1], [0, 0, 1, 1], [], []>} : vector<8x32xbf16>, vector<32x8xbf16>, vector<8x8xf32> -> vector<8x8xf32>
    %837 = vector.extract_strided_slice %643 {offsets = [3, 0], sizes = [1, 8], strides = [1, 1]} : vector<12x8xf32> to vector<1x8xf32>
    %838 = vector.shape_cast %837 : vector<1x8xf32> to vector<8xf32>
    %839 = vector.shape_cast %838 : vector<8xf32> to vector<1x8xf32>
    %840 = vector.broadcast %839 : vector<1x8xf32> to vector<8x8xf32>
    %841 = arith.addf %836, %840 : vector<8x8xf32>
    %842 = vector.extract_strided_slice %649 {offsets = [7, 0, 0], sizes = [1, 32, 8], strides = [1, 1, 1]} : vector<12x32x8xbf16> to vector<1x32x8xbf16>
    %843 = vector.shape_cast %842 : vector<1x32x8xbf16> to vector<32x8xbf16>
    %cst_211 = arith.constant dense<0.000000e+00> : vector<8x8xf32>
    %844 = tpu.matmul %685, %843, %cst_211 {dimension_numbers = #tpu.dot_dimension_numbers<[1], [0], [0], [1], [0, 0, 1, 1], [], []>} : vector<8x32xbf16>, vector<32x8xbf16>, vector<8x8xf32> -> vector<8x8xf32>
    %845 = vector.extract_strided_slice %643 {offsets = [7, 0], sizes = [1, 8], strides = [1, 1]} : vector<12x8xf32> to vector<1x8xf32>
    %846 = vector.shape_cast %845 : vector<1x8xf32> to vector<8xf32>
    %847 = vector.shape_cast %846 : vector<8xf32> to vector<1x8xf32>
    %848 = vector.broadcast %847 : vector<1x8xf32> to vector<8x8xf32>
    %849 = arith.addf %844, %848 : vector<8x8xf32>
    %850 = vector.extract_strided_slice %649 {offsets = [11, 0, 0], sizes = [1, 32, 8], strides = [1, 1, 1]} : vector<12x32x8xbf16> to vector<1x32x8xbf16>
    %851 = vector.shape_cast %850 : vector<1x32x8xbf16> to vector<32x8xbf16>
    %cst_212 = arith.constant dense<0.000000e+00> : vector<8x8xf32>
    %852 = tpu.matmul %685, %851, %cst_212 {dimension_numbers = #tpu.dot_dimension_numbers<[1], [0], [0], [1], [0, 0, 1, 1], [], []>} : vector<8x32xbf16>, vector<32x8xbf16>, vector<8x8xf32> -> vector<8x8xf32>
    %853 = vector.extract_strided_slice %643 {offsets = [11, 0], sizes = [1, 8], strides = [1, 1]} : vector<12x8xf32> to vector<1x8xf32>
    %854 = vector.shape_cast %853 : vector<1x8xf32> to vector<8xf32>
    %855 = vector.shape_cast %854 : vector<8xf32> to vector<1x8xf32>
    %856 = vector.broadcast %855 : vector<1x8xf32> to vector<8x8xf32>
    %857 = arith.addf %852, %856 : vector<8x8xf32>
    %858 = arith.truncf %841 : vector<8x8xf32> to vector<8x8xbf16>
    %859 = arith.truncf %849 : vector<8x8xf32> to vector<8x8xbf16>
    %cst_213 = arith.constant dense<0.000000e+00> : vector<8x8xf32>
    %860 = tpu.matmul %858, %859, %cst_213 {dimension_numbers = #tpu.dot_dimension_numbers<[1], [1], [0], [0], [0, 0, 1, 0], [], []>} : vector<8x8xbf16>, vector<8x8xbf16>, vector<8x8xf32> -> vector<8x8xf32>
    %cst_214 = arith.constant 0.353553385 : f32
    %861 = vector.broadcast %cst_214 : f32 to vector<8x8xf32>
    %862 = arith.mulf %860, %861 : vector<8x8xf32>
    %863 = vector.broadcast %314 : vector<1x8xf32> to vector<8x8xf32>
    %864 = arith.addf %862, %863 : vector<8x8xf32>
    %cst_215 = arith.constant dense<0xFF800000> : vector<8xf32>
    %865 = vector.multi_reduction <maximumf>, %864, %cst_215 [1] : vector<8x8xf32> to vector<8xf32>
    %866 = vector.shape_cast %865 : vector<8xf32> to vector<8x1xf32>
    %867 = vector.broadcast %866 : vector<8x1xf32> to vector<8x8xf32>
    %868 = arith.subf %864, %867 : vector<8x8xf32>
    %869 = math.exp %868 : vector<8x8xf32>
    %cst_216 = arith.constant dense<0.000000e+00> : vector<8xf32>
    %870 = vector.multi_reduction <add>, %869, %cst_216 [1] : vector<8x8xf32> to vector<8xf32>
    %871 = vector.shape_cast %870 : vector<8xf32> to vector<8x1xf32>
    %872 = tpu.reciprocal %871 {approx = true} : vector<8x1xf32> -> vector<8x1xf32>
    %873 = vector.broadcast %872 : vector<8x1xf32> to vector<8x8xf32>
    %874 = arith.mulf %869, %873 : vector<8x8xf32>
    %875 = arith.truncf %874 : vector<8x8xf32> to vector<8x8xbf16>
    %876 = arith.truncf %857 : vector<8x8xf32> to vector<8x8xbf16>
    %cst_217 = arith.constant dense<0.000000e+00> : vector<8x8xf32>
    %877 = tpu.matmul %875, %876, %cst_217 {dimension_numbers = #tpu.dot_dimension_numbers<[1], [0], [0], [1], [0, 0, 1, 1], [], []>} : vector<8x8xbf16>, vector<8x8xbf16>, vector<8x8xf32> -> vector<8x8xf32>
    %878 = arith.truncf %877 : vector<8x8xf32> to vector<8x8xbf16>
    %879 = vector.extract_strided_slice %652 {offsets = [3, 0, 0], sizes = [1, 8, 32], strides = [1, 1, 1]} : vector<4x8x32xbf16> to vector<1x8x32xbf16>
    %880 = vector.shape_cast %879 : vector<1x8x32xbf16> to vector<8x32xbf16>
    %cst_218 = arith.constant dense<0.000000e+00> : vector<8x32xf32>
    %881 = tpu.matmul %878, %880, %cst_218 {dimension_numbers = #tpu.dot_dimension_numbers<[1], [0], [0], [1], [0, 0, 1, 1], [], []>} : vector<8x8xbf16>, vector<8x32xbf16>, vector<8x32xf32> -> vector<8x32xf32>
    %882 = arith.addf %833, %881 : vector<8x32xf32>
    %883 = arith.addf %625, %882 : vector<8x32xf32>
    %884 = vector.shape_cast %638 : vector<32xf32> to vector<1x32xf32>
    %885 = vector.broadcast %884 : vector<1x32xf32> to vector<8x32xf32>
    %886 = arith.addf %883, %885 : vector<8x32xf32>
    %cst_219 = arith.constant dense<0.000000e+00> : vector<8xf32>
    %887 = vector.multi_reduction <add>, %886, %cst_219 [1] : vector<8x32xf32> to vector<8xf32>
    %888 = vector.shape_cast %887 : vector<8xf32> to vector<8x1xf32>
    %cst_220 = arith.constant 3.200000e+01 : f32
    %889 = vector.broadcast %cst_220 : f32 to vector<8x1xf32>
    %890 = arith.divf %888, %889 : vector<8x1xf32>
    %891 = arith.mulf %886, %886 : vector<8x32xf32>
    %cst_221 = arith.constant dense<0.000000e+00> : vector<8xf32>
    %892 = vector.multi_reduction <add>, %891, %cst_221 [1] : vector<8x32xf32> to vector<8xf32>
    %893 = vector.shape_cast %892 : vector<8xf32> to vector<8x1xf32>
    %cst_222 = arith.constant 3.200000e+01 : f32
    %894 = vector.broadcast %cst_222 : f32 to vector<8x1xf32>
    %895 = arith.divf %893, %894 : vector<8x1xf32>
    %896 = arith.mulf %890, %890 : vector<8x1xf32>
    %897 = arith.subf %895, %896 : vector<8x1xf32>
    %cst_223 = arith.constant 0.000000e+00 : f32
    %898 = vector.broadcast %cst_223 : f32 to vector<8x1xf32>
    %899 = arith.maximumf %897, %898 : vector<8x1xf32>
    %900 = vector.broadcast %890 : vector<8x1xf32> to vector<8x32xf32>
    %901 = arith.subf %886, %900 : vector<8x32xf32>
    %cst_224 = arith.constant 9.99999974E-6 : f32
    %902 = vector.broadcast %cst_224 : f32 to vector<8x1xf32>
    %903 = arith.addf %899, %902 : vector<8x1xf32>
    %904 = math.rsqrt %903 : vector<8x1xf32>
    %905 = vector.broadcast %904 : vector<8x1xf32> to vector<8x32xf32>
    %906 = arith.mulf %901, %905 : vector<8x32xf32>
    %907 = vector.shape_cast %634 : vector<32xf32> to vector<1x32xf32>
    %908 = vector.broadcast %907 : vector<1x32xf32> to vector<8x32xf32>
    %909 = arith.mulf %906, %908 : vector<8x32xf32>
    %910 = vector.shape_cast %636 : vector<32xf32> to vector<1x32xf32>
    %911 = vector.broadcast %910 : vector<1x32xf32> to vector<8x32xf32>
    %912 = arith.addf %909, %911 : vector<8x32xf32>
    %913 = arith.truncf %912 : vector<8x32xf32> to vector<8x32xbf16>
    %cst_225 = arith.constant dense<0.000000e+00> : vector<8x128xf32>
    %914 = tpu.matmul %913, %655, %cst_225 {dimension_numbers = #tpu.dot_dimension_numbers<[1], [0], [0], [1], [0, 0, 1, 1], [], []>} : vector<8x32xbf16>, vector<32x128xbf16>, vector<8x128xf32> -> vector<8x128xf32>
    %915 = vector.shape_cast %646 : vector<128xf32> to vector<1x128xf32>
    %916 = vector.broadcast %915 : vector<1x128xf32> to vector<8x128xf32>
    %917 = arith.addf %914, %916 : vector<8x128xf32>
    %918 = arith.mulf %917, %917 : vector<8x128xf32>
    %919 = arith.mulf %917, %918 : vector<8x128xf32>
    %cst_226 = arith.constant 4.471500e-02 : f32
    %920 = vector.broadcast %cst_226 : f32 to vector<8x128xf32>
    %921 = arith.mulf %920, %919 : vector<8x128xf32>
    %922 = arith.addf %917, %921 : vector<8x128xf32>
    %cst_227 = arith.constant 0.797884583 : f32
    %923 = vector.broadcast %cst_227 : f32 to vector<8x128xf32>
    %924 = arith.mulf %923, %922 : vector<8x128xf32>
    %925 = math.tanh %924 : vector<8x128xf32>
    %cst_228 = arith.constant 1.000000e+00 : f32
    %926 = vector.broadcast %cst_228 : f32 to vector<8x128xf32>
    %927 = arith.addf %926, %925 : vector<8x128xf32>
    %cst_229 = arith.constant 5.000000e-01 : f32
    %928 = vector.broadcast %cst_229 : f32 to vector<8x128xf32>
    %929 = arith.mulf %928, %927 : vector<8x128xf32>
    %930 = arith.mulf %917, %929 : vector<8x128xf32>
    %931 = arith.truncf %930 : vector<8x128xf32> to vector<8x128xbf16>
    %cst_230 = arith.constant dense<0.000000e+00> : vector<8x32xf32>
    %932 = tpu.matmul %931, %658, %cst_230 {dimension_numbers = #tpu.dot_dimension_numbers<[1], [0], [0], [1], [0, 0, 1, 1], [], []>} : vector<8x128xbf16>, vector<128x32xbf16>, vector<8x32xf32> -> vector<8x32xf32>
    %933 = vector.shape_cast %640 : vector<32xf32> to vector<1x32xf32>
    %934 = vector.broadcast %933 : vector<1x32xf32> to vector<8x32xf32>
    %935 = arith.addf %932, %934 : vector<8x32xf32>
    %936 = arith.addf %886, %935 : vector<8x32xf32>
    %c3_i32 = arith.constant 3 : i32
    %937 = arith.index_cast %c3_i32 : i32 to index
    %c0_231 = arith.constant 0 : index
    %c0_232 = arith.constant 0 : index
    %938 = vector.load %arg3[%937, %c0_231, %c0_232] : memref<4x8x32xf32, #tpu.memory_space<vmem>>, vector<1x8x32xf32>
    %939 = vector.shape_cast %938 : vector<1x8x32xf32> to vector<8x32xf32>
    %940 = vector.extract_strided_slice %939 {offsets = [0, 0], sizes = [1, 32], strides = [1, 1]} : vector<8x32xf32> to vector<1x32xf32>
    %941 = vector.shape_cast %940 : vector<1x32xf32> to vector<32xf32>
    %942 = vector.extract_strided_slice %939 {offsets = [1, 0], sizes = [1, 32], strides = [1, 1]} : vector<8x32xf32> to vector<1x32xf32>
    %943 = vector.shape_cast %942 : vector<1x32xf32> to vector<32xf32>
    %944 = vector.extract_strided_slice %939 {offsets = [2, 0], sizes = [1, 32], strides = [1, 1]} : vector<8x32xf32> to vector<1x32xf32>
    %945 = vector.shape_cast %944 : vector<1x32xf32> to vector<32xf32>
    %946 = vector.extract_strided_slice %939 {offsets = [3, 0], sizes = [1, 32], strides = [1, 1]} : vector<8x32xf32> to vector<1x32xf32>
    %947 = vector.shape_cast %946 : vector<1x32xf32> to vector<32xf32>
    %948 = vector.extract_strided_slice %939 {offsets = [4, 0], sizes = [1, 32], strides = [1, 1]} : vector<8x32xf32> to vector<1x32xf32>
    %949 = vector.shape_cast %948 : vector<1x32xf32> to vector<32xf32>
    %950 = vector.extract_strided_slice %939 {offsets = [5, 0], sizes = [1, 32], strides = [1, 1]} : vector<8x32xf32> to vector<1x32xf32>
    %951 = vector.shape_cast %950 : vector<1x32xf32> to vector<32xf32>
    %952 = arith.index_cast %c3_i32 : i32 to index
    %c0_233 = arith.constant 0 : index
    %c0_234 = arith.constant 0 : index
    %953 = vector.load %arg4[%952, %c0_233, %c0_234] : memref<4x12x8xf32, #tpu.memory_space<vmem>>, vector<1x12x8xf32>
    %954 = vector.shape_cast %953 : vector<1x12x8xf32> to vector<12x8xf32>
    %955 = arith.index_cast %c3_i32 : i32 to index
    %c0_235 = arith.constant 0 : index
    %956 = vector.load %arg5[%955, %c0_235] : memref<4x128xf32, #tpu.memory_space<vmem>>, vector<1x128xf32>
    %957 = vector.shape_cast %956 : vector<1x128xf32> to vector<128xf32>
    %958 = arith.index_cast %c3_i32 : i32 to index
    %c0_236 = arith.constant 0 : index
    %c0_237 = arith.constant 0 : index
    %c0_238 = arith.constant 0 : index
    %959 = vector.load %arg6[%958, %c0_236, %c0_237, %c0_238] : memref<4x12x32x8xbf16, #tpu.memory_space<vmem>>, vector<1x12x32x8xbf16>
    %960 = vector.shape_cast %959 : vector<1x12x32x8xbf16> to vector<12x32x8xbf16>
    %961 = arith.index_cast %c3_i32 : i32 to index
    %c0_239 = arith.constant 0 : index
    %c0_240 = arith.constant 0 : index
    %c0_241 = arith.constant 0 : index
    %962 = vector.load %arg7[%961, %c0_239, %c0_240, %c0_241] : memref<4x4x8x32xbf16, #tpu.memory_space<vmem>>, vector<1x4x8x32xbf16>
    %963 = vector.shape_cast %962 : vector<1x4x8x32xbf16> to vector<4x8x32xbf16>
    %964 = arith.index_cast %c3_i32 : i32 to index
    %c0_242 = arith.constant 0 : index
    %c0_243 = arith.constant 0 : index
    %965 = vector.load %arg8[%964, %c0_242, %c0_243] : memref<4x32x128xbf16, #tpu.memory_space<vmem>>, vector<1x32x128xbf16>
    %966 = vector.shape_cast %965 : vector<1x32x128xbf16> to vector<32x128xbf16>
    %967 = arith.index_cast %c3_i32 : i32 to index
    %c0_244 = arith.constant 0 : index
    %c0_245 = arith.constant 0 : index
    %968 = vector.load %arg9[%967, %c0_244, %c0_245] : memref<4x128x32xbf16, #tpu.memory_space<vmem>>, vector<1x128x32xbf16>
    %969 = vector.shape_cast %968 : vector<1x128x32xbf16> to vector<128x32xbf16>
    %cst_246 = arith.constant dense<0.000000e+00> : vector<8xf32>
    %970 = vector.multi_reduction <add>, %936, %cst_246 [1] : vector<8x32xf32> to vector<8xf32>
    %971 = vector.shape_cast %970 : vector<8xf32> to vector<8x1xf32>
    %cst_247 = arith.constant 3.200000e+01 : f32
    %972 = vector.broadcast %cst_247 : f32 to vector<8x1xf32>
    %973 = arith.divf %971, %972 : vector<8x1xf32>
    %974 = arith.mulf %936, %936 : vector<8x32xf32>
    %cst_248 = arith.constant dense<0.000000e+00> : vector<8xf32>
    %975 = vector.multi_reduction <add>, %974, %cst_248 [1] : vector<8x32xf32> to vector<8xf32>
    %976 = vector.shape_cast %975 : vector<8xf32> to vector<8x1xf32>
    %cst_249 = arith.constant 3.200000e+01 : f32
    %977 = vector.broadcast %cst_249 : f32 to vector<8x1xf32>
    %978 = arith.divf %976, %977 : vector<8x1xf32>
    %979 = arith.mulf %973, %973 : vector<8x1xf32>
    %980 = arith.subf %978, %979 : vector<8x1xf32>
    %cst_250 = arith.constant 0.000000e+00 : f32
    %981 = vector.broadcast %cst_250 : f32 to vector<8x1xf32>
    %982 = arith.maximumf %980, %981 : vector<8x1xf32>
    %983 = vector.broadcast %973 : vector<8x1xf32> to vector<8x32xf32>
    %984 = arith.subf %936, %983 : vector<8x32xf32>
    %cst_251 = arith.constant 9.99999974E-6 : f32
    %985 = vector.broadcast %cst_251 : f32 to vector<8x1xf32>
    %986 = arith.addf %982, %985 : vector<8x1xf32>
    %987 = math.rsqrt %986 : vector<8x1xf32>
    %988 = vector.broadcast %987 : vector<8x1xf32> to vector<8x32xf32>
    %989 = arith.mulf %984, %988 : vector<8x32xf32>
    %990 = vector.shape_cast %941 : vector<32xf32> to vector<1x32xf32>
    %991 = vector.broadcast %990 : vector<1x32xf32> to vector<8x32xf32>
    %992 = arith.mulf %989, %991 : vector<8x32xf32>
    %993 = vector.shape_cast %943 : vector<32xf32> to vector<1x32xf32>
    %994 = vector.broadcast %993 : vector<1x32xf32> to vector<8x32xf32>
    %995 = arith.addf %992, %994 : vector<8x32xf32>
    %996 = arith.truncf %995 : vector<8x32xf32> to vector<8x32xbf16>
    %cst_252 = arith.constant 0.000000e+00 : f32
    %997 = vector.broadcast %cst_252 : f32 to vector<8x32xf32>
    %998 = vector.extract_strided_slice %960 {offsets = [0, 0, 0], sizes = [1, 32, 8], strides = [1, 1, 1]} : vector<12x32x8xbf16> to vector<1x32x8xbf16>
    %999 = vector.shape_cast %998 : vector<1x32x8xbf16> to vector<32x8xbf16>
    %cst_253 = arith.constant dense<0.000000e+00> : vector<8x8xf32>
    %1000 = tpu.matmul %996, %999, %cst_253 {dimension_numbers = #tpu.dot_dimension_numbers<[1], [0], [0], [1], [0, 0, 1, 1], [], []>} : vector<8x32xbf16>, vector<32x8xbf16>, vector<8x8xf32> -> vector<8x8xf32>
    %1001 = vector.extract_strided_slice %954 {offsets = [0, 0], sizes = [1, 8], strides = [1, 1]} : vector<12x8xf32> to vector<1x8xf32>
    %1002 = vector.shape_cast %1001 : vector<1x8xf32> to vector<8xf32>
    %1003 = vector.shape_cast %1002 : vector<8xf32> to vector<1x8xf32>
    %1004 = vector.broadcast %1003 : vector<1x8xf32> to vector<8x8xf32>
    %1005 = arith.addf %1000, %1004 : vector<8x8xf32>
    %1006 = vector.extract_strided_slice %960 {offsets = [4, 0, 0], sizes = [1, 32, 8], strides = [1, 1, 1]} : vector<12x32x8xbf16> to vector<1x32x8xbf16>
    %1007 = vector.shape_cast %1006 : vector<1x32x8xbf16> to vector<32x8xbf16>
    %cst_254 = arith.constant dense<0.000000e+00> : vector<8x8xf32>
    %1008 = tpu.matmul %996, %1007, %cst_254 {dimension_numbers = #tpu.dot_dimension_numbers<[1], [0], [0], [1], [0, 0, 1, 1], [], []>} : vector<8x32xbf16>, vector<32x8xbf16>, vector<8x8xf32> -> vector<8x8xf32>
    %1009 = vector.extract_strided_slice %954 {offsets = [4, 0], sizes = [1, 8], strides = [1, 1]} : vector<12x8xf32> to vector<1x8xf32>
    %1010 = vector.shape_cast %1009 : vector<1x8xf32> to vector<8xf32>
    %1011 = vector.shape_cast %1010 : vector<8xf32> to vector<1x8xf32>
    %1012 = vector.broadcast %1011 : vector<1x8xf32> to vector<8x8xf32>
    %1013 = arith.addf %1008, %1012 : vector<8x8xf32>
    %1014 = vector.extract_strided_slice %960 {offsets = [8, 0, 0], sizes = [1, 32, 8], strides = [1, 1, 1]} : vector<12x32x8xbf16> to vector<1x32x8xbf16>
    %1015 = vector.shape_cast %1014 : vector<1x32x8xbf16> to vector<32x8xbf16>
    %cst_255 = arith.constant dense<0.000000e+00> : vector<8x8xf32>
    %1016 = tpu.matmul %996, %1015, %cst_255 {dimension_numbers = #tpu.dot_dimension_numbers<[1], [0], [0], [1], [0, 0, 1, 1], [], []>} : vector<8x32xbf16>, vector<32x8xbf16>, vector<8x8xf32> -> vector<8x8xf32>
    %1017 = vector.extract_strided_slice %954 {offsets = [8, 0], sizes = [1, 8], strides = [1, 1]} : vector<12x8xf32> to vector<1x8xf32>
    %1018 = vector.shape_cast %1017 : vector<1x8xf32> to vector<8xf32>
    %1019 = vector.shape_cast %1018 : vector<8xf32> to vector<1x8xf32>
    %1020 = vector.broadcast %1019 : vector<1x8xf32> to vector<8x8xf32>
    %1021 = arith.addf %1016, %1020 : vector<8x8xf32>
    %1022 = arith.truncf %1005 : vector<8x8xf32> to vector<8x8xbf16>
    %1023 = arith.truncf %1013 : vector<8x8xf32> to vector<8x8xbf16>
    %cst_256 = arith.constant dense<0.000000e+00> : vector<8x8xf32>
    %1024 = tpu.matmul %1022, %1023, %cst_256 {dimension_numbers = #tpu.dot_dimension_numbers<[1], [1], [0], [0], [0, 0, 1, 0], [], []>} : vector<8x8xbf16>, vector<8x8xbf16>, vector<8x8xf32> -> vector<8x8xf32>
    %cst_257 = arith.constant 0.353553385 : f32
    %1025 = vector.broadcast %cst_257 : f32 to vector<8x8xf32>
    %1026 = arith.mulf %1024, %1025 : vector<8x8xf32>
    %1027 = vector.broadcast %314 : vector<1x8xf32> to vector<8x8xf32>
    %1028 = arith.addf %1026, %1027 : vector<8x8xf32>
    %cst_258 = arith.constant dense<0xFF800000> : vector<8xf32>
    %1029 = vector.multi_reduction <maximumf>, %1028, %cst_258 [1] : vector<8x8xf32> to vector<8xf32>
    %1030 = vector.shape_cast %1029 : vector<8xf32> to vector<8x1xf32>
    %1031 = vector.broadcast %1030 : vector<8x1xf32> to vector<8x8xf32>
    %1032 = arith.subf %1028, %1031 : vector<8x8xf32>
    %1033 = math.exp %1032 : vector<8x8xf32>
    %cst_259 = arith.constant dense<0.000000e+00> : vector<8xf32>
    %1034 = vector.multi_reduction <add>, %1033, %cst_259 [1] : vector<8x8xf32> to vector<8xf32>
    %1035 = vector.shape_cast %1034 : vector<8xf32> to vector<8x1xf32>
    %1036 = tpu.reciprocal %1035 {approx = true} : vector<8x1xf32> -> vector<8x1xf32>
    %1037 = vector.broadcast %1036 : vector<8x1xf32> to vector<8x8xf32>
    %1038 = arith.mulf %1033, %1037 : vector<8x8xf32>
    %1039 = arith.truncf %1038 : vector<8x8xf32> to vector<8x8xbf16>
    %1040 = arith.truncf %1021 : vector<8x8xf32> to vector<8x8xbf16>
    %cst_260 = arith.constant dense<0.000000e+00> : vector<8x8xf32>
    %1041 = tpu.matmul %1039, %1040, %cst_260 {dimension_numbers = #tpu.dot_dimension_numbers<[1], [0], [0], [1], [0, 0, 1, 1], [], []>} : vector<8x8xbf16>, vector<8x8xbf16>, vector<8x8xf32> -> vector<8x8xf32>
    %1042 = arith.truncf %1041 : vector<8x8xf32> to vector<8x8xbf16>
    %1043 = vector.extract_strided_slice %963 {offsets = [0, 0, 0], sizes = [1, 8, 32], strides = [1, 1, 1]} : vector<4x8x32xbf16> to vector<1x8x32xbf16>
    %1044 = vector.shape_cast %1043 : vector<1x8x32xbf16> to vector<8x32xbf16>
    %cst_261 = arith.constant dense<0.000000e+00> : vector<8x32xf32>
    %1045 = tpu.matmul %1042, %1044, %cst_261 {dimension_numbers = #tpu.dot_dimension_numbers<[1], [0], [0], [1], [0, 0, 1, 1], [], []>} : vector<8x8xbf16>, vector<8x32xbf16>, vector<8x32xf32> -> vector<8x32xf32>
    %1046 = arith.addf %997, %1045 : vector<8x32xf32>
    %1047 = vector.extract_strided_slice %960 {offsets = [1, 0, 0], sizes = [1, 32, 8], strides = [1, 1, 1]} : vector<12x32x8xbf16> to vector<1x32x8xbf16>
    %1048 = vector.shape_cast %1047 : vector<1x32x8xbf16> to vector<32x8xbf16>
    %cst_262 = arith.constant dense<0.000000e+00> : vector<8x8xf32>
    %1049 = tpu.matmul %996, %1048, %cst_262 {dimension_numbers = #tpu.dot_dimension_numbers<[1], [0], [0], [1], [0, 0, 1, 1], [], []>} : vector<8x32xbf16>, vector<32x8xbf16>, vector<8x8xf32> -> vector<8x8xf32>
    %1050 = vector.extract_strided_slice %954 {offsets = [1, 0], sizes = [1, 8], strides = [1, 1]} : vector<12x8xf32> to vector<1x8xf32>
    %1051 = vector.shape_cast %1050 : vector<1x8xf32> to vector<8xf32>
    %1052 = vector.shape_cast %1051 : vector<8xf32> to vector<1x8xf32>
    %1053 = vector.broadcast %1052 : vector<1x8xf32> to vector<8x8xf32>
    %1054 = arith.addf %1049, %1053 : vector<8x8xf32>
    %1055 = vector.extract_strided_slice %960 {offsets = [5, 0, 0], sizes = [1, 32, 8], strides = [1, 1, 1]} : vector<12x32x8xbf16> to vector<1x32x8xbf16>
    %1056 = vector.shape_cast %1055 : vector<1x32x8xbf16> to vector<32x8xbf16>
    %cst_263 = arith.constant dense<0.000000e+00> : vector<8x8xf32>
    %1057 = tpu.matmul %996, %1056, %cst_263 {dimension_numbers = #tpu.dot_dimension_numbers<[1], [0], [0], [1], [0, 0, 1, 1], [], []>} : vector<8x32xbf16>, vector<32x8xbf16>, vector<8x8xf32> -> vector<8x8xf32>
    %1058 = vector.extract_strided_slice %954 {offsets = [5, 0], sizes = [1, 8], strides = [1, 1]} : vector<12x8xf32> to vector<1x8xf32>
    %1059 = vector.shape_cast %1058 : vector<1x8xf32> to vector<8xf32>
    %1060 = vector.shape_cast %1059 : vector<8xf32> to vector<1x8xf32>
    %1061 = vector.broadcast %1060 : vector<1x8xf32> to vector<8x8xf32>
    %1062 = arith.addf %1057, %1061 : vector<8x8xf32>
    %1063 = vector.extract_strided_slice %960 {offsets = [9, 0, 0], sizes = [1, 32, 8], strides = [1, 1, 1]} : vector<12x32x8xbf16> to vector<1x32x8xbf16>
    %1064 = vector.shape_cast %1063 : vector<1x32x8xbf16> to vector<32x8xbf16>
    %cst_264 = arith.constant dense<0.000000e+00> : vector<8x8xf32>
    %1065 = tpu.matmul %996, %1064, %cst_264 {dimension_numbers = #tpu.dot_dimension_numbers<[1], [0], [0], [1], [0, 0, 1, 1], [], []>} : vector<8x32xbf16>, vector<32x8xbf16>, vector<8x8xf32> -> vector<8x8xf32>
    %1066 = vector.extract_strided_slice %954 {offsets = [9, 0], sizes = [1, 8], strides = [1, 1]} : vector<12x8xf32> to vector<1x8xf32>
    %1067 = vector.shape_cast %1066 : vector<1x8xf32> to vector<8xf32>
    %1068 = vector.shape_cast %1067 : vector<8xf32> to vector<1x8xf32>
    %1069 = vector.broadcast %1068 : vector<1x8xf32> to vector<8x8xf32>
    %1070 = arith.addf %1065, %1069 : vector<8x8xf32>
    %1071 = arith.truncf %1054 : vector<8x8xf32> to vector<8x8xbf16>
    %1072 = arith.truncf %1062 : vector<8x8xf32> to vector<8x8xbf16>
    %cst_265 = arith.constant dense<0.000000e+00> : vector<8x8xf32>
    %1073 = tpu.matmul %1071, %1072, %cst_265 {dimension_numbers = #tpu.dot_dimension_numbers<[1], [1], [0], [0], [0, 0, 1, 0], [], []>} : vector<8x8xbf16>, vector<8x8xbf16>, vector<8x8xf32> -> vector<8x8xf32>
    %cst_266 = arith.constant 0.353553385 : f32
    %1074 = vector.broadcast %cst_266 : f32 to vector<8x8xf32>
    %1075 = arith.mulf %1073, %1074 : vector<8x8xf32>
    %1076 = vector.broadcast %314 : vector<1x8xf32> to vector<8x8xf32>
    %1077 = arith.addf %1075, %1076 : vector<8x8xf32>
    %cst_267 = arith.constant dense<0xFF800000> : vector<8xf32>
    %1078 = vector.multi_reduction <maximumf>, %1077, %cst_267 [1] : vector<8x8xf32> to vector<8xf32>
    %1079 = vector.shape_cast %1078 : vector<8xf32> to vector<8x1xf32>
    %1080 = vector.broadcast %1079 : vector<8x1xf32> to vector<8x8xf32>
    %1081 = arith.subf %1077, %1080 : vector<8x8xf32>
    %1082 = math.exp %1081 : vector<8x8xf32>
    %cst_268 = arith.constant dense<0.000000e+00> : vector<8xf32>
    %1083 = vector.multi_reduction <add>, %1082, %cst_268 [1] : vector<8x8xf32> to vector<8xf32>
    %1084 = vector.shape_cast %1083 : vector<8xf32> to vector<8x1xf32>
    %1085 = tpu.reciprocal %1084 {approx = true} : vector<8x1xf32> -> vector<8x1xf32>
    %1086 = vector.broadcast %1085 : vector<8x1xf32> to vector<8x8xf32>
    %1087 = arith.mulf %1082, %1086 : vector<8x8xf32>
    %1088 = arith.truncf %1087 : vector<8x8xf32> to vector<8x8xbf16>
    %1089 = arith.truncf %1070 : vector<8x8xf32> to vector<8x8xbf16>
    %cst_269 = arith.constant dense<0.000000e+00> : vector<8x8xf32>
    %1090 = tpu.matmul %1088, %1089, %cst_269 {dimension_numbers = #tpu.dot_dimension_numbers<[1], [0], [0], [1], [0, 0, 1, 1], [], []>} : vector<8x8xbf16>, vector<8x8xbf16>, vector<8x8xf32> -> vector<8x8xf32>
    %1091 = arith.truncf %1090 : vector<8x8xf32> to vector<8x8xbf16>
    %1092 = vector.extract_strided_slice %963 {offsets = [1, 0, 0], sizes = [1, 8, 32], strides = [1, 1, 1]} : vector<4x8x32xbf16> to vector<1x8x32xbf16>
    %1093 = vector.shape_cast %1092 : vector<1x8x32xbf16> to vector<8x32xbf16>
    %cst_270 = arith.constant dense<0.000000e+00> : vector<8x32xf32>
    %1094 = tpu.matmul %1091, %1093, %cst_270 {dimension_numbers = #tpu.dot_dimension_numbers<[1], [0], [0], [1], [0, 0, 1, 1], [], []>} : vector<8x8xbf16>, vector<8x32xbf16>, vector<8x32xf32> -> vector<8x32xf32>
    %1095 = arith.addf %1046, %1094 : vector<8x32xf32>
    %1096 = vector.extract_strided_slice %960 {offsets = [2, 0, 0], sizes = [1, 32, 8], strides = [1, 1, 1]} : vector<12x32x8xbf16> to vector<1x32x8xbf16>
    %1097 = vector.shape_cast %1096 : vector<1x32x8xbf16> to vector<32x8xbf16>
    %cst_271 = arith.constant dense<0.000000e+00> : vector<8x8xf32>
    %1098 = tpu.matmul %996, %1097, %cst_271 {dimension_numbers = #tpu.dot_dimension_numbers<[1], [0], [0], [1], [0, 0, 1, 1], [], []>} : vector<8x32xbf16>, vector<32x8xbf16>, vector<8x8xf32> -> vector<8x8xf32>
    %1099 = vector.extract_strided_slice %954 {offsets = [2, 0], sizes = [1, 8], strides = [1, 1]} : vector<12x8xf32> to vector<1x8xf32>
    %1100 = vector.shape_cast %1099 : vector<1x8xf32> to vector<8xf32>
    %1101 = vector.shape_cast %1100 : vector<8xf32> to vector<1x8xf32>
    %1102 = vector.broadcast %1101 : vector<1x8xf32> to vector<8x8xf32>
    %1103 = arith.addf %1098, %1102 : vector<8x8xf32>
    %1104 = vector.extract_strided_slice %960 {offsets = [6, 0, 0], sizes = [1, 32, 8], strides = [1, 1, 1]} : vector<12x32x8xbf16> to vector<1x32x8xbf16>
    %1105 = vector.shape_cast %1104 : vector<1x32x8xbf16> to vector<32x8xbf16>
    %cst_272 = arith.constant dense<0.000000e+00> : vector<8x8xf32>
    %1106 = tpu.matmul %996, %1105, %cst_272 {dimension_numbers = #tpu.dot_dimension_numbers<[1], [0], [0], [1], [0, 0, 1, 1], [], []>} : vector<8x32xbf16>, vector<32x8xbf16>, vector<8x8xf32> -> vector<8x8xf32>
    %1107 = vector.extract_strided_slice %954 {offsets = [6, 0], sizes = [1, 8], strides = [1, 1]} : vector<12x8xf32> to vector<1x8xf32>
    %1108 = vector.shape_cast %1107 : vector<1x8xf32> to vector<8xf32>
    %1109 = vector.shape_cast %1108 : vector<8xf32> to vector<1x8xf32>
    %1110 = vector.broadcast %1109 : vector<1x8xf32> to vector<8x8xf32>
    %1111 = arith.addf %1106, %1110 : vector<8x8xf32>
    %1112 = vector.extract_strided_slice %960 {offsets = [10, 0, 0], sizes = [1, 32, 8], strides = [1, 1, 1]} : vector<12x32x8xbf16> to vector<1x32x8xbf16>
    %1113 = vector.shape_cast %1112 : vector<1x32x8xbf16> to vector<32x8xbf16>
    %cst_273 = arith.constant dense<0.000000e+00> : vector<8x8xf32>
    %1114 = tpu.matmul %996, %1113, %cst_273 {dimension_numbers = #tpu.dot_dimension_numbers<[1], [0], [0], [1], [0, 0, 1, 1], [], []>} : vector<8x32xbf16>, vector<32x8xbf16>, vector<8x8xf32> -> vector<8x8xf32>
    %1115 = vector.extract_strided_slice %954 {offsets = [10, 0], sizes = [1, 8], strides = [1, 1]} : vector<12x8xf32> to vector<1x8xf32>
    %1116 = vector.shape_cast %1115 : vector<1x8xf32> to vector<8xf32>
    %1117 = vector.shape_cast %1116 : vector<8xf32> to vector<1x8xf32>
    %1118 = vector.broadcast %1117 : vector<1x8xf32> to vector<8x8xf32>
    %1119 = arith.addf %1114, %1118 : vector<8x8xf32>
    %1120 = arith.truncf %1103 : vector<8x8xf32> to vector<8x8xbf16>
    %1121 = arith.truncf %1111 : vector<8x8xf32> to vector<8x8xbf16>
    %cst_274 = arith.constant dense<0.000000e+00> : vector<8x8xf32>
    %1122 = tpu.matmul %1120, %1121, %cst_274 {dimension_numbers = #tpu.dot_dimension_numbers<[1], [1], [0], [0], [0, 0, 1, 0], [], []>} : vector<8x8xbf16>, vector<8x8xbf16>, vector<8x8xf32> -> vector<8x8xf32>
    %cst_275 = arith.constant 0.353553385 : f32
    %1123 = vector.broadcast %cst_275 : f32 to vector<8x8xf32>
    %1124 = arith.mulf %1122, %1123 : vector<8x8xf32>
    %1125 = vector.broadcast %314 : vector<1x8xf32> to vector<8x8xf32>
    %1126 = arith.addf %1124, %1125 : vector<8x8xf32>
    %cst_276 = arith.constant dense<0xFF800000> : vector<8xf32>
    %1127 = vector.multi_reduction <maximumf>, %1126, %cst_276 [1] : vector<8x8xf32> to vector<8xf32>
    %1128 = vector.shape_cast %1127 : vector<8xf32> to vector<8x1xf32>
    %1129 = vector.broadcast %1128 : vector<8x1xf32> to vector<8x8xf32>
    %1130 = arith.subf %1126, %1129 : vector<8x8xf32>
    %1131 = math.exp %1130 : vector<8x8xf32>
    %cst_277 = arith.constant dense<0.000000e+00> : vector<8xf32>
    %1132 = vector.multi_reduction <add>, %1131, %cst_277 [1] : vector<8x8xf32> to vector<8xf32>
    %1133 = vector.shape_cast %1132 : vector<8xf32> to vector<8x1xf32>
    %1134 = tpu.reciprocal %1133 {approx = true} : vector<8x1xf32> -> vector<8x1xf32>
    %1135 = vector.broadcast %1134 : vector<8x1xf32> to vector<8x8xf32>
    %1136 = arith.mulf %1131, %1135 : vector<8x8xf32>
    %1137 = arith.truncf %1136 : vector<8x8xf32> to vector<8x8xbf16>
    %1138 = arith.truncf %1119 : vector<8x8xf32> to vector<8x8xbf16>
    %cst_278 = arith.constant dense<0.000000e+00> : vector<8x8xf32>
    %1139 = tpu.matmul %1137, %1138, %cst_278 {dimension_numbers = #tpu.dot_dimension_numbers<[1], [0], [0], [1], [0, 0, 1, 1], [], []>} : vector<8x8xbf16>, vector<8x8xbf16>, vector<8x8xf32> -> vector<8x8xf32>
    %1140 = arith.truncf %1139 : vector<8x8xf32> to vector<8x8xbf16>
    %1141 = vector.extract_strided_slice %963 {offsets = [2, 0, 0], sizes = [1, 8, 32], strides = [1, 1, 1]} : vector<4x8x32xbf16> to vector<1x8x32xbf16>
    %1142 = vector.shape_cast %1141 : vector<1x8x32xbf16> to vector<8x32xbf16>
    %cst_279 = arith.constant dense<0.000000e+00> : vector<8x32xf32>
    %1143 = tpu.matmul %1140, %1142, %cst_279 {dimension_numbers = #tpu.dot_dimension_numbers<[1], [0], [0], [1], [0, 0, 1, 1], [], []>} : vector<8x8xbf16>, vector<8x32xbf16>, vector<8x32xf32> -> vector<8x32xf32>
    %1144 = arith.addf %1095, %1143 : vector<8x32xf32>
    %1145 = vector.extract_strided_slice %960 {offsets = [3, 0, 0], sizes = [1, 32, 8], strides = [1, 1, 1]} : vector<12x32x8xbf16> to vector<1x32x8xbf16>
    %1146 = vector.shape_cast %1145 : vector<1x32x8xbf16> to vector<32x8xbf16>
    %cst_280 = arith.constant dense<0.000000e+00> : vector<8x8xf32>
    %1147 = tpu.matmul %996, %1146, %cst_280 {dimension_numbers = #tpu.dot_dimension_numbers<[1], [0], [0], [1], [0, 0, 1, 1], [], []>} : vector<8x32xbf16>, vector<32x8xbf16>, vector<8x8xf32> -> vector<8x8xf32>
    %1148 = vector.extract_strided_slice %954 {offsets = [3, 0], sizes = [1, 8], strides = [1, 1]} : vector<12x8xf32> to vector<1x8xf32>
    %1149 = vector.shape_cast %1148 : vector<1x8xf32> to vector<8xf32>
    %1150 = vector.shape_cast %1149 : vector<8xf32> to vector<1x8xf32>
    %1151 = vector.broadcast %1150 : vector<1x8xf32> to vector<8x8xf32>
    %1152 = arith.addf %1147, %1151 : vector<8x8xf32>
    %1153 = vector.extract_strided_slice %960 {offsets = [7, 0, 0], sizes = [1, 32, 8], strides = [1, 1, 1]} : vector<12x32x8xbf16> to vector<1x32x8xbf16>
    %1154 = vector.shape_cast %1153 : vector<1x32x8xbf16> to vector<32x8xbf16>
    %cst_281 = arith.constant dense<0.000000e+00> : vector<8x8xf32>
    %1155 = tpu.matmul %996, %1154, %cst_281 {dimension_numbers = #tpu.dot_dimension_numbers<[1], [0], [0], [1], [0, 0, 1, 1], [], []>} : vector<8x32xbf16>, vector<32x8xbf16>, vector<8x8xf32> -> vector<8x8xf32>
    %1156 = vector.extract_strided_slice %954 {offsets = [7, 0], sizes = [1, 8], strides = [1, 1]} : vector<12x8xf32> to vector<1x8xf32>
    %1157 = vector.shape_cast %1156 : vector<1x8xf32> to vector<8xf32>
    %1158 = vector.shape_cast %1157 : vector<8xf32> to vector<1x8xf32>
    %1159 = vector.broadcast %1158 : vector<1x8xf32> to vector<8x8xf32>
    %1160 = arith.addf %1155, %1159 : vector<8x8xf32>
    %1161 = vector.extract_strided_slice %960 {offsets = [11, 0, 0], sizes = [1, 32, 8], strides = [1, 1, 1]} : vector<12x32x8xbf16> to vector<1x32x8xbf16>
    %1162 = vector.shape_cast %1161 : vector<1x32x8xbf16> to vector<32x8xbf16>
    %cst_282 = arith.constant dense<0.000000e+00> : vector<8x8xf32>
    %1163 = tpu.matmul %996, %1162, %cst_282 {dimension_numbers = #tpu.dot_dimension_numbers<[1], [0], [0], [1], [0, 0, 1, 1], [], []>} : vector<8x32xbf16>, vector<32x8xbf16>, vector<8x8xf32> -> vector<8x8xf32>
    %1164 = vector.extract_strided_slice %954 {offsets = [11, 0], sizes = [1, 8], strides = [1, 1]} : vector<12x8xf32> to vector<1x8xf32>
    %1165 = vector.shape_cast %1164 : vector<1x8xf32> to vector<8xf32>
    %1166 = vector.shape_cast %1165 : vector<8xf32> to vector<1x8xf32>
    %1167 = vector.broadcast %1166 : vector<1x8xf32> to vector<8x8xf32>
    %1168 = arith.addf %1163, %1167 : vector<8x8xf32>
    %1169 = arith.truncf %1152 : vector<8x8xf32> to vector<8x8xbf16>
    %1170 = arith.truncf %1160 : vector<8x8xf32> to vector<8x8xbf16>
    %cst_283 = arith.constant dense<0.000000e+00> : vector<8x8xf32>
    %1171 = tpu.matmul %1169, %1170, %cst_283 {dimension_numbers = #tpu.dot_dimension_numbers<[1], [1], [0], [0], [0, 0, 1, 0], [], []>} : vector<8x8xbf16>, vector<8x8xbf16>, vector<8x8xf32> -> vector<8x8xf32>
    %cst_284 = arith.constant 0.353553385 : f32
    %1172 = vector.broadcast %cst_284 : f32 to vector<8x8xf32>
    %1173 = arith.mulf %1171, %1172 : vector<8x8xf32>
    %1174 = vector.broadcast %314 : vector<1x8xf32> to vector<8x8xf32>
    %1175 = arith.addf %1173, %1174 : vector<8x8xf32>
    %cst_285 = arith.constant dense<0xFF800000> : vector<8xf32>
    %1176 = vector.multi_reduction <maximumf>, %1175, %cst_285 [1] : vector<8x8xf32> to vector<8xf32>
    %1177 = vector.shape_cast %1176 : vector<8xf32> to vector<8x1xf32>
    %1178 = vector.broadcast %1177 : vector<8x1xf32> to vector<8x8xf32>
    %1179 = arith.subf %1175, %1178 : vector<8x8xf32>
    %1180 = math.exp %1179 : vector<8x8xf32>
    %cst_286 = arith.constant dense<0.000000e+00> : vector<8xf32>
    %1181 = vector.multi_reduction <add>, %1180, %cst_286 [1] : vector<8x8xf32> to vector<8xf32>
    %1182 = vector.shape_cast %1181 : vector<8xf32> to vector<8x1xf32>
    %1183 = tpu.reciprocal %1182 {approx = true} : vector<8x1xf32> -> vector<8x1xf32>
    %1184 = vector.broadcast %1183 : vector<8x1xf32> to vector<8x8xf32>
    %1185 = arith.mulf %1180, %1184 : vector<8x8xf32>
    %1186 = arith.truncf %1185 : vector<8x8xf32> to vector<8x8xbf16>
    %1187 = arith.truncf %1168 : vector<8x8xf32> to vector<8x8xbf16>
    %cst_287 = arith.constant dense<0.000000e+00> : vector<8x8xf32>
    %1188 = tpu.matmul %1186, %1187, %cst_287 {dimension_numbers = #tpu.dot_dimension_numbers<[1], [0], [0], [1], [0, 0, 1, 1], [], []>} : vector<8x8xbf16>, vector<8x8xbf16>, vector<8x8xf32> -> vector<8x8xf32>
    %1189 = arith.truncf %1188 : vector<8x8xf32> to vector<8x8xbf16>
    %1190 = vector.extract_strided_slice %963 {offsets = [3, 0, 0], sizes = [1, 8, 32], strides = [1, 1, 1]} : vector<4x8x32xbf16> to vector<1x8x32xbf16>
    %1191 = vector.shape_cast %1190 : vector<1x8x32xbf16> to vector<8x32xbf16>
    %cst_288 = arith.constant dense<0.000000e+00> : vector<8x32xf32>
    %1192 = tpu.matmul %1189, %1191, %cst_288 {dimension_numbers = #tpu.dot_dimension_numbers<[1], [0], [0], [1], [0, 0, 1, 1], [], []>} : vector<8x8xbf16>, vector<8x32xbf16>, vector<8x32xf32> -> vector<8x32xf32>
    %1193 = arith.addf %1144, %1192 : vector<8x32xf32>
    %1194 = arith.addf %936, %1193 : vector<8x32xf32>
    %1195 = vector.shape_cast %949 : vector<32xf32> to vector<1x32xf32>
    %1196 = vector.broadcast %1195 : vector<1x32xf32> to vector<8x32xf32>
    %1197 = arith.addf %1194, %1196 : vector<8x32xf32>
    %cst_289 = arith.constant dense<0.000000e+00> : vector<8xf32>
    %1198 = vector.multi_reduction <add>, %1197, %cst_289 [1] : vector<8x32xf32> to vector<8xf32>
    %1199 = vector.shape_cast %1198 : vector<8xf32> to vector<8x1xf32>
    %cst_290 = arith.constant 3.200000e+01 : f32
    %1200 = vector.broadcast %cst_290 : f32 to vector<8x1xf32>
    %1201 = arith.divf %1199, %1200 : vector<8x1xf32>
    %1202 = arith.mulf %1197, %1197 : vector<8x32xf32>
    %cst_291 = arith.constant dense<0.000000e+00> : vector<8xf32>
    %1203 = vector.multi_reduction <add>, %1202, %cst_291 [1] : vector<8x32xf32> to vector<8xf32>
    %1204 = vector.shape_cast %1203 : vector<8xf32> to vector<8x1xf32>
    %cst_292 = arith.constant 3.200000e+01 : f32
    %1205 = vector.broadcast %cst_292 : f32 to vector<8x1xf32>
    %1206 = arith.divf %1204, %1205 : vector<8x1xf32>
    %1207 = arith.mulf %1201, %1201 : vector<8x1xf32>
    %1208 = arith.subf %1206, %1207 : vector<8x1xf32>
    %cst_293 = arith.constant 0.000000e+00 : f32
    %1209 = vector.broadcast %cst_293 : f32 to vector<8x1xf32>
    %1210 = arith.maximumf %1208, %1209 : vector<8x1xf32>
    %1211 = vector.broadcast %1201 : vector<8x1xf32> to vector<8x32xf32>
    %1212 = arith.subf %1197, %1211 : vector<8x32xf32>
    %cst_294 = arith.constant 9.99999974E-6 : f32
    %1213 = vector.broadcast %cst_294 : f32 to vector<8x1xf32>
    %1214 = arith.addf %1210, %1213 : vector<8x1xf32>
    %1215 = math.rsqrt %1214 : vector<8x1xf32>
    %1216 = vector.broadcast %1215 : vector<8x1xf32> to vector<8x32xf32>
    %1217 = arith.mulf %1212, %1216 : vector<8x32xf32>
    %1218 = vector.shape_cast %945 : vector<32xf32> to vector<1x32xf32>
    %1219 = vector.broadcast %1218 : vector<1x32xf32> to vector<8x32xf32>
    %1220 = arith.mulf %1217, %1219 : vector<8x32xf32>
    %1221 = vector.shape_cast %947 : vector<32xf32> to vector<1x32xf32>
    %1222 = vector.broadcast %1221 : vector<1x32xf32> to vector<8x32xf32>
    %1223 = arith.addf %1220, %1222 : vector<8x32xf32>
    %1224 = arith.truncf %1223 : vector<8x32xf32> to vector<8x32xbf16>
    %cst_295 = arith.constant dense<0.000000e+00> : vector<8x128xf32>
    %1225 = tpu.matmul %1224, %966, %cst_295 {dimension_numbers = #tpu.dot_dimension_numbers<[1], [0], [0], [1], [0, 0, 1, 1], [], []>} : vector<8x32xbf16>, vector<32x128xbf16>, vector<8x128xf32> -> vector<8x128xf32>
    %1226 = vector.shape_cast %957 : vector<128xf32> to vector<1x128xf32>
    %1227 = vector.broadcast %1226 : vector<1x128xf32> to vector<8x128xf32>
    %1228 = arith.addf %1225, %1227 : vector<8x128xf32>
    %1229 = arith.mulf %1228, %1228 : vector<8x128xf32>
    %1230 = arith.mulf %1228, %1229 : vector<8x128xf32>
    %cst_296 = arith.constant 4.471500e-02 : f32
    %1231 = vector.broadcast %cst_296 : f32 to vector<8x128xf32>
    %1232 = arith.mulf %1231, %1230 : vector<8x128xf32>
    %1233 = arith.addf %1228, %1232 : vector<8x128xf32>
    %cst_297 = arith.constant 0.797884583 : f32
    %1234 = vector.broadcast %cst_297 : f32 to vector<8x128xf32>
    %1235 = arith.mulf %1234, %1233 : vector<8x128xf32>
    %1236 = math.tanh %1235 : vector<8x128xf32>
    %cst_298 = arith.constant 1.000000e+00 : f32
    %1237 = vector.broadcast %cst_298 : f32 to vector<8x128xf32>
    %1238 = arith.addf %1237, %1236 : vector<8x128xf32>
    %cst_299 = arith.constant 5.000000e-01 : f32
    %1239 = vector.broadcast %cst_299 : f32 to vector<8x128xf32>
    %1240 = arith.mulf %1239, %1238 : vector<8x128xf32>
    %1241 = arith.mulf %1228, %1240 : vector<8x128xf32>
    %1242 = arith.truncf %1241 : vector<8x128xf32> to vector<8x128xbf16>
    %cst_300 = arith.constant dense<0.000000e+00> : vector<8x32xf32>
    %1243 = tpu.matmul %1242, %969, %cst_300 {dimension_numbers = #tpu.dot_dimension_numbers<[1], [0], [0], [1], [0, 0, 1, 1], [], []>} : vector<8x128xbf16>, vector<128x32xbf16>, vector<8x32xf32> -> vector<8x32xf32>
    %1244 = vector.shape_cast %951 : vector<32xf32> to vector<1x32xf32>
    %1245 = vector.broadcast %1244 : vector<1x32xf32> to vector<8x32xf32>
    %1246 = arith.addf %1243, %1245 : vector<8x32xf32>
    %1247 = arith.addf %1197, %1246 : vector<8x32xf32>
    %c3_i32_301 = arith.constant 3 : i32
    %1248 = vector.shape_cast %1247 : vector<8x32xf32> to vector<1x8x32xf32>
    %c0_302 = arith.constant 0 : index
    %c0_303 = arith.constant 0 : index
    %c0_304 = arith.constant 0 : index
    %1249 = vector.load %arg10[%c0_302, %c0_303, %c0_304] : memref<1x8x32xf32, #tpu.memory_space<vmem>>, vector<1x8x32xf32>
    tpu.vector_store %arg10[%c0_302, %c0_303, %c0_304], %1248 {strides = array<i32>} : memref<1x8x32xf32, #tpu.memory_space<vmem>>, vector<1x8x32xf32>,
    return
  }
  func.func @transform_0(%arg0: i32) -> (i32, i32, i32) {
    %c0_i32 = arith.constant 0 : i32
    %c0_i32_0 = arith.constant 0 : i32
    %c0_i32_1 = arith.constant 0 : i32
    return %arg0, %c0_i32, %c0_i32_0 : i32, i32, i32
  }
  func.func @transform_1(%arg0: i32) -> (i32, i32, i32) {
    %c0_i32 = arith.constant 0 : i32
    %c0_i32_0 = arith.constant 0 : i32
    %c0_i32_1 = arith.constant 0 : i32
    %c0_i32_2 = arith.constant 0 : i32
    return %c0_i32, %c0_i32_0, %c0_i32_1 : i32, i32, i32
  }
  func.func @transform_2(%arg0: i32) -> (i32, i32, i32) {
    %c0_i32 = arith.constant 0 : i32
    %c0_i32_0 = arith.constant 0 : i32
    %c0_i32_1 = arith.constant 0 : i32
    %c0_i32_2 = arith.constant 0 : i32
    return %c0_i32, %c0_i32_0, %c0_i32_1 : i32, i32, i32
  }
  func.func @transform_3(%arg0: i32) -> (i32, i32, i32) {
    %c0_i32 = arith.constant 0 : i32
    %c0_i32_0 = arith.constant 0 : i32
    %c0_i32_1 = arith.constant 0 : i32
    %c0_i32_2 = arith.constant 0 : i32
    return %c0_i32, %c0_i32_0, %c0_i32_1 : i32, i32, i32
  }
  func.func @transform_4(%arg0: i32) -> (i32, i32) {
    %c0_i32 = arith.constant 0 : i32
    %c0_i32_0 = arith.constant 0 : i32
    %c0_i32_1 = arith.constant 0 : i32
    return %c0_i32, %c0_i32_0 : i32, i32
  }
  func.func @transform_5(%arg0: i32) -> (i32, i32, i32, i32) {
    %c0_i32 = arith.constant 0 : i32
    %c0_i32_0 = arith.constant 0 : i32
    %c0_i32_1 = arith.constant 0 : i32
    %c0_i32_2 = arith.constant 0 : i32
    %c0_i32_3 = arith.constant 0 : i32
    return %c0_i32, %c0_i32_0, %c0_i32_1, %c0_i32_2 : i32, i32, i32, i32
  }
  func.func @transform_6(%arg0: i32) -> (i32, i32, i32, i32) {
    %c0_i32 = arith.constant 0 : i32
    %c0_i32_0 = arith.constant 0 : i32
    %c0_i32_1 = arith.constant 0 : i32
    %c0_i32_2 = arith.constant 0 : i32
    %c0_i32_3 = arith.constant 0 : i32
    return %c0_i32, %c0_i32_0, %c0_i32_1, %c0_i32_2 : i32, i32, i32, i32
  }
  func.func @transform_7(%arg0: i32) -> (i32, i32, i32) {
    %c0_i32 = arith.constant 0 : i32
    %c0_i32_0 = arith.constant 0 : i32
    %c0_i32_1 = arith.constant 0 : i32
    %c0_i32_2 = arith.constant 0 : i32
    return %c0_i32, %c0_i32_0, %c0_i32_1 : i32, i32, i32
  }
  func.func @transform_8(%arg0: i32) -> (i32, i32, i32) {
    %c0_i32 = arith.constant 0 : i32
    %c0_i32_0 = arith.constant 0 : i32
    %c0_i32_1 = arith.constant 0 : i32
    %c0_i32_2 = arith.constant 0 : i32
    return %c0_i32, %c0_i32_0, %c0_i32_1 : i32, i32, i32
  }
  func.func @transform_9(%arg0: i32) -> (i32, i32, i32) {
    %c0_i32 = arith.constant 0 : i32
    %c0_i32_0 = arith.constant 0 : i32
    %c0_i32_1 = arith.constant 0 : i32
    return %arg0, %c0_i32, %c0_i32_0 : i32, i32, i32
  }
}

</mosaic_0001>

<bundles_post_ra>
// kernel: tpu_custom_call.1
= control target key start
LH: loop header
LB: loop body
LE: loop exit
PB: predicated region body
PF: predicated region fallthrough
CT: control target
= control target key end

     0   :  { %14 = vsyncpa [#allocation4], 0  ;;  %s10480_s0 = inlined_call_operand.vmem [shape: f32[2,16,32], index: 0, kind: input, shape index: {}]   ;;  %s10481_s1 = inlined_call_operand.vmem [shape: f32[1,8,32], index: 1, kind: input, shape index: {}]   ;;  %s10482_s2 = inlined_call_operand.vmem [shape: f32[4,8,32], index: 2, kind: input, shape index: {}]   ;;  %s10483_s3 = inlined_call_operand.vmem [shape: f32[4,12,8], index: 3, kind: input, shape index: {}]   ;;  %s10484_s4 = inlined_call_operand.vmem [shape: f32[4,128], index: 4, kind: input, shape index: {}]   ;;  %s10485_s5 = inlined_call_operand.vmem [shape: bf16[4,12,32,8], index: 5, kind: input, shape index: {}]   ;;  %s10486_s6 = inlined_call_operand.vmem [shape: bf16[4,4,8,32], index: 6, kind: input, shape index: {}]   ;;  %s10487_s7 = inlined_call_operand.vmem [shape: bf16[4,32,128], index: 7, kind: input, shape index: {}]   ;;  %s10488_s8 = inlined_call_operand.vmem [shape: bf16[4,128,32], index: 8, kind: input, shape index: {}]   ;;  %s10489_s9 = inlined_call_operand.hbm [shape: f32[2,8,32], index: 9, kind: output, shape index: {}]  }
   0x1   :  { %16 = vsyncpa [#allocation4 + $0x1], 0  ;;  %s8909_s30 = smov 0   ;;  %s8911_s10 = smov 0  }
   0x2   :  { %s8913_s11 = smov 0   ;;  %s8915_s12 = smov 0  }
   0x3 LB: > { %s8930_s13 = sadd.s32 4294967295, %s8853_s12   ;;  %s6951_s14 = sadd.s32 4294967294, %s8853_s12   ;;  %s8853_s12 = sphi %s8915_s12, %s10495_s12   ;;  %s8849_s11 = sphi %s8913_s11, %s10494_s11   ;;  %s8845_s10 = sphi %s8911_s10, %s10493_s10   ;;  %s8841_s30 = sphi %s8909_s30, %s10492_s30  }
   0x4   : > { %s8934_s15 = sadd.s32 1, %s8853_s12   ;;  %s223_s16 = sadd.s32 1, %s8849_s11 }
   0x5   : > { %s220_s17 = ssub.s32 %s8853_s12, %s8934_s15  ;;  %p233_p0 = scmp.ne.s32.totalorder %s8849_s11, %s8845_s10 }
   0x6   : > { %p221_p1 = scmp.eq.s32.totalorder %s220_s17, 0  ;;  %p234_p2 = scmp.eq.s32.totalorder %s8930_s13, 1 }
   0x7   : > { %p239_p3 = scmp.ne.s32.totalorder %s8845_s10, %s8841_s30  ;;  %p240_p4 = scmp.eq.s32.totalorder %s6951_s14, 1 }
   0x8   : > { %s8945_s18 = scalar_select %p221_p1, %s8849_s11, %s223_s16  }
   0x9   : > { %p8947_p5 = por %p234_p2, %p233_p0  ;;  %p8951_p6 = por %p240_p4, %p239_p3 }
   0xa   : > { %p6954_p7 = scmp.ge.s32.totalorder %s8853_s12, 1  ;;  %p290_p8 = scmp.lt.s32.totalorder %s8853_s12, 3 }
   0xc   : > { %p291_p9 = pnand %p6954_p7, %p290_p8 }
   0xd   : > { %p326_p10 = scmp.lt.s32.totalorder (!%p291_p9), %s8930_s13, 1  ;;  %vm410_vm0 = vcmask (!%p291_p9), 261120   ;;  %v8542_v8 = vld [vmem:[%s10485_s5] sm:$0xff] (!%p291_p9)   ;;  %v8855_v9 = vmov (!%p291_p9), 0.0   ;;  %v8543_v10 = vld [vmem:[%s10485_s5 + $0x8] sm:$0xff] (!%p291_p9)   ;;  %vm8856_vm1 = vmmov (!%p291_p9), 0   ;;  %v444_v25 = vlaneseq (!%p291_p9) }
   0xe   : > { %294 = sbr.rel (%p291_p9) target bundleno = 18924 (0x49ec), region = 56  ;;  %7716 = vmatprep.subr.bf16.mxu1 (!%p291_p9), %v8855_v9  ;;  %2046 = vst.msk [vmem:[#allocation2 + $0x10] sm:$0xff] (!%p291_p9), %vm410_vm0, %v8855_v9  ;;  %7746 = vmatprep.subr.bf16.mxu0 (!%p291_p9), %v8855_v9  ;;  %v8995_v30 = vld [vmem:[%s10482_s2] sm:$0xff] (!%p291_p9)  ;;  %v8545_v46 = vld [vmem:[%s10485_s5 + $0x48] sm:$0xff] (!%p291_p9)   ;;  %vm633_vm2 = vcmask (!%p291_p9), 64512   ;;  %vm683_vm3 = vcmask (!%p291_p9), 130048  }
   0xf   : > { %7717 = vmatpush3.bf16.msra.mxu1 (!%p291_p9), %v8542_v8  ;;  %7720 = vmatprep.mubr.msk.bf16.mxu1 (!%p291_p9), %vm8856_vm1, %v8855_v9  ;;  %v8987_v28 = vshrl.u32 (!%p291_p9), %v444_v25, 7  ;;  %v8544_v44 = vld [vmem:[%s10485_s5 + $0x40] sm:$0xff] (!%p291_p9)   ;;  %v8547_v48 = vld [vmem:[%s10485_s5 + $0x88] sm:$0xff] (!%p291_p9)   ;;  %vm1047_vm4 = vcmask (!%p291_p9), 1043456   ;;  %s7424_s24 = sshll.u32 (!%p291_p9), %s8930_s13, 7  ;;  %s8858_s17 = smov (!%p291_p9), [#allocation3]  }
  0x10   : > { %7718 = vmatprep.subr.bf16.mxu1 (!%p291_p9), %v8855_v9  ;;  %7748 = vmatprep.mubr.msk.bf16.mxu0 (!%p291_p9), %vm8856_vm1, %v8855_v9  ;;  %v8546_v47 = vld [vmem:[%s10485_s5 + $0x80] sm:$0xff] (!%p291_p9)   ;;  %s10437_s14 = scalar_lea.hbm (!%p291_p9), %s10489_s9, %s7424_s24 }
  0x11   : > { %v8990_v29 = vsub.s32 (!%p291_p9), 0, %v8987_v28  ;;  %v9000_v34 = vsub.s32 (!%p291_p9), 1, %v8987_v28  ;;  %v9037_v49 = vld [vmem:[%s10483_s3] sm:$0xff] (!%p291_p9)  ;;  %v9042_v57 = vsub.s32 (!%p291_p9), 4, %v8987_v28 }
  0x13   : > { %7719 = vmatpush3.bf16.msra.mxu1 (!%p291_p9), %v8543_v10  ;;  %v447_v33 = vrot.slane (!%p291_p9), %v8995_v30, %v8990_v29  ;;  %v453_v38 = vrot.slane (!%p291_p9), %v8995_v30, %v9000_v34  ;;  %v460_v50 = vrot.slane (!%p291_p9), %v9037_v49, %v8990_v29  ;;  %v520_v59 = vrot.slane (!%p291_p9), %v9037_v49, %v9042_v57 }
  0x14   : > { %7724 = vmatprep.subr.bf16.mxu1 (!%p291_p9), %v8855_v9 }
  0x15   : > { %s327_s21 = scalar_select %p326_p10, %s8930_s13, 1 }
  0x17   : > { %s7427_s22 = sshll.u32 %s327_s21, 4 }
  0x18   : > { %s8962_s25 = scalar_lea.vmem %s10480_s0, %s7427_s22  ;;  %s323_s22 = sand.u32 1, %s8845_s10  }
  0x19   : > { %v332_v0 = vld [vmem:[%s8962_s25] sm:$0xff]  ;;  %v333_v1 = vld [vmem:[%s8962_s25 + $0x8] sm:$0xff]  ;;  %s6955_s23 = sshll.u32 %s323_s22, 3  ;;  %s6879_s13 = scalar_lea.sflag [#allocation4], %s323_s22 }
  0x1a   : > { %v411_v2 = vsel %vm410_vm0, %v332_v0, 0.0  ;;  %v420_v3 = vmul.f32 %v332_v0, %v332_v0  ;;  %v414_v4 = vsel %vm410_vm0, %v333_v1, 0.0  ;;  %v421_v5 = vmul.f32 %v333_v1, %v333_v1  ;;  %s325_s26 = scalar_lea.vmem [#allocation3], %s6955_s23 }
  0x1b   : > { %412 = vadd.xlane.f32.xlu0 %v411_v2  ;;  %v9049_v2 = vld [vmem:[%s10483_s3 + $0x8] sm:$0xf]  ;;  %s6892_s27 = sshll.u32 %s325_s26, 4  ;;  %s10439_s27 = int_to_ptr.vmem [resolvable:$true] %s6892_s27 }
  0x1c   : > { %v422_v6 = vsel %vm410_vm0, %v420_v3, 0.0  ;;  %v425_v7 = vsel %vm410_vm0, %v421_v5, 0.0  ;;  %s8791_s16 = scalar_lea.vmem %s10439_s27, 128 }
  0x1d   : > { %423 = vadd.xlane.f32.xlu1 %v422_v6  ;;  %p8792_p11 = scmp.ne.s32.totalorder %s10439_s27, %s8791_s16 }
  0x1f   : > { %415 = vadd.xlane.f32.xlu0 %v414_v4  ;;  %v577_v4 = vrot.slane %v9049_v2, %v8990_v29  ;;  %p8793_p12 = pnand %p8792_p11, %p8947_p5 }
  0x21   : > { %426 = vadd.xlane.f32.xlu1 %v425_v7  ;;  %p8794_p13 = pneg %p8793_p12 }
  0xa8   : > { %v413_v11 = vpop.xlane.xlu0 %412 }
  0xa9   : > { %v418_v12 = vmul.f32 0.03125, %v413_v11 }
  0xaa   : > { %v424_v13 = vpop.xlane.xlu1 %423 }
  0xab   : > { %v430_v14 = vmul.f32 %v418_v12, %v418_v12  ;;  %v428_v15 = vmul.f32 0.03125, %v424_v13  ;;  %v436_v31 = vsub.f32 %v332_v0, %v418_v12  ;;  %v8548_v13 = vld [vmem:[%s10485_s5 + $0x10] sm:$0xff]  }
  0xac   : > { %v416_v16 = vpop.xlane.xlu0 %415 }
  0xad   : > { %v432_v17 = vsub.f32 %v428_v15, %v430_v14  ;;  %v419_v18 = vmul.f32 0.03125, %v416_v16  ;;  %v8549_v15 = vld [vmem:[%s10485_s5 + $0x18] sm:$0xff]   ;;  %v8550_v16 = vld [vmem:[%s10485_s5 + $0x90] sm:$0xff]  }
  0xae   : > { %v427_v19 = vpop.xlane.xlu1 %426 }
  0xaf   : > { %v434_v20 = vmax.f32 %v432_v17, 0.0  ;;  %v431_v21 = vmul.f32 %v419_v18, %v419_v18  ;;  %v429_v22 = vmul.f32 0.03125, %v427_v19  ;;  %v437_v36 = vsub.f32 %v333_v1, %v419_v18  ;;  %v8551_v17 = vld [vmem:[%s10485_s5 + $0x98] sm:$0xff]  }
  0xb1   : > { %v438_v23 = vadd.f32 1e-05, %v434_v20  ;;  %v433_v24 = vsub.f32 %v429_v22, %v431_v21 }
  0xb3   : > { %8678 = vrsqrt.f32 %v438_v23  ;;  %v435_v26 = vmax.f32 %v433_v24, 0.0 }
  0xb5   : > { %v439_v27 = vadd.f32 1e-05, %v435_v26 }
  0xb7   : > { %8680 = vrsqrt.f32 %v439_v27  ;;  %v756_v27 = vrot.slane %v9037_v49, %v9000_v34 }
  0xbd   : > { %v8679_v32 = vpop.eup %8678 }
  0xbe   : > { %v442_v35 = vmul.f32 %v8679_v32, %v436_v31 }
  0xc0   : > { %v448_v39 = vmul.f32 %v447_v33, %v442_v35 }
  0xc1   : > { %v8681_v37 = vpop.eup %8680 }
  0xc2   : > { %v443_v40 = vmul.f32 %v8681_v37, %v437_v36  ;;  %v454_v42 = vadd.f32 %v453_v38, %v448_v39  ;;  %v870_v39 = vrot.slane %v9049_v2, %v9000_v34 }
  0xc4   : > { %v449_v41 = vmul.f32 %v447_v33, %v443_v40 }
  0xc6   : > { %v455_v43 = vadd.f32 %v453_v38, %v449_v41 }
  0xc8   : > { %v9007_v45 = vpack.c.bf16 %v455_v43, %v454_v42 }
  0xca   : > { %7721 = vmatmul.mubr.msk.bf16.vlgmr.msra.gmra.mrb[0].mxu1 %vm410_vm0, %v9007_v45 }
  0xcb   : > { %7725 = vmatpush3.bf16.msra.mxu1 %v8544_v44  ;;  %7728 = vmatprep.mubr.msk.bf16.mxu1 %vm8856_vm1, %v8855_v9 }
  0xcc   : > { %7726 = vmatprep.subr.bf16.mxu1 %v8855_v9 }
  0xcf   : > { %7727 = vmatpush3.bf16.msra.mxu1 %v8545_v46 }
  0xd0   : > { %7732 = vmatprep.subr.bf16.mxu1 %v8855_v9 }
  0xd2   : > { %7729 = vmatmul.mubr.msk.bf16.vlgmr.msra.gmra.mrb[4].mxu1 %vm410_vm0, %v9007_v45 }
  0xd3   : > { %7733 = vmatpush3.bf16.msra.mxu1 %v8546_v47  ;;  %7736 = vmatprep.mubr.msk.bf16.mxu1 %vm8856_vm1, %v8855_v9 }
  0xd4   : > { %7734 = vmatprep.subr.bf16.mxu1 %v8855_v9 }
  0xd7   : > { %7735 = vmatpush3.bf16.msra.mxu1 %v8547_v48 }
  0xd8   : > { %7740 = vmatprep.subr.bf16.mxu1 %v8855_v9 }
  0xda   : > { %7737 = vmatmul.mubr.msk.bf16.vlgmr.msra.gmra.mrb[8].mxu1 %vm410_vm0, %v9007_v45 }
  0xdb   : > { %7742 = vmatprep.mubr.msk.bf16.mxu1 %vm8856_vm1, %v8855_v9 }
 0x19d   : > { %v510_v51 = vpop.f32.mrb[0].mxu1 }
 0x19e   : > { %v7722_v52 = vpop.f32.mrb[1].mxu1  ;;  %v511_v54 = vadd.f32 %v510_v51, %v460_v50 }
 0x19f   : > { %v513_v53 = vpop.f32.mrb[2].mxu1 }
 0x1a0   : > { %v514_v55 = vadd.f32 %v513_v53, %v460_v50  ;;  %v7723_v56 = vpop.f32.mrb[3].mxu1 }
 0x1a2   : > { %v631_v58 = vpack.c.bf16 %v514_v55, %v511_v54 }
 0x1a5   : > { %v567_v60 = vpop.f32.mrb[4].mxu1 }
 0x1a6   : > { %v7730_v61 = vpop.f32.mrb[5].mxu1  ;;  %v568_v63 = vadd.f32 %v567_v60, %v520_v59 }
 0x1a7   : > { %v570_v62 = vpop.f32.mrb[6].mxu1 }
 0x1a8   : > { %v571_v0 = vadd.f32 %v570_v62, %v520_v59  ;;  %v7731_v1 = vpop.f32.mrb[7].mxu1 }
 0x1aa   : > { %v632_v3 = vpack.c.bf16 %v571_v0, %v568_v63 }
 0x1ac   : > { %v638_v5 = vsel %vm633_vm2, %v632_v3, 0  ;;  %v8552_v3 = vld [vmem:[%s10485_s5 + $0x50] sm:$0xff]  }
 0x1ad   : > { %v624_v6 = vpop.f32.mrb[8].mxu1  ;;  %7741 = vmatpush3.bf16.xpose.msra.mxu1 %v638_v5  ;;  %v8553_v5 = vld [vmem:[%s10485_s5 + $0x58] sm:$0xff]  }
 0x1ae   : > { %v7738_v7 = vpop.f32.mrb[9].mxu1  ;;  %7752 = vmatprep.subr.bf16.mxu1 %v8855_v9  ;;  %v625_v10 = vadd.f32 %v624_v6, %v577_v4 }
 0x1af   : > { %v627_v8 = vpop.f32.mrb[10].mxu1 }
 0x1b0   : > { %v628_v11 = vadd.f32 %v627_v8, %v577_v4  ;;  %v7739_v12 = vpop.f32.mrb[11].mxu1 }
 0x1b1   : > { %v9120_v12 = vsub.s32 5, %v8987_v28 }
 0x1b2   : > { %v707_v14 = vpack.c.bf16 %v628_v11, %v625_v10 }
 0x1b4   : > { %7743 = vmatmul.mubr.msk.bf16.vlgmr.msra.gmra.mrb[12].mxu1 %vm633_vm2, %v631_v58  ;;  %7747 = vmatpush3.bf16.msra.mxu0 %v707_v14 }
 0x1b5   : > { %7753 = vmatpush3.bf16.msra.mxu1 %v8548_v13  ;;  %7756 = vmatprep.mubr.msk.bf16.mxu1 %vm8856_vm1, %v8855_v9  ;;  %v813_v13 = vrot.slane %v9037_v49, %v9120_v12 }
 0x1b6   : > { %7754 = vmatprep.subr.bf16.mxu1 %v8855_v9  ;;  %7760 = vmatprep.subr.bf16.mxu0 %v8855_v9 }
 0x1b9   : > { %7755 = vmatpush3.bf16.msra.mxu1 %v8549_v15 }
 0x1ba   : > { %7768 = vmatprep.subr.bf16.mxu1 %v8855_v9 }
 0x1bc   : > { %7757 = vmatmul.mubr.msk.bf16.vlgmr.msra.gmra.mrb[16].mxu1 %vm410_vm0, %v9007_v45 }
 0x1bd   : > { %7769 = vmatpush3.bf16.msra.mxu1 %v8550_v16  ;;  %7772 = vmatprep.mubr.msk.bf16.mxu1 %vm8856_vm1, %v8855_v9 }
 0x1be   : > { %7770 = vmatprep.subr.bf16.mxu1 %v8855_v9 }
 0x1c1   : > { %7771 = vmatpush3.bf16.msra.mxu1 %v8551_v17 }
 0x1c2   : > { %7782 = vmatprep.subr.bf16.mxu1 %v8855_v9 }
 0x1c4   : > { %7773 = vmatmul.mubr.msk.bf16.vlgmr.msra.gmra.mrb[20].mxu1 %vm410_vm0, %v9007_v45 }
 0x1c5   : > { %7784 = vmatprep.mubr.msk.bf16.mxu1 %vm8856_vm1, %v8855_v9 }
 0x287   : > { %v674_v18 = vpop.f32.mrb[12].mxu1 }
 0x288   : > { %v681_v19 = vmul.f32 0.35355338, %v674_v18  ;;  %v7744_v20 = vpop.f32.mrb[13].mxu1 }
 0x289   : > { %v677_v21 = vpop.f32.mrb[14].mxu1 }
 0x28a   : > { %v682_v22 = vmul.f32 0.35355338, %v677_v21  ;;  %v7745_v23 = vpop.f32.mrb[15].mxu1  ;;  %v684_v24 = vsel %vm683_vm3, %v681_v19, -inf }
 0x28b   : > { %685 = vmax.xlane.f32.xlu0 %v684_v24 }
 0x28c   : > { %v687_v26 = vsel %vm683_vm3, %v682_v22, -inf }
 0x28d   : > { %688 = vmax.xlane.f32.xlu1 %v687_v26 }
 0x28f   : > { %v803_v31 = vpop.f32.mrb[16].mxu1 }
 0x290   : > { %v7758_v32 = vpop.f32.mrb[17].mxu1  ;;  %v9087_v35 = vadd.f32 %v803_v31, %v756_v27 }
 0x291   : > { %v806_v33 = vpop.f32.mrb[18].mxu1 }
 0x292   : > { %v9089_v36 = vadd.f32 %v806_v33, %v756_v27  ;;  %v7759_v37 = vpop.f32.mrb[19].mxu1 }
 0x294   : > { %v924_v38 = vpack.c.bf16 %v9089_v36, %v9087_v35 }
 0x297   : > { %v917_v40 = vpop.f32.mrb[20].mxu1 }
 0x298   : > { %v7774_v41 = vpop.f32.mrb[21].mxu1  ;;  %v918_v43 = vadd.f32 %v917_v40, %v870_v39 }
 0x299   : > { %v920_v42 = vpop.f32.mrb[22].mxu1 }
 0x29a   : > { %v921_v44 = vadd.f32 %v920_v42, %v870_v39  ;;  %v7775_v46 = vpop.f32.mrb[23].mxu1 }
 0x29b   : > { %v387_v46 = vld [vmem:[%s10486_s6 + $0x4] sm:$0xf] }
 0x29c   : > { %v998_v47 = vpack.c.bf16 %v921_v44, %v918_v43 }
 0x29e   : > { %7783 = vmatpush3.bf16.msra.mxu1 %v998_v47  ;;  %v1049_v47 = vsel %vm1047_vm4, %v387_v46, 0 }
 0x29f   : > { %7794 = vmatprep.subr.bf16.mxu1 %v8855_v9 }
 0x318   : > { %v686_v48 = vpop.xlane.xlu0 %685 }
 0x319   : > { %v690_v50 = vsub.f32 %v681_v19, %v686_v48 }
 0x31a   : > { %v689_v51 = vpop.xlane.xlu1 %688 }
 0x31b   : > { %v692_v52 = vmul.f32 1.442695, %v690_v50  ;;  %v691_v53 = vsub.f32 %v682_v22, %v689_v51 }
 0x31d   : > { %8682 = vpow2.f32 %v692_v52  ;;  %v694_v54 = vmul.f32 1.442695, %v691_v53  ;;  %v386_v53 = vld [vmem:[%s10486_s6] sm:$0xf] }
 0x31f   : > { %8684 = vpow2.f32 %v694_v54 }
 0x327   : > { %v8683_v55 = vpop.eup %8682 }
 0x328   : > { %v696_v56 = vsel %vm683_vm3, %v8683_v55, 0.0 }
 0x329   : > { %v8685_v58 = vpop.eup %8684  ;;  %697 = vadd.xlane.f32.xlu0 %v696_v56 }
 0x32a   : > { %v699_v59 = vsel %vm683_vm3, %v8685_v58, 0.0 }
 0x32b   : > { %700 = vadd.xlane.f32.xlu1 %v699_v59  ;;  %v8554_v59 = vld [vmem:[%s10485_s5 + $0x60] sm:$0xff]  }
 0x3b6   : > { %v698_v60 = vpop.xlane.xlu0 %697 }
 0x3b7   : > { %8686 = vrcp.f32 %v698_v60  ;;  %v8555_v60 = vld [vmem:[%s10485_s5 + $0x68] sm:$0xff]  }
 0x3b8   : > { %v701_v61 = vpop.xlane.xlu1 %700 }
 0x3b9   : > { %8688 = vrcp.f32 %v701_v61 }
 0x3c1   : > { %v8687_v62 = vpop.eup %8686 }
 0x3c2   : > { %v704_v0 = vmul.f32 %v8687_v62, %v8683_v55 }
 0x3c3   : > { %v8689_v63 = vpop.eup %8688 }
 0x3c4   : > { %v705_v1 = vmul.f32 %v8689_v63, %v8685_v58  ;;  %v1096_v58 = vsel %vm1047_vm4, %v386_v53, 0 }
 0x3c6   : > { %v706_v4 = vpack.c.bf16 %v705_v1, %v704_v0  ;;  %v8556_v0 = vld [vmem:[%s10485_s5 + $0x20] sm:$0xff]  }
 0x3c8   : > { %7749 = vmatmul.mubr.msk.bf16.vlgmr.msra.gmra.mrb[0].mxu0 %vm683_vm3, %v706_v4  ;;  %v8557_v4 = vld [vmem:[%s10485_s5 + $0x28] sm:$0xff]  }
 0x3c9   : > { %7761 = vmatpush3.bf16.msra.mxu0 %v8552_v3  ;;  %7764 = vmatprep.mubr.msk.bf16.mxu0 %vm8856_vm1, %v8855_v9 }
 0x3ca   : > { %7762 = vmatprep.subr.bf16.mxu0 %v8855_v9 }
 0x3cd   : > { %7763 = vmatpush3.bf16.msra.mxu0 %v8553_v5 }
 0x3ce   : > { %7776 = vmatprep.subr.bf16.mxu0 %v8855_v9 }
 0x3d0   : > { %7765 = vmatmul.mubr.msk.bf16.vlgmr.msra.gmra.mrb[4].mxu0 %vm410_vm0, %v9007_v45 }
 0x3d1   : > { %7778 = vmatprep.mubr.msk.bf16.mxu0 %vm8856_vm1, %v8855_v9 }
 0x49b   : > { %v9113_v6 = vpop.f32.mrb[0].mxu0 }
 0x49c   : > { %v7750_v7 = vpop.f32.mrb[1].mxu0 }
 0x49d   : > { %v9115_v8 = vpop.f32.mrb[2].mxu0 }
 0x49e   : > { %v752_v10 = vpack.c.bf16 %v9115_v8, %v9113_v6  ;;  %v7751_v11 = vpop.f32.mrb[3].mxu0  ;;  %v8558_v8 = vld [vmem:[%s10485_s5 + $0xa0] sm:$0xff]  }
 0x49f   : > { %v9176_v11 = vsub.s32 6, %v8987_v28 }
 0x4a3   : > { %v860_v14 = vpop.f32.mrb[4].mxu0 }
 0x4a4   : > { %v7766_v15 = vpop.f32.mrb[5].mxu0  ;;  %v861_v17 = vadd.f32 %v860_v14, %v813_v13  ;;  %v1199_v14 = vrot.slane %v9037_v49, %v9176_v11 }
 0x4a5   : > { %v863_v16 = vpop.f32.mrb[6].mxu0 }
 0x4a6   : > { %v864_v18 = vadd.f32 %v863_v16, %v813_v13  ;;  %v7767_v19 = vpop.f32.mrb[7].mxu0  ;;  %v8559_v13 = vld [vmem:[%s10485_s5 + $0xa8] sm:$0xff]  }
 0x4a8   : > { %v925_v20 = vpack.c.bf16 %v864_v18, %v861_v17 }
 0x4aa   : > { %v930_v21 = vsel %vm633_vm2, %v925_v20, 0 }
 0x4ab   : > { %7777 = vmatpush3.bf16.xpose.msra.mxu0 %v930_v21 }
 0x4ac   : > { %7788 = vmatprep.subr.bf16.mxu0 %v8855_v9 }
 0x4b2   : > { %7779 = vmatmul.mubr.msk.bf16.vlgmr.msra.gmra.mrb[8].mxu0 %vm633_vm2, %v924_v38 }
 0x4b3   : > { %7790 = vmatprep.mubr.msk.bf16.mxu0 %vm8856_vm1, %v8855_v9  ;;  %7789 = vmatpush3.bf16.msra.mxu0 %v1049_v47 }
 0x4b4   : > { %7800 = vmatprep.subr.bf16.mxu0 %v8855_v9 }
 0x585   : > { %v966_v22 = vpop.f32.mrb[8].mxu0 }
 0x586   : > { %v973_v23 = vmul.f32 0.35355338, %v966_v22  ;;  %v7780_v24 = vpop.f32.mrb[9].mxu0 }
 0x587   : > { %v969_v26 = vpop.f32.mrb[10].mxu0 }
 0x588   : > { %v974_v27 = vmul.f32 0.35355338, %v969_v26  ;;  %v7781_v31 = vpop.f32.mrb[11].mxu0  ;;  %v975_v32 = vsel %vm683_vm3, %v973_v23, -inf }
 0x589   : > { %976 = vmax.xlane.f32.xlu0 %v975_v32 }
 0x58a   : > { %v978_v33 = vsel %vm683_vm3, %v974_v27, -inf }
 0x58b   : > { %979 = vmax.xlane.f32.xlu1 %v978_v33  ;;  %v9200_v33 = vsub.s32 2, %v8987_v28 }
 0x616   : > { %v977_v35 = vpop.xlane.xlu0 %976 }
 0x617   : > { %v981_v36 = vsub.f32 %v973_v23, %v977_v35  ;;  %v1142_v35 = vrot.slane %v9037_v49, %v9200_v33 }
 0x618   : > { %v980_v37 = vpop.xlane.xlu1 %979 }
 0x619   : > { %v983_v39 = vmul.f32 1.442695, %v981_v36  ;;  %v982_v38 = vsub.f32 %v974_v27, %v980_v37 }
 0x61b   : > { %8690 = vpow2.f32 %v983_v39  ;;  %v985_v40 = vmul.f32 1.442695, %v982_v38 }
 0x61d   : > { %8692 = vpow2.f32 %v985_v40 }
 0x625   : > { %v8691_v41 = vpop.eup %8690 }
 0x626   : > { %v987_v42 = vsel %vm683_vm3, %v8691_v41, 0.0 }
 0x627   : > { %v8693_v43 = vpop.eup %8692  ;;  %988 = vadd.xlane.f32.xlu0 %v987_v42 }
 0x628   : > { %v990_v44 = vsel %vm683_vm3, %v8693_v43, 0.0 }
 0x629   : > { %991 = vadd.xlane.f32.xlu1 %v990_v44 }
 0x6b4   : > { %v989_v48 = vpop.xlane.xlu0 %988 }
 0x6b5   : > { %8694 = vrcp.f32 %v989_v48 }
 0x6b6   : > { %v992_v50 = vpop.xlane.xlu1 %991 }
 0x6b7   : > { %8696 = vrcp.f32 %v992_v50 }
 0x6bf   : > { %v8695_v51 = vpop.eup %8694 }
 0x6c0   : > { %v995_v54 = vmul.f32 %v8695_v51, %v8691_v41 }
 0x6c1   : > { %v8697_v52 = vpop.eup %8696 }
 0x6c2   : > { %v996_v55 = vmul.f32 %v8697_v52, %v8693_v43  ;;  %v1256_v43 = vrot.slane %v9049_v2, %v9200_v33 }
 0x6c4   : > { %v997_v56 = vpack.c.bf16 %v996_v55, %v995_v54 }
 0x6c6   : > { %7785 = vmatmul.mubr.msk.bf16.vlgmr.msra.gmra.mrb[24].mxu1 %vm683_vm3, %v997_v56 }
 0x6c7   : > { %7795 = vmatpush3.bf16.msra.mxu1 %v1096_v58  ;;  %7796 = vmatprep.mubr.msk.bf16.mxu1 %vm8856_vm1, %v8855_v9 }
 0x6c8   : > { %7808 = vmatprep.subr.bf16.mxu1 %v8855_v9 }
 0x6ce   : > { %7797 = vmatmul.mubr.msk.bf16.vlgmr.msra.gmra.mrb[28].mxu1 %vm633_vm2, %v752_v10 }
 0x6cf   : > { %7809 = vmatpush3.bf16.msra.mxu1 %v8554_v59  ;;  %7812 = vmatprep.mubr.msk.bf16.mxu1 %vm8856_vm1, %v8855_v9 }
 0x6d0   : > { %7810 = vmatprep.subr.bf16.mxu1 %v8855_v9 }
 0x6d3   : > { %7811 = vmatpush3.bf16.msra.mxu1 %v8555_v60 }
 0x6d4   : > { %7824 = vmatprep.subr.bf16.mxu1 %v8855_v9 }
 0x6d6   : > { %7813 = vmatmul.mubr.msk.bf16.vlgmr.msra.gmra.mrb[32].mxu1 %vm410_vm0, %v9007_v45 }
 0x6d7   : > { %7826 = vmatprep.mubr.msk.bf16.mxu1 %vm8856_vm1, %v8855_v9 }
 0x799   : > { %v1036_v61 = vpop.f32.mrb[24].mxu1 }
 0x79a   : > { %v7786_v62 = vpop.f32.mrb[25].mxu1 }
 0x79b   : > { %v1039_v63 = vpop.f32.mrb[26].mxu1 }
 0x79c   : > { %v1043_v1 = vpack.c.bf16 %v1039_v63, %v1036_v61  ;;  %v7787_v3 = vpop.f32.mrb[27].mxu1 }
 0x79e   : > { %7791 = vmatmul.mubr.msk.bf16.vlgmr.msra.gmra.mrb[12].mxu0 %vm633_vm2, %v1043_v1 }
 0x79f   : > { %7801 = vmatpush3.bf16.msra.mxu0 %v8556_v0  ;;  %7804 = vmatprep.mubr.msk.bf16.mxu0 %vm8856_vm1, %v8855_v9 }
 0x7a0   : > { %7802 = vmatprep.subr.bf16.mxu0 %v8855_v9 }
 0x7a1   : > { %v1132_v5 = vpop.f32.mrb[28].mxu1 }
 0x7a2   : > { %v7798_v6 = vpop.f32.mrb[29].mxu1 }
 0x7a3   : > { %v1135_v7 = vpop.f32.mrb[30].mxu1  ;;  %7803 = vmatpush3.bf16.msra.mxu0 %v8557_v4 }
 0x7a4   : > { %v7799_v10 = vpop.f32.mrb[31].mxu1  ;;  %7816 = vmatprep.subr.bf16.mxu0 %v8855_v9 }
 0x7a5   : > { %v388_v10 = vld [vmem:[%s10486_s6 + $0x8] sm:$0xf] }
 0x7a6   : > { %7805 = vmatmul.mubr.msk.bf16.vlgmr.msra.gmra.mrb[16].mxu0 %vm410_vm0, %v9007_v45 }
 0x7a7   : > { %7817 = vmatpush3.bf16.msra.mxu0 %v8558_v8  ;;  %7820 = vmatprep.mubr.msk.bf16.mxu0 %vm8856_vm1, %v8855_v9 }
 0x7a8   : > { %7818 = vmatprep.subr.bf16.mxu0 %v8855_v9 }
 0x7a9   : > { %v1246_v15 = vpop.f32.mrb[32].mxu1 }
 0x7aa   : > { %v7814_v16 = vpop.f32.mrb[33].mxu1  ;;  %v1247_v18 = vadd.f32 %v1246_v15, %v1199_v14 }
 0x7ab   : > { %v1249_v17 = vpop.f32.mrb[34].mxu1  ;;  %7819 = vmatpush3.bf16.msra.mxu0 %v8559_v13  ;;  %v1434_v13 = vsel %vm1047_vm4, %v388_v10, 0 }
 0x7ac   : > { %v1250_v19 = vadd.f32 %v1249_v17, %v1199_v14  ;;  %v7815_v20 = vpop.f32.mrb[35].mxu1  ;;  %7830 = vmatprep.subr.bf16.mxu0 %v8855_v9 }
 0x7ad   : > { %v8560_v20 = vld [vmem:[%s10485_s5 + $0x30] sm:$0xff]  }
 0x7ae   : > { %v1311_v21 = vpack.c.bf16 %v1250_v19, %v1247_v18  ;;  %7821 = vmatmul.mubr.msk.bf16.vlgmr.msra.gmra.mrb[20].mxu0 %vm410_vm0, %v9007_v45 }
 0x7af   : > { %7832 = vmatprep.mubr.msk.bf16.mxu0 %vm8856_vm1, %v8855_v9 }
 0x7b0   : > { %v1316_v22 = vsel %vm633_vm2, %v1311_v21, 0 }
 0x7b1   : > { %7825 = vmatpush3.bf16.xpose.msra.mxu1 %v1316_v22  ;;  %v8561_v22 = vld [vmem:[%s10485_s5 + $0x38] sm:$0xff]  }
 0x7b2   : > { %7836 = vmatprep.subr.bf16.mxu1 %v8855_v9 }
 0x871   : > { %v1085_v23 = vpop.f32.mrb[12].mxu0 }
 0x872   : > { %v9195_v24 = vadd.f32 %v1132_v5, %v1085_v23  ;;  %v7792_v26 = vpop.f32.mrb[13].mxu0  ;;  %v8562_v23 = vld [vmem:[%s10485_s5 + $0xb0] sm:$0xff]  }
 0x873   : > { %v1088_v27 = vpop.f32.mrb[14].mxu0  ;;  %v8563_v26 = vld [vmem:[%s10485_s5 + $0xb8] sm:$0xff]  }
 0x874   : > { %v9197_v31 = vadd.f32 %v1135_v7, %v1088_v27  ;;  %v7793_v32 = vpop.f32.mrb[15].mxu0 }
 0x879   : > { %v1189_v36 = vpop.f32.mrb[16].mxu0 }
 0x87a   : > { %v7806_v37 = vpop.f32.mrb[17].mxu0  ;;  %v1190_v38 = vadd.f32 %v1189_v36, %v1142_v35  ;;  %v8564_v36 = vld [vmem:[%s10485_s5 + $0x70] sm:$0xff]  }
 0x87b   : > { %v1192_v39 = vpop.f32.mrb[18].mxu0 }
 0x87c   : > { %v1193_v40 = vadd.f32 %v1192_v39, %v1142_v35  ;;  %v7807_v41 = vpop.f32.mrb[19].mxu0 }
 0x87e   : > { %v1310_v42 = vpack.c.bf16 %v1193_v40, %v1190_v38  ;;  %v9250_v38 = vsub.s32 3, %v8987_v28  ;;  %v8565_v40 = vld [vmem:[%s10485_s5 + $0x78] sm:$0xff]  }
 0x880   : > { %7827 = vmatmul.mubr.msk.bf16.vlgmr.msra.gmra.mrb[36].mxu1 %vm633_vm2, %v1310_v42  ;;  %v1482_v41 = vrot.slane %v9037_v49, %v9250_v38 }
 0x881   : > { %v1303_v44 = vpop.f32.mrb[20].mxu0  ;;  %7838 = vmatprep.mubr.msk.bf16.mxu1 %vm8856_vm1, %v8855_v9  ;;  %7837 = vmatpush3.bf16.msra.mxu1 %v1434_v13 }
 0x882   : > { %v7822_v46 = vpop.f32.mrb[21].mxu0  ;;  %v1304_v48 = vadd.f32 %v1303_v44, %v1256_v43  ;;  %7850 = vmatprep.subr.bf16.mxu1 %v8855_v9 }
 0x883   : > { %v1306_v47 = vpop.f32.mrb[22].mxu0 }
 0x884   : > { %v1307_v50 = vadd.f32 %v1306_v47, %v1256_v43  ;;  %v7823_v51 = vpop.f32.mrb[23].mxu0 }
 0x885   : > { %v1596_v51 = vrot.slane %v9049_v2, %v9250_v38 }
 0x886   : > { %v1384_v52 = vpack.c.bf16 %v1307_v50, %v1304_v48 }
 0x888   : > { %7831 = vmatpush3.bf16.msra.mxu0 %v1384_v52 }
 0x889   : > { %7842 = vmatprep.subr.bf16.mxu0 %v8855_v9 }
 0x953   : > { %v1352_v53 = vpop.f32.mrb[36].mxu1 }
 0x954   : > { %v1359_v54 = vmul.f32 0.35355338, %v1352_v53  ;;  %v7828_v55 = vpop.f32.mrb[37].mxu1 }
 0x955   : > { %v1355_v56 = vpop.f32.mrb[38].mxu1 }
 0x956   : > { %v1360_v58 = vmul.f32 0.35355338, %v1355_v56  ;;  %v7829_v59 = vpop.f32.mrb[39].mxu1  ;;  %v1361_v60 = vsel %vm683_vm3, %v1359_v54, -inf }
 0x957   : > { %1362 = vmax.xlane.f32.xlu0 %v1361_v60 }
 0x958   : > { %v1364_v61 = vsel %vm683_vm3, %v1360_v58, -inf }
 0x959   : > { %1365 = vmax.xlane.f32.xlu1 %v1364_v61 }
 0x9e4   : > { %v1363_v62 = vpop.xlane.xlu0 %1362 }
 0x9e5   : > { %v1367_v63 = vsub.f32 %v1359_v54, %v1363_v62 }
 0x9e6   : > { %v1366_v0 = vpop.xlane.xlu1 %1365 }
 0x9e7   : > { %v1369_v1 = vmul.f32 1.442695, %v1367_v63  ;;  %v1368_v3 = vsub.f32 %v1360_v58, %v1366_v0  ;;  %v9276_v0 = vsub.s32 7, %v8987_v28 }
 0x9e9   : > { %8698 = vpow2.f32 %v1369_v1  ;;  %v1371_v4 = vmul.f32 1.442695, %v1368_v3  ;;  %v1539_v1 = vrot.slane %v9037_v49, %v9276_v0 }
 0x9eb   : > { %8700 = vpow2.f32 %v1371_v4 }
 0x9f3   : > { %v8699_v5 = vpop.eup %8698 }
 0x9f4   : > { %v1373_v6 = vsel %vm683_vm3, %v8699_v5, 0.0 }
 0x9f5   : > { %v8701_v7 = vpop.eup %8700  ;;  %1374 = vadd.xlane.f32.xlu0 %v1373_v6 }
 0x9f6   : > { %v1376_v8 = vsel %vm683_vm3, %v8701_v7, 0.0 }
 0x9f7   : > { %1377 = vadd.xlane.f32.xlu1 %v1376_v8 }
 0xa82   : > { %v1375_v14 = vpop.xlane.xlu0 %1374 }
 0xa83   : > { %8702 = vrcp.f32 %v1375_v14 }
 0xa84   : > { %v1378_v15 = vpop.xlane.xlu1 %1377 }
 0xa85   : > { %8704 = vrcp.f32 %v1378_v15 }
 0xa8d   : > { %v8703_v16 = vpop.eup %8702 }
 0xa8e   : > { %v1381_v18 = vmul.f32 %v8703_v16, %v8699_v5 }
 0xa8f   : > { %v8705_v17 = vpop.eup %8704 }
 0xa90   : > { %v1382_v19 = vmul.f32 %v8705_v17, %v8701_v7 }
 0xa92   : > { %v1383_v21 = vpack.c.bf16 %v1382_v19, %v1381_v18 }
 0xa94   : > { %7833 = vmatmul.mubr.msk.bf16.vlgmr.msra.gmra.mrb[24].mxu0 %vm683_vm3, %v1383_v21 }
 0xa95   : > { %7843 = vmatpush3.bf16.msra.mxu0 %v8560_v20  ;;  %7846 = vmatprep.mubr.msk.bf16.mxu0 %vm8856_vm1, %v8855_v9 }
 0xa96   : > { %7844 = vmatprep.subr.bf16.mxu0 %v8855_v9 }
 0xa99   : > { %7845 = vmatpush3.bf16.msra.mxu0 %v8561_v22 }
 0xa9a   : > { %7858 = vmatprep.subr.bf16.mxu0 %v8855_v9 }
 0xa9c   : > { %7847 = vmatmul.mubr.msk.bf16.vlgmr.msra.gmra.mrb[28].mxu0 %vm410_vm0, %v9007_v45 }
 0xa9d   : > { %7859 = vmatpush3.bf16.msra.mxu0 %v8562_v23  ;;  %7862 = vmatprep.mubr.msk.bf16.mxu0 %vm8856_vm1, %v8855_v9 }
 0xa9e   : > { %7860 = vmatprep.subr.bf16.mxu0 %v8855_v9 }
 0xaa1   : > { %7861 = vmatpush3.bf16.msra.mxu0 %v8563_v26 }
 0xaa2   : > { %7872 = vmatprep.subr.bf16.mxu0 %v8855_v9 }
 0xaa4   : > { %7863 = vmatmul.mubr.msk.bf16.vlgmr.msra.gmra.mrb[32].mxu0 %vm410_vm0, %v9007_v45 }
 0xaa5   : > { %7874 = vmatprep.mubr.msk.bf16.mxu0 %vm8856_vm1, %v8855_v9 }
 0xb67   : > { %v1422_v27 = vpop.f32.mrb[24].mxu0 }
 0xb68   : > { %v7834_v32 = vpop.f32.mrb[25].mxu0 }
 0xb69   : > { %v1425_v35 = vpop.f32.mrb[26].mxu0 }
 0xb6a   : > { %v1429_v37 = vpack.c.bf16 %v1425_v35, %v1422_v27  ;;  %v7835_v39 = vpop.f32.mrb[27].mxu0 }
 0xb6c   : > { %7839 = vmatmul.mubr.msk.bf16.vlgmr.msra.gmra.mrb[40].mxu1 %vm633_vm2, %v1429_v37 }
 0xb6d   : > { %7851 = vmatpush3.bf16.msra.mxu1 %v8564_v36  ;;  %7854 = vmatprep.mubr.msk.bf16.mxu1 %vm8856_vm1, %v8855_v9  ;;  %v389_v36 = vld [vmem:[%s10486_s6 + $0xc] sm:$0xf] }
 0xb6e   : > { %7852 = vmatprep.subr.bf16.mxu1 %v8855_v9  ;;  %v1774_v37 = vsel %vm1047_vm4, %v389_v36, 0 }
 0xb6f   : > { %v1529_v42 = vpop.f32.mrb[28].mxu0 }
 0xb70   : > { %v7848_v43 = vpop.f32.mrb[29].mxu0  ;;  %v1530_v46 = vadd.f32 %v1529_v42, %v1482_v41 }
 0xb71   : > { %v1532_v44 = vpop.f32.mrb[30].mxu0  ;;  %7853 = vmatpush3.bf16.msra.mxu1 %v8565_v40 }
 0xb72   : > { %v1533_v47 = vadd.f32 %v1532_v44, %v1482_v41  ;;  %v7849_v48 = vpop.f32.mrb[31].mxu0  ;;  %7866 = vmatprep.subr.bf16.mxu1 %v8855_v9 }
 0xb74   : > { %v1650_v50 = vpack.c.bf16 %v1533_v47, %v1530_v46  ;;  %7855 = vmatmul.mubr.msk.bf16.vlgmr.msra.gmra.mrb[44].mxu1 %vm410_vm0, %v9007_v45 }
 0xb75   : > { %7868 = vmatprep.mubr.msk.bf16.mxu1 %vm8856_vm1, %v8855_v9 }
 0xb77   : > { %v1643_v52 = vpop.f32.mrb[32].mxu0 }
 0xb78   : > { %v7864_v53 = vpop.f32.mrb[33].mxu0  ;;  %v1644_v55 = vadd.f32 %v1643_v52, %v1596_v51 }
 0xb79   : > { %v1646_v54 = vpop.f32.mrb[34].mxu0 }
 0xb7a   : > { %v1647_v56 = vadd.f32 %v1646_v54, %v1596_v51  ;;  %v7865_v58 = vpop.f32.mrb[35].mxu0 }
 0xb7c   : > { %v1724_v59 = vpack.c.bf16 %v1647_v56, %v1644_v55  ;;  %v1824_v55 = vrot.slane %v8995_v30, %v9042_v57 }
 0xb7e   : > { %7873 = vmatpush3.bf16.msra.mxu0 %v1724_v59  ;;  %v8788_v59 = vld [vmem:[%s8962_s25] sm:$0xff] }
 0xb7f   : > { %7884 = vmatprep.subr.bf16.mxu0 %v8855_v9 }
 0xc3f   : > { %v1470_v60 = vpop.f32.mrb[40].mxu1 }
 0xc40   : > { %v9270_v61 = vadd.f32 %v1470_v60, %v9195_v24  ;;  %v7840_v45 = vpop.f32.mrb[41].mxu1 }
 0xc41   : > { %v1473_v62 = vpop.f32.mrb[42].mxu1 }
 0xc42   : > { %v9273_v63 = vadd.f32 %v1473_v62, %v9197_v31  ;;  %v7841_v2 = vpop.f32.mrb[43].mxu1 }
 0xc47   : > { %v1586_v3 = vpop.f32.mrb[44].mxu1 }
 0xc48   : > { %v7856_v4 = vpop.f32.mrb[45].mxu1  ;;  %v1587_v6 = vadd.f32 %v1586_v3, %v1539_v1 }
 0xc49   : > { %v1589_v5 = vpop.f32.mrb[46].mxu1 }
 0xc4a   : > { %v1590_v7 = vadd.f32 %v1589_v5, %v1539_v1  ;;  %v7857_v8 = vpop.f32.mrb[47].mxu1  ;;  %v8789_v1 = vld [vmem:[%s8962_s25 + $0x8] sm:$0xff]  ;;  %s8795_s25 = sshll.u32 %s8858_s17, 4  ;;  %s8796_s25 = int_to_ptr.vmem [resolvable:$false] %s8795_s25 }
 0xc4b   : > { %s8797_s21 = scalar_lea.vmem %s8796_s25, 256  ;;  %p8798_p0 = scmp.lt.s32.totalorder %s10439_s27, %s8796_s25 }
 0xc4c   : > { %v1651_v24 = vpack.c.bf16 %v1590_v7, %v1587_v6  ;;  %p8799_p1 = scmp.lt.s32.totalorder %s8797_s21, %s8791_s16 }
 0xc4e   : > { %v1656_v10 = vsel %vm633_vm2, %v1651_v24, 0  ;;  %v8566_v24 = vld [vmem:[%s10487_s7] sm:$0xff]   ;;  %p8800_p2 = por %p8799_p1, %p8798_p0 }
 0xc4f   : > { %7867 = vmatpush3.bf16.xpose.msra.mxu1 %v1656_v10  ;;  %v8567_v10 = vld [vmem:[%s10487_s7 + $0x8] sm:$0xff]  }
 0xc50   : > { %7878 = vmatprep.subr.bf16.mxu1 %v8855_v9  ;;  %p8801_p3 = pnand %p8800_p2, %p8794_p13 }
 0xc56   : > { %7869 = vmatmul.mubr.msk.bf16.vlgmr.msra.gmra.mrb[48].mxu1 %vm633_vm2, %v1650_v50 }
 0xc57   : > { %7880 = vmatprep.mubr.msk.bf16.mxu1 %vm8856_vm1, %v8855_v9  ;;  %7879 = vmatpush3.bf16.msra.mxu1 %v1774_v37 }
 0xc58   : > { %7892 = vmatprep.subr.bf16.mxu1 %v8855_v9 }
 0xd29   : > { %v1692_v28 = vpop.f32.mrb[48].mxu1 }
 0xd2a   : > { %v1699_v31 = vmul.f32 0.35355338, %v1692_v28  ;;  %v7870_v49 = vpop.f32.mrb[49].mxu1 }
 0xd2b   : > { %v1695_v13 = vpop.f32.mrb[50].mxu1 }
 0xd2c   : > { %v1700_v14 = vmul.f32 0.35355338, %v1695_v13  ;;  %v7871_v15 = vpop.f32.mrb[51].mxu1  ;;  %v1701_v16 = vsel %vm683_vm3, %v1699_v31, -inf }
 0xd2d   : > { %1702 = vmax.xlane.f32.xlu0 %v1701_v16 }
 0xd2e   : > { %v1704_v17 = vsel %vm683_vm3, %v1700_v14, -inf }
 0xd2f   : > { %1705 = vmax.xlane.f32.xlu1 %v1704_v17 }
 0xdba   : > { %v1703_v18 = vpop.xlane.xlu0 %1702 }
 0xdbb   : > { %v1707_v19 = vsub.f32 %v1699_v31, %v1703_v18 }
 0xdbc   : > { %v1706_v20 = vpop.xlane.xlu1 %1705 }
 0xdbd   : > { %v1709_v21 = vmul.f32 1.442695, %v1707_v19  ;;  %v1708_v22 = vsub.f32 %v1700_v14, %v1706_v20 }
 0xdbf   : > { %8706 = vpow2.f32 %v1709_v21  ;;  %v1711_v23 = vmul.f32 1.442695, %v1708_v22 }
 0xdc1   : > { %8708 = vpow2.f32 %v1711_v23 }
 0xdc9   : > { %v8707_v26 = vpop.eup %8706 }
 0xdca   : > { %v1713_v27 = vsel %vm683_vm3, %v8707_v26, 0.0 }
 0xdcb   : > { %v8709_v32 = vpop.eup %8708  ;;  %1714 = vadd.xlane.f32.xlu0 %v1713_v27 }
 0xdcc   : > { %v1716_v35 = vsel %vm683_vm3, %v8709_v32, 0.0 }
 0xdcd   : > { %1717 = vadd.xlane.f32.xlu1 %v1716_v35  ;;  %v1862_v35 = vrot.slane %v8995_v30, %v9200_v33 }
 0xe58   : > { %v1715_v39 = vpop.xlane.xlu0 %1714 }
 0xe59   : > { %8710 = vrcp.f32 %v1715_v39 }
 0xe5a   : > { %v1718_v40 = vpop.xlane.xlu1 %1717 }
 0xe5b   : > { %8712 = vrcp.f32 %v1718_v40 }
 0xe63   : > { %v8711_v41 = vpop.eup %8710 }
 0xe64   : > { %v1721_v43 = vmul.f32 %v8711_v41, %v8707_v26 }
 0xe65   : > { %v8713_v42 = vpop.eup %8712 }
 0xe66   : > { %v1722_v44 = vmul.f32 %v8713_v42, %v8709_v32 }
 0xe68   : > { %v1723_v46 = vpack.c.bf16 %v1722_v44, %v1721_v43  ;;  %v1868_v43 = vrot.slane %v8995_v30, %v9250_v38  ;;  %v8569_v30 = vld [vmem:[%s10488_s8 + $0x8] sm:$0xff]  }
 0xe6a   : > { %7875 = vmatmul.mubr.msk.bf16.vlgmr.msra.gmra.mrb[36].mxu0 %vm683_vm3, %v1723_v46 }
 0xe6b   : > { %7888 = vmatprep.mubr.msk.bf16.mxu0 %vm8856_vm1, %v8855_v9  ;;  %7885 = vmatpush3.bf16.msra.mxu0 %v8566_v24 }
 0xe6c   : > { %7886 = vmatprep.subr.bf16.mxu0 %v8855_v9 }
 0xe6f   : > { %7887 = vmatpush3.bf16.msra.mxu0 %v8567_v10 }
 0xe70   : > { %7912 = vmatprep.subr.bf16.mxu0 %v8855_v9 }
 0xf3d   : > { %v1762_v47 = vpop.f32.mrb[36].mxu0 }
 0xf3e   : > { %v7876_v48 = vpop.f32.mrb[37].mxu0 }
 0xf3f   : > { %v1765_v50 = vpop.f32.mrb[38].mxu0 }
 0xf40   : > { %v1769_v51 = vpack.c.bf16 %v1765_v50, %v1762_v47  ;;  %v7877_v52 = vpop.f32.mrb[39].mxu0  ;;  %v8568_v50 = vld [vmem:[%s10488_s8] sm:$0xff]  }
 0xf41   : > { %v8571_v52 = vld [vmem:[%s10488_s8 + $0x18] sm:$0xff]  }
 0xf42   : > { %7881 = vmatmul.mubr.msk.bf16.vlgmr.msra.gmra.mrb[52].mxu1 %vm633_vm2, %v1769_v51  ;;  %v8570_v51 = vld [vmem:[%s10488_s8 + $0x10] sm:$0xff]  }
 0xf43   : > { %7908 = vmatprep.mubr.msk.bf16.mxu1 %vm8856_vm1, %v8855_v9  ;;  %7893 = vmatpush3.bf16.msra.mxu1 %v8568_v50  ;;  %v8576_v50 = vld [vmem:[%s10485_s5 + $0xc0] sm:$0xff]  }
 0xf44   : > { %7894 = vmatprep.subr.bf16.mxu1 %v8855_v9 }
 0xf47   : > { %7895 = vmatpush3.bf16.msra.mxu1 %v8569_v30  ;;  %v8577_v30 = vld [vmem:[%s10485_s5 + $0xc8] sm:$0xff]  }
 0xf48   : > { %7896 = vmatprep.subr.bf16.mxu1 %v8855_v9 }
 0xf4b   : > { %7897 = vmatpush3.bf16.msra.mxu1 %v8570_v51 }
 0xf4c   : > { %7898 = vmatprep.subr.bf16.mxu1 %v8855_v9 }
 0xf4f   : > { %7899 = vmatpush3.bf16.msra.mxu1 %v8571_v52 }
 0xf50   : > { %7900 = vmatprep.subr.bf16.mxu1 %v8855_v9 }
0x1015   : > { %v1810_v53 = vpop.f32.mrb[52].mxu1 }
0x1016   : > { %v1817_v54 = vadd.f32 %v1810_v53, %v9270_v61  ;;  %v7882_v56 = vpop.f32.mrb[53].mxu1  ;;  %v8572_v53 = vld [vmem:[%s10488_s8 + $0x20] sm:$0xff]  }
0x1017   : > { %v1813_v58 = vpop.f32.mrb[54].mxu1  ;;  %7901 = vmatpush3.bf16.msra.mxu1 %v8572_v53  ;;  %v8575_v56 = vld [vmem:[%s10488_s8 + $0x38] sm:$0xff]  }
0x1018   : > { %v1819_v60 = vadd.f32 %v8788_v59, %v1817_v54  ;;  %v1818_v45 = vadd.f32 %v1813_v58, %v9273_v63  ;;  %v7883_v62 = vpop.f32.mrb[55].mxu1  ;;  %7902 = vmatprep.subr.bf16.mxu1 %v8855_v9  ;;  %v8573_v54 = vld [vmem:[%s10488_s8 + $0x28] sm:$0xff]   ;;  %v7006_v58 = vld [vmem:[%s10484_s4] ss:$0 sm:$0xff] }
0x101a   : > { %v9305_v2 = vadd.f32 %v1824_v55, %v1819_v60  ;;  %v1820_v3 = vadd.f32 %v8789_v1, %v1818_v45 }
0x101b   : > { %7903 = vmatpush3.bf16.msra.mxu1 %v8573_v54 }
0x101c   : > { %v9308_v4 = vadd.f32 %v1824_v55, %v1820_v3  ;;  %v1827_v5 = vsel %vm410_vm0, %v9305_v2, 0.0  ;;  %v1835_v61 = vmul.f32 %v9305_v2, %v9305_v2  ;;  %7904 = vmatprep.subr.bf16.mxu1 %v8855_v9  ;;  %v8574_v55 = vld [vmem:[%s10488_s8 + $0x30] sm:$0xff]  }
0x101d   : > { %1828 = vadd.xlane.f32.xlu0 %v1827_v5 }
0x101e   : > { %v1830_v6 = vsel %vm410_vm0, %v9308_v4, 0.0  ;;  %v1836_v63 = vmul.f32 %v9308_v4, %v9308_v4  ;;  %v1837_v7 = vsel %vm410_vm0, %v1835_v61, 0.0 }
0x101f   : > { %1831 = vadd.xlane.f32.xlu1 %v1830_v6  ;;  %7905 = vmatpush3.bf16.msra.mxu1 %v8574_v55 }
0x1020   : > { %v1840_v8 = vsel %vm410_vm0, %v1836_v63, 0.0  ;;  %7906 = vmatprep.subr.bf16.mxu1 %v8855_v9 }
0x1021   : > { %1838 = vadd.xlane.f32.xlu0 %v1837_v7 }
0x1023   : > { %1841 = vadd.xlane.f32.xlu1 %v1840_v8  ;;  %7907 = vmatpush3.bf16.msra.mxu1 %v8575_v56 }
0x1024   : > { %7942 = vmatprep.subr.bf16.mxu1 %v8855_v9 }
0x10aa   : > { %v1829_v28 = vpop.xlane.xlu0 %1828 }
0x10ab   : > { %v1833_v31 = vmul.f32 0.03125, %v1829_v28 }
0x10ac   : > { %v1832_v49 = vpop.xlane.xlu1 %1831 }
0x10ad   : > { %v1834_v13 = vmul.f32 0.03125, %v1832_v49  ;;  %v1845_v15 = vmul.f32 %v1833_v31, %v1833_v31  ;;  %v1851_v32 = vsub.f32 %v9305_v2, %v1833_v31 }
0x10ae   : > { %v1839_v14 = vpop.xlane.xlu0 %1838 }
0x10af   : > { %v1843_v16 = vmul.f32 0.03125, %v1839_v14  ;;  %v1846_v18 = vmul.f32 %v1834_v13, %v1834_v13  ;;  %v1852_v37 = vsub.f32 %v9308_v4, %v1834_v13 }
0x10b0   : > { %v1842_v17 = vpop.xlane.xlu1 %1841 }
0x10b1   : > { %v1847_v19 = vsub.f32 %v1843_v16, %v1845_v15  ;;  %v1844_v20 = vmul.f32 0.03125, %v1842_v17 }
0x10b3   : > { %v1849_v21 = vmax.f32 %v1847_v19, 0.0  ;;  %v1848_v22 = vsub.f32 %v1844_v20, %v1846_v18 }
0x10b5   : > { %v1853_v23 = vadd.f32 1e-05, %v1849_v21  ;;  %v1850_v26 = vmax.f32 %v1848_v22, 0.0  ;;  %v8790_v21 = vld [vmem:[%s10482_s2] sm:$0xff] }
0x10b6   : > { %v1954_v22 = vrot.slane %v8790_v21, %v9120_v12 }
0x10b7   : > { %8714 = vrsqrt.f32 %v1853_v23  ;;  %v1854_v27 = vadd.f32 1e-05, %v1850_v26 }
0x10b9   : > { %8716 = vrsqrt.f32 %v1854_v27 }
0x10c1   : > { %v8715_v36 = vpop.eup %8714 }
0x10c2   : > { %v1857_v39 = vmul.f32 %v8715_v36, %v1851_v32 }
0x10c3   : > { %v8717_v40 = vpop.eup %8716 }
0x10c4   : > { %v1858_v41 = vmul.f32 %v8717_v40, %v1852_v37  ;;  %v1863_v42 = vmul.f32 %v1862_v35, %v1857_v39 }
0x10c6   : > { %v1864_v44 = vmul.f32 %v1862_v35, %v1858_v41  ;;  %v1869_v46 = vadd.f32 %v1868_v43, %v1863_v42 }
0x10c8   : > { %v1870_v47 = vadd.f32 %v1868_v43, %v1864_v44  ;;  %v2047_v43 = vld [vmem:[%s10481_s1] sm:$0xff] }
0x10ca   : > { %v1871_v48 = vpack.c.bf16 %v1870_v47, %v1869_v46 }
0x10cc   : > { %7889 = vmatmul.mubr.msk.bf16.vlgmr.msra.gmra.mrb[40].mxu0 %vm410_vm0, %v1871_v48 }
0x10cd   : > { %7916 = vmatprep.mubr.msk.bf16.mxu0 %vm8856_vm1, %v8855_v9  ;;  %7913 = vmatpush3.bf16.msra.mxu0 %v8576_v50 }
0x10ce   : > { %7914 = vmatprep.subr.bf16.mxu0 %v8855_v9 }
0x10d1   : > { %7915 = vmatpush3.bf16.msra.mxu0 %v8577_v30  ;;  %v8857_v30 = vmov -1e+30  }
0x10d2   : > { %7920 = vmatprep.subr.bf16.mxu0 %v8855_v9 }
0x119f   : > { %v1925_v59 = vpop.f32.mrb[40].mxu0 }
0x11a0   : > { %v1926_v60 = vadd.f32 %v7006_v58, %v1925_v59  ;;  %v7890_v45 = vpop.f32.mrb[41].mxu0 }
0x11a1   : > { %v1928_v62 = vpop.f32.mrb[42].mxu0 }
0x11a2   : > { %v1932_v1 = vmul.f32 %v1926_v60, %v1926_v60  ;;  %v1929_v3 = vadd.f32 %v7006_v58, %v1928_v62  ;;  %v7891_v5 = vpop.f32.mrb[43].mxu0 }
0x11a4   : > { %v1934_v61 = vmul.f32 %v1932_v1, %v1926_v60  ;;  %v1933_v6 = vmul.f32 %v1929_v3, %v1929_v3 }
0x11a6   : > { %v1936_v63 = vmul.f32 0.044715, %v1934_v61  ;;  %v1935_v7 = vmul.f32 %v1933_v6, %v1929_v3 }
0x11a8   : > { %v1938_v8 = vadd.f32 %v1936_v63, %v1926_v60  ;;  %v1937_v24 = vmul.f32 0.044715, %v1935_v7  ;;  %v8578_v63 = vld [vmem:[%s10485_s5 + $0x100] sm:$0xff]  }
0x11aa   : > { %v1940_v10 = vmul.f32 0.7978846, %v1938_v8  ;;  %v1939_v28 = vadd.f32 %v1937_v24, %v1929_v3  ;;  %v8579_v8 = vld [vmem:[%s10485_s5 + $0x108] sm:$0xff]   ;;  %v8580_v24 = vld [vmem:[%s10485_s5 + $0x140] sm:$0xff]  }
0x11ac   : > { %8718 = vtanh.f32 %v1940_v10  ;;  %v1941_v31 = vmul.f32 0.7978846, %v1939_v28  ;;  %v8581_v10 = vld [vmem:[%s10485_s5 + $0x148] sm:$0xff]  }
0x11ae   : > { %8720 = vtanh.f32 %v1941_v31 }
0x11b6   : > { %v8719_v49 = vpop.eup %8718 }
0x11b7   : > { %v1944_v13 = vadd.f32 1.0, %v8719_v49 }
0x11b8   : > { %v8721_v14 = vpop.eup %8720 }
0x11b9   : > { %v1946_v15 = vmul.f32 0.5, %v1944_v13  ;;  %v1945_v16 = vadd.f32 1.0, %v8721_v14  ;;  %v9443_v14 = vld [vmem:[%s10483_s3 + $0x10] sm:$0xff] }
0x11ba   : > { %v2174_v21 = vrot.slane %v9443_v14, %v8990_v29 }
0x11bb   : > { %v1947_v17 = vmul.f32 0.5, %v1945_v16  ;;  %v1948_v18 = vmul.f32 %v1946_v15, %v1926_v60  ;;  %v9403_v60 = vld [vmem:[%s10482_s2 + $0x8] sm:$0xff]  ;;  %v2233_v15 = vrot.slane %v9443_v14, %v9042_v57 }
0x11bc   : > { %v2163_v62 = vrot.slane %v9403_v60, %v8990_v29 }
0x11bd   : > { %v1949_v19 = vmul.f32 %v1947_v17, %v1929_v3  ;;  %v2168_v3 = vrot.slane %v9403_v60, %v9000_v34 }
0x11bf   : > { %v1950_v20 = vpack.c.bf16 %v1949_v19, %v1948_v18 }
0x11c1   : > { %7909 = vmatmul.mubr.bf16.vlgmr.msra.gmra.mrb[56].mxu1 %v1950_v20  ;;  %v9450_v20 = vld [vmem:[%s10483_s3 + $0x18] sm:$0xf] }
0x11c2   : > { %7944 = vmatprep.mubr.msk.bf16.mxu1 %vm8856_vm1, %v8855_v9 }
0x1294   : > { %v2037_v23 = vpop.f32.mrb[56].mxu1 }
0x1295   : > { %v2038_v26 = vadd.f32 %v2037_v23, %v1954_v22  ;;  %v7910_v27 = vpop.f32.mrb[57].mxu1 }
0x1296   : > { %v2040_v32 = vpop.f32.mrb[58].mxu1  ;;  %v2289_v27 = vrot.slane %v9450_v20, %v8990_v29 }
0x1297   : > { %v2044_v35 = vadd.f32 %v2038_v26, %v9305_v2  ;;  %v2041_v36 = vadd.f32 %v2040_v32, %v1954_v22  ;;  %v7911_v37 = vpop.f32.mrb[59].mxu1 }
0x1299   : > { %2048 = vst.msk [vmem:[#allocation2] sm:$0xff] %vm410_vm0, %v2044_v35  ;;  %v2045_v39 = vadd.f32 %v2041_v36, %v9308_v4 }
0x129b   : > { %2049 = vst.msk [vmem:[#allocation2 + $0x8] sm:$0xff] %vm410_vm0, %v2045_v39 }
0x12a2   : > { %v2050_v40 = vld [vmem:[#allocation2] ss:$2 sm:$0xff]  ;;  %v2052_v41 = vld [vmem:[#allocation2 + $0x1] ss:$2 sm:$0xff] }
0x12a3   : > { %v2053_v42 = vmax.f32 %v2050_v40, %v2052_v41  ;;  %v2055_v44 = vld [vmem:[#allocation2 + $0x2] ss:$2 sm:$0xff] }
0x12a4   : > { %v8582_v40 = vld [vmem:[%s10485_s5 + $0xd0] sm:$0xff]  }
0x12a5   : > { %v2056_v46 = vmax.f32 %v2053_v42, %v2055_v44 }
0x12a7   : > { %v9385_v47 = vadd.f32 %v2056_v46, %v2047_v43  ;;  %v8583_v46 = vld [vmem:[%s10485_s5 + $0xd8] sm:$0xff]  }
0x12a9   : > { %v2144_v2 = vsel %vm410_vm0, %v9385_v47, 0.0  ;;  %v2148_v48 = vmul.f32 %v9385_v47, %v9385_v47 }
0x12aa   : > { %2145 = vadd.xlane.f32.xlu0 %v2144_v2  ;;  %v8584_v2 = vld [vmem:[%s10485_s5 + $0x150] sm:$0xff]  }
0x12ab   : > { %v2149_v4 = vsel %vm410_vm0, %v2148_v48, 0.0  ;;  %v8585_v48 = vld [vmem:[%s10485_s5 + $0x158] sm:$0xff]  }
0x12ac   : > { %2150 = vadd.xlane.f32.xlu1 %v2149_v4  ;;  %v2059_v4 = vand.u32 127, %v444_v25  ;;  %v2567_v25 = vrot.slane %v9450_v20, %v9000_v34 }
0x12ae   : > { %vm2060_vm5 = vcmp.lt.s32.totalorder %v2059_v4, 7 }
0x1337   : > { %v2146_v51 = vpop.xlane.xlu0 %2145 }
0x1338   : > { %v2147_v52 = vmul.f32 0.03125, %v2146_v51  ;;  %v9488_v51 = vsel %vm2060_vm5, 0.0, %v8857_v30 }
0x1339   : > { %v2151_v53 = vpop.xlane.xlu1 %2150 }
0x133a   : > { %v2153_v54 = vmul.f32 %v2147_v52, %v2147_v52  ;;  %v2152_v55 = vmul.f32 0.03125, %v2151_v53  ;;  %v2156_v45 = vsub.f32 %v9385_v47, %v2147_v52 }
0x133c   : > { %v2154_v56 = vsub.f32 %v2152_v55, %v2153_v54 }
0x133e   : > { %v2155_v58 = vmax.f32 %v2154_v56, 0.0 }
0x1340   : > { %v2157_v59 = vadd.f32 1e-05, %v2155_v58 }
0x1342   : > { %8722 = vrsqrt.f32 %v2157_v59 }
0x134c   : > { %v8723_v1 = vpop.eup %8722 }
0x134d   : > { %v2159_v5 = vmul.f32 %v8723_v1, %v2156_v45 }
0x134f   : > { %v2164_v61 = vmul.f32 %v2163_v62, %v2159_v5 }
0x1351   : > { %v2169_v6 = vadd.f32 %v2168_v3, %v2164_v61 }
0x1353   : > { %v9413_v7 = vpack.c.bf16 %v2169_v6, %v2169_v6 }
0x1355   : > { %7917 = vmatmul.mubr.msk.bf16.vlgmr.msra.gmra.mrb[44].mxu0 %vm410_vm0, %v9413_v7 }
0x1356   : > { %7921 = vmatpush3.bf16.msra.mxu0 %v8578_v63  ;;  %7924 = vmatprep.mubr.msk.bf16.mxu0 %vm8856_vm1, %v8855_v9 }
0x1357   : > { %7922 = vmatprep.subr.bf16.mxu0 %v8855_v9 }
0x135a   : > { %7923 = vmatpush3.bf16.msra.mxu0 %v8579_v8 }
0x135b   : > { %7928 = vmatprep.subr.bf16.mxu0 %v8855_v9 }
0x135d   : > { %7925 = vmatmul.mubr.msk.bf16.vlgmr.msra.gmra.mrb[48].mxu0 %vm410_vm0, %v9413_v7 }
0x135e   : > { %7929 = vmatpush3.bf16.msra.mxu0 %v8580_v24  ;;  %7932 = vmatprep.mubr.msk.bf16.mxu0 %vm8856_vm1, %v8855_v9 }
0x135f   : > { %7930 = vmatprep.subr.bf16.mxu0 %v8855_v9 }
0x1362   : > { %7931 = vmatpush3.bf16.msra.mxu0 %v8581_v10 }
0x1363   : > { %7936 = vmatprep.subr.bf16.mxu0 %v8855_v9 }
0x1365   : > { %7933 = vmatmul.mubr.msk.bf16.vlgmr.msra.gmra.mrb[52].mxu0 %vm410_vm0, %v9413_v7 }
0x1366   : > { %7938 = vmatprep.mubr.msk.bf16.mxu0 %vm8856_vm1, %v8855_v9 }
0x1428   : > { %v2224_v28 = vpop.f32.mrb[44].mxu0 }
0x1429   : > { %v7918_v31 = vpop.f32.mrb[45].mxu0  ;;  %v2225_v32 = vadd.f32 %v2224_v28, %v2174_v21  ;;  %v8587_v21 = vld [vmem:[%s10485_s5 + $0x118] sm:$0xff]  }
0x142a   : > { %v2227_v49 = vpop.f32.mrb[46].mxu0 }
0x142b   : > { %v7919_v13 = vpop.f32.mrb[47].mxu0  ;;  %v2342_v41 = vpack.c.bf16 %v2225_v32, %v2225_v32  ;;  %v2511_v32 = vrot.slane %v9443_v14, %v9120_v12 }
0x1430   : > { %v2280_v16 = vpop.f32.mrb[48].mxu0 }
0x1431   : > { %v2281_v17 = vadd.f32 %v2280_v16, %v2233_v15  ;;  %v7926_v18 = vpop.f32.mrb[49].mxu0 }
0x1432   : > { %v2283_v19 = vpop.f32.mrb[50].mxu0  ;;  %v8586_v18 = vld [vmem:[%s10485_s5 + $0x110] sm:$0xff]  }
0x1433   : > { %v2343_v22 = vpack.c.bf16 %v2281_v17, %v2281_v17  ;;  %v7927_v23 = vpop.f32.mrb[51].mxu0 }
0x1435   : > { %v2348_v26 = vsel %vm633_vm2, %v2343_v22, 0 }
0x1436   : > { %7937 = vmatpush3.bf16.xpose.msra.mxu0 %v2348_v26 }
0x1437   : > { %7948 = vmatprep.subr.bf16.mxu0 %v8855_v9 }
0x1438   : > { %v2336_v35 = vpop.f32.mrb[52].mxu0 }
0x1439   : > { %v2337_v36 = vadd.f32 %v2336_v35, %v2289_v27  ;;  %v7934_v37 = vpop.f32.mrb[53].mxu0 }
0x143a   : > { %v2339_v39 = vpop.f32.mrb[54].mxu0 }
0x143b   : > { %v2404_v42 = vpack.c.bf16 %v2337_v36, %v2337_v36  ;;  %v7935_v43 = vpop.f32.mrb[55].mxu0 }
0x143d   : > { %v2409_v44 = vsel %vm1047_vm4, %v2404_v42, 0  ;;  %7939 = vmatmul.mubr.msk.bf16.vlgmr.msra.gmra.mrb[56].mxu0 %vm633_vm2, %v2342_v41 }
0x143e   : > { %7943 = vmatpush3.bf16.msra.mxu1 %v2409_v44  ;;  %7949 = vmatpush3.bf16.msra.mxu0 %v8582_v40  ;;  %v2455_v40 = vrot.slane %v9443_v14, %v9000_v34 }
0x143f   : > { %7950 = vmatprep.subr.bf16.mxu0 %v8855_v9  ;;  %7952 = vmatprep.mubr.msk.bf16.mxu0 %vm8856_vm1, %v8855_v9 }
0x1440   : > { %7956 = vmatprep.subr.bf16.mxu1 %v8855_v9 }
0x1442   : > { %7951 = vmatpush3.bf16.msra.mxu0 %v8583_v46 }
0x1443   : > { %7964 = vmatprep.subr.bf16.mxu0 %v8855_v9 }
0x1445   : > { %7953 = vmatmul.mubr.msk.bf16.vlgmr.msra.gmra.mrb[60].mxu0 %vm410_vm0, %v9413_v7 }
0x1446   : > { %7965 = vmatpush3.bf16.msra.mxu0 %v8584_v2  ;;  %7968 = vmatprep.mubr.msk.bf16.mxu0 %vm8856_vm1, %v8855_v9 }
0x1447   : > { %7966 = vmatprep.subr.bf16.mxu0 %v8855_v9 }
0x144a   : > { %7967 = vmatpush3.bf16.msra.mxu0 %v8585_v48 }
0x144b   : > { %7978 = vmatprep.subr.bf16.mxu0 %v8855_v9 }
0x144d   : > { %7969 = vmatmul.mubr.msk.bf16.vlgmr.msra.gmra.mrb[64].mxu0 %vm410_vm0, %v9413_v7 }
0x144e   : > { %7980 = vmatprep.mubr.msk.bf16.mxu0 %vm8856_vm1, %v8855_v9 }
0x1510   : > { %v2384_v50 = vpop.f32.mrb[56].mxu0 }
0x1511   : > { %v2390_v52 = vmul.f32 0.35355338, %v2384_v50  ;;  %v7940_v53 = vpop.f32.mrb[57].mxu0 }
0x1512   : > { %v2387_v54 = vpop.f32.mrb[58].mxu0 }
0x1513   : > { %v7941_v55 = vpop.f32.mrb[59].mxu0  ;;  %v2391_v56 = vadd.f32 %v2390_v52, %v9488_v51 }
0x1515   : > { %v2392_v58 = vsel %vm633_vm2, %v2391_v56, -inf }
0x1516   : > { %2393 = vmax.xlane.f32.xlu0 %v2392_v58 }
0x1518   : > { %v2502_v59 = vpop.f32.mrb[60].mxu0 }
0x1519   : > { %v7954_v45 = vpop.f32.mrb[61].mxu0  ;;  %v2503_v44 = vadd.f32 %v2502_v59, %v2455_v40 }
0x151a   : > { %v2505_v62 = vpop.f32.mrb[62].mxu0  ;;  %v7070_v45 = vld [vmem:[%s10486_s6 + $0x14] sm:$0xf] }
0x151b   : > { %v7955_v1 = vpop.f32.mrb[63].mxu0  ;;  %v2620_v46 = vpack.c.bf16 %v2503_v44, %v2503_v44  ;;  %v2734_v62 = vsel %vm1047_vm4, %v7070_v45, 0 }
0x1520   : > { %v2614_v3 = vpop.f32.mrb[64].mxu0 }
0x1521   : > { %v2615_v5 = vadd.f32 %v2614_v3, %v2567_v25  ;;  %v7970_v61 = vpop.f32.mrb[65].mxu0  ;;  %v7069_v3 = vld [vmem:[%s10486_s6 + $0x10] sm:$0xf] }
0x1522   : > { %v2617_v6 = vpop.f32.mrb[66].mxu0 }
0x1523   : > { %v2682_v63 = vpack.c.bf16 %v2615_v5, %v2615_v5  ;;  %v7971_v8 = vpop.f32.mrb[67].mxu0  ;;  %v2780_v6 = vsel %vm1047_vm4, %v7069_v3, 0 }
0x1525   : > { %v2687_v24 = vsel %vm1047_vm4, %v2682_v63, 0  ;;  %v8588_v63 = vld [vmem:[%s10485_s5 + $0x120] sm:$0xff]  }
0x1526   : > { %7979 = vmatpush3.bf16.msra.mxu0 %v2687_v24  ;;  %v8589_v24 = vld [vmem:[%s10485_s5 + $0x128] sm:$0xff]  }
0x1527   : > { %7990 = vmatprep.subr.bf16.mxu0 %v8855_v9 }
0x15a3   : > { %v2394_v10 = vpop.xlane.xlu0 %2393 }
0x15a4   : > { %v2395_v28 = vsub.f32 %v2391_v56, %v2394_v10 }
0x15a6   : > { %v2396_v31 = vmul.f32 1.442695, %v2395_v28  ;;  %v8590_v28 = vld [vmem:[%s10485_s5 + $0xe0] sm:$0xff]  }
0x15a8   : > { %8724 = vpow2.f32 %v2396_v31 }
0x15b2   : > { %v8725_v49 = vpop.eup %8724 }
0x15b3   : > { %v2398_v13 = vsel %vm633_vm2, %v8725_v49, 0.0 }
0x15b4   : > { %2399 = vadd.xlane.f32.xlu1 %v2398_v13 }
0x1641   : > { %v2400_v15 = vpop.xlane.xlu1 %2399 }
0x1642   : > { %8726 = vrcp.f32 %v2400_v15 }
0x164c   : > { %v8727_v16 = vpop.eup %8726 }
0x164d   : > { %v2402_v17 = vmul.f32 %v8727_v16, %v8725_v49  ;;  %v8591_v16 = vld [vmem:[%s10485_s5 + $0xe8] sm:$0xff]  }
0x164f   : > { %v2403_v19 = vpack.c.bf16 %v2402_v17, %v2402_v17 }
0x1651   : > { %7945 = vmatmul.mubr.msk.bf16.vlgmr.msra.gmra.mrb[60].mxu1 %vm633_vm2, %v2403_v19 }
0x1652   : > { %7957 = vmatpush3.bf16.msra.mxu1 %v8586_v18  ;;  %7960 = vmatprep.mubr.msk.bf16.mxu1 %vm8856_vm1, %v8855_v9  ;;  %v8592_v18 = vld [vmem:[%s10485_s5 + $0x160] sm:$0xff]  }
0x1653   : > { %7958 = vmatprep.subr.bf16.mxu1 %v8855_v9 }
0x1656   : > { %7959 = vmatpush3.bf16.msra.mxu1 %v8587_v21 }
0x1657   : > { %7972 = vmatprep.subr.bf16.mxu1 %v8855_v9 }
0x1659   : > { %7961 = vmatmul.mubr.msk.bf16.vlgmr.msra.gmra.mrb[64].mxu1 %vm410_vm0, %v9413_v7 }
0x165a   : > { %7974 = vmatprep.mubr.msk.bf16.mxu1 %vm8856_vm1, %v8855_v9 }
0x1724   : > { %v2445_v22 = vpop.f32.mrb[60].mxu1 }
0x1725   : > { %v7946_v23 = vpop.f32.mrb[61].mxu1  ;;  %v2451_v8 = vpack.c.bf16 %v2445_v22, %v2445_v22 }
0x1726   : > { %v2448_v26 = vpop.f32.mrb[62].mxu1  ;;  %v8593_v23 = vld [vmem:[%s10485_s5 + $0x168] sm:$0xff]  }
0x1727   : > { %v7947_v27 = vpop.f32.mrb[63].mxu1  ;;  %v2881_v26 = vrot.slane %v9443_v14, %v9176_v11 }
0x172c   : > { %v2558_v35 = vpop.f32.mrb[64].mxu1 }
0x172d   : > { %v2559_v36 = vadd.f32 %v2558_v35, %v2511_v32  ;;  %v7962_v37 = vpop.f32.mrb[65].mxu1 }
0x172e   : > { %v2561_v39 = vpop.f32.mrb[66].mxu1 }
0x172f   : > { %v2621_v41 = vpack.c.bf16 %v2559_v36, %v2559_v36  ;;  %v7963_v42 = vpop.f32.mrb[67].mxu1 }
0x1731   : > { %v2626_v43 = vsel %vm633_vm2, %v2621_v41, 0 }
0x1732   : > { %7973 = vmatpush3.bf16.xpose.msra.mxu1 %v2626_v43 }
0x1733   : > { %7984 = vmatprep.subr.bf16.mxu1 %v8855_v9 }
0x1739   : > { %7975 = vmatmul.mubr.msk.bf16.vlgmr.msra.gmra.mrb[68].mxu1 %vm633_vm2, %v2620_v46 }
0x173a   : > { %7986 = vmatprep.mubr.msk.bf16.mxu1 %vm8856_vm1, %v8855_v9  ;;  %7985 = vmatpush3.bf16.msra.mxu1 %v2734_v62 }
0x173b   : > { %7996 = vmatprep.subr.bf16.mxu1 %v8855_v9 }
0x180c   : > { %v2662_v2 = vpop.f32.mrb[68].mxu1 }
0x180d   : > { %v2668_v48 = vmul.f32 0.35355338, %v2662_v2  ;;  %v7976_v4 = vpop.f32.mrb[69].mxu1  ;;  %v2825_v2 = vrot.slane %v9443_v14, %v9200_v33 }
0x180e   : > { %v2665_v50 = vpop.f32.mrb[70].mxu1 }
0x180f   : > { %v7977_v30 = vpop.f32.mrb[71].mxu1  ;;  %v2669_v52 = vadd.f32 %v2668_v48, %v9488_v51 }
0x1811   : > { %v2670_v53 = vsel %vm633_vm2, %v2669_v52, -inf }
0x1812   : > { %2671 = vmax.xlane.f32.xlu0 %v2670_v53 }
0x189f   : > { %v2672_v54 = vpop.xlane.xlu0 %2671 }
0x18a0   : > { %v2673_v55 = vsub.f32 %v2669_v52, %v2672_v54  ;;  %v2937_v54 = vrot.slane %v9450_v20, %v9200_v33 }
0x18a2   : > { %v2674_v56 = vmul.f32 1.442695, %v2673_v55 }
0x18a4   : > { %8728 = vpow2.f32 %v2674_v56 }
0x18ae   : > { %v8729_v58 = vpop.eup %8728 }
0x18af   : > { %v2676_v59 = vsel %vm633_vm2, %v8729_v58, 0.0 }
0x18b0   : > { %2677 = vadd.xlane.f32.xlu1 %v2676_v59 }
0x193d   : > { %v2678_v1 = vpop.xlane.xlu1 %2677 }
0x193e   : > { %8730 = vrcp.f32 %v2678_v1 }
0x1948   : > { %v8731_v25 = vpop.eup %8730 }
0x1949   : > { %v2680_v5 = vmul.f32 %v8731_v25, %v8729_v58 }
0x194b   : > { %v2681_v61 = vpack.c.bf16 %v2680_v5, %v2680_v5 }
0x194d   : > { %7981 = vmatmul.mubr.msk.bf16.vlgmr.msra.gmra.mrb[68].mxu0 %vm633_vm2, %v2681_v61 }
0x194e   : > { %7991 = vmatpush3.bf16.msra.mxu0 %v2780_v6  ;;  %7992 = vmatprep.mubr.msk.bf16.mxu0 %vm8856_vm1, %v8855_v9 }
0x194f   : > { %8004 = vmatprep.subr.bf16.mxu0 %v8855_v9 }
0x1955   : > { %7993 = vmatmul.mubr.msk.bf16.vlgmr.msra.gmra.mrb[72].mxu0 %vm633_vm2, %v2451_v8 }
0x1956   : > { %8005 = vmatpush3.bf16.msra.mxu0 %v8588_v63  ;;  %8008 = vmatprep.mubr.msk.bf16.mxu0 %vm8856_vm1, %v8855_v9 }
0x1957   : > { %8006 = vmatprep.subr.bf16.mxu0 %v8855_v9 }
0x195a   : > { %8007 = vmatpush3.bf16.msra.mxu0 %v8589_v24 }
0x195b   : > { %8020 = vmatprep.subr.bf16.mxu0 %v8855_v9 }
0x195d   : > { %8009 = vmatmul.mubr.msk.bf16.vlgmr.msra.gmra.mrb[76].mxu0 %vm410_vm0, %v9413_v7 }
0x195e   : > { %8022 = vmatprep.mubr.msk.bf16.mxu0 %vm8856_vm1, %v8855_v9 }
0x1a20   : > { %v2723_v10 = vpop.f32.mrb[68].mxu0 }
0x1a21   : > { %v2729_v31 = vpack.c.bf16 %v2723_v10, %v2723_v10  ;;  %v7982_v49 = vpop.f32.mrb[69].mxu0 }
0x1a22   : > { %v2726_v13 = vpop.f32.mrb[70].mxu0 }
0x1a23   : > { %v7983_v15 = vpop.f32.mrb[71].mxu0  ;;  %7987 = vmatmul.mubr.msk.bf16.vlgmr.msra.gmra.mrb[72].mxu1 %vm633_vm2, %v2729_v31  ;;  %v7071_v13 = vld [vmem:[%s10486_s6 + $0x18] sm:$0xf] }
0x1a24   : > { %7997 = vmatpush3.bf16.msra.mxu1 %v8590_v28  ;;  %8000 = vmatprep.mubr.msk.bf16.mxu1 %vm8856_vm1, %v8855_v9  ;;  %v3104_v15 = vsel %vm1047_vm4, %v7071_v13, 0 }
0x1a25   : > { %7998 = vmatprep.subr.bf16.mxu1 %v8855_v9 }
0x1a28   : > { %v2816_v17 = vpop.f32.mrb[72].mxu0  ;;  %7999 = vmatpush3.bf16.msra.mxu1 %v8591_v16 }
0x1a29   : > { %v7994_v19 = vpop.f32.mrb[73].mxu0  ;;  %8012 = vmatprep.subr.bf16.mxu1 %v8855_v9 }
0x1a2a   : > { %v2819_v21 = vpop.f32.mrb[74].mxu0  ;;  %v8594_v19 = vld [vmem:[%s10485_s5 + $0xf0] sm:$0xff]  }
0x1a2b   : > { %v7995_v22 = vpop.f32.mrb[75].mxu0  ;;  %8001 = vmatmul.mubr.msk.bf16.vlgmr.msra.gmra.mrb[76].mxu1 %vm410_vm0, %v9413_v7 }
0x1a2c   : > { %8013 = vmatpush3.bf16.msra.mxu1 %v8592_v18  ;;  %8016 = vmatprep.mubr.msk.bf16.mxu1 %vm8856_vm1, %v8855_v9  ;;  %v8595_v22 = vld [vmem:[%s10485_s5 + $0xf8] sm:$0xff]  }
0x1a2d   : > { %8014 = vmatprep.subr.bf16.mxu1 %v8855_v9 }
0x1a30   : > { %v2928_v27 = vpop.f32.mrb[76].mxu0  ;;  %8015 = vmatpush3.bf16.msra.mxu1 %v8593_v23  ;;  %v8596_v23 = vld [vmem:[%s10485_s5 + $0x170] sm:$0xff]  }
0x1a31   : > { %v2929_v32 = vadd.f32 %v2928_v27, %v2881_v26  ;;  %v8010_v35 = vpop.f32.mrb[77].mxu0  ;;  %8026 = vmatprep.subr.bf16.mxu1 %v8855_v9  ;;  %v8597_v26 = vld [vmem:[%s10485_s5 + $0x178] sm:$0xff]  }
0x1a32   : > { %v2931_v36 = vpop.f32.mrb[78].mxu0 }
0x1a33   : > { %v2991_v37 = vpack.c.bf16 %v2929_v32, %v2929_v32  ;;  %v8011_v39 = vpop.f32.mrb[79].mxu0  ;;  %8017 = vmatmul.mubr.msk.bf16.vlgmr.msra.gmra.mrb[80].mxu1 %vm410_vm0, %v9413_v7  ;;  %v8598_v32 = vld [vmem:[%s10485_s5 + $0x130] sm:$0xff]  }
0x1a34   : > { %8028 = vmatprep.mubr.msk.bf16.mxu1 %vm8856_vm1, %v8855_v9 }
0x1a35   : > { %v2996_v40 = vsel %vm633_vm2, %v2991_v37, 0 }
0x1a36   : > { %8021 = vmatpush3.bf16.xpose.msra.mxu0 %v2996_v40  ;;  %v8599_v40 = vld [vmem:[%s10485_s5 + $0x138] sm:$0xff]  }
0x1a37   : > { %8032 = vmatprep.subr.bf16.mxu0 %v8855_v9 }
0x1af6   : > { %v2770_v41 = vpop.f32.mrb[72].mxu1 }
0x1af7   : > { %v9583_v42 = vadd.f32 %v2816_v17, %v2770_v41  ;;  %v7988_v43 = vpop.f32.mrb[73].mxu1 }
0x1af8   : > { %v2773_v44 = vpop.f32.mrb[74].mxu1 }
0x1af9   : > { %v7989_v46 = vpop.f32.mrb[75].mxu1 }
0x1afe   : > { %v2872_v48 = vpop.f32.mrb[76].mxu1 }
0x1aff   : > { %v2873_v4 = vadd.f32 %v2872_v48, %v2825_v2  ;;  %v8002_v50 = vpop.f32.mrb[77].mxu1  ;;  %v3262_v2 = vrot.slane %v9450_v20, %v9250_v38  ;;  %v3206_v20 = vrot.slane %v9443_v14, %v9276_v0 }
0x1b00   : > { %v2875_v30 = vpop.f32.mrb[78].mxu1 }
0x1b01   : > { %v2990_v52 = vpack.c.bf16 %v2873_v4, %v2873_v4  ;;  %v8003_v53 = vpop.f32.mrb[79].mxu1 }
0x1b03   : > { %8023 = vmatmul.mubr.msk.bf16.vlgmr.msra.gmra.mrb[80].mxu0 %vm633_vm2, %v2990_v52 }
0x1b04   : > { %8034 = vmatprep.mubr.msk.bf16.mxu0 %vm8856_vm1, %v8855_v9  ;;  %8033 = vmatpush3.bf16.msra.mxu0 %v3104_v15 }
0x1b05   : > { %8046 = vmatprep.subr.bf16.mxu0 %v8855_v9 }
0x1b06   : > { %v2984_v55 = vpop.f32.mrb[80].mxu1 }
0x1b07   : > { %v2985_v56 = vadd.f32 %v2984_v55, %v2937_v54  ;;  %v8018_v58 = vpop.f32.mrb[81].mxu1 }
0x1b08   : > { %v2987_v59 = vpop.f32.mrb[82].mxu1 }
0x1b09   : > { %v3052_v45 = vpack.c.bf16 %v2985_v56, %v2985_v56  ;;  %v8019_v62 = vpop.f32.mrb[83].mxu1 }
0x1b0b   : > { %v3057_v1 = vsel %vm1047_vm4, %v3052_v45, 0 }
0x1b0c   : > { %8027 = vmatpush3.bf16.msra.mxu1 %v3057_v1 }
0x1b0d   : > { %8038 = vmatprep.subr.bf16.mxu1 %v8855_v9 }
0x1bd6   : > { %v3032_v25 = vpop.f32.mrb[80].mxu0 }
0x1bd7   : > { %v3038_v3 = vmul.f32 0.35355338, %v3032_v25  ;;  %v8024_v5 = vpop.f32.mrb[81].mxu0 }
0x1bd8   : > { %v3035_v61 = vpop.f32.mrb[82].mxu0 }
0x1bd9   : > { %v8025_v6 = vpop.f32.mrb[83].mxu0  ;;  %v3039_v63 = vadd.f32 %v3038_v3, %v9488_v51  ;;  %v3150_v3 = vrot.slane %v9443_v14, %v9250_v38 }
0x1bdb   : > { %v3040_v8 = vsel %vm633_vm2, %v3039_v63, -inf }
0x1bdc   : > { %3041 = vmax.xlane.f32.xlu0 %v3040_v8 }
0x1c69   : > { %v3042_v24 = vpop.xlane.xlu0 %3041 }
0x1c6a   : > { %v3043_v10 = vsub.f32 %v3039_v63, %v3042_v24 }
0x1c6c   : > { %v3044_v28 = vmul.f32 1.442695, %v3043_v10 }
0x1c6e   : > { %8732 = vpow2.f32 %v3044_v28 }
0x1c78   : > { %v8733_v31 = vpop.eup %8732 }
0x1c79   : > { %v3046_v49 = vsel %vm633_vm2, %v8733_v31, 0.0 }
0x1c7a   : > { %3047 = vadd.xlane.f32.xlu1 %v3046_v49 }
0x1d07   : > { %v3048_v16 = vpop.xlane.xlu1 %3047 }
0x1d08   : > { %8734 = vrcp.f32 %v3048_v16 }
0x1d12   : > { %v8735_v17 = vpop.eup %8734 }
0x1d13   : > { %v3050_v18 = vmul.f32 %v8735_v17, %v8733_v31 }
0x1d15   : > { %v3051_v21 = vpack.c.bf16 %v3050_v18, %v3050_v18 }
0x1d17   : > { %8029 = vmatmul.mubr.msk.bf16.vlgmr.msra.gmra.mrb[84].mxu1 %vm633_vm2, %v3051_v21 }
0x1d18   : > { %8039 = vmatpush3.bf16.msra.mxu1 %v8594_v19  ;;  %8042 = vmatprep.mubr.msk.bf16.mxu1 %vm8856_vm1, %v8855_v9  ;;  %v7072_v19 = vld [vmem:[%s10486_s6 + $0x1c] sm:$0xf] }
0x1d19   : > { %8040 = vmatprep.subr.bf16.mxu1 %v8855_v9  ;;  %v3429_v21 = vsel %vm1047_vm4, %v7072_v19, 0 }
0x1d1c   : > { %8041 = vmatpush3.bf16.msra.mxu1 %v8595_v22 }
0x1d1d   : > { %8054 = vmatprep.subr.bf16.mxu1 %v8855_v9 }
0x1d1f   : > { %8043 = vmatmul.mubr.msk.bf16.vlgmr.msra.gmra.mrb[88].mxu1 %vm410_vm0, %v9413_v7 }
0x1d20   : > { %8055 = vmatpush3.bf16.msra.mxu1 %v8596_v23  ;;  %8058 = vmatprep.mubr.msk.bf16.mxu1 %vm8856_vm1, %v8855_v9 }
0x1d21   : > { %8056 = vmatprep.subr.bf16.mxu1 %v8855_v9 }
0x1d24   : > { %8057 = vmatpush3.bf16.msra.mxu1 %v8597_v26 }
0x1d25   : > { %8068 = vmatprep.subr.bf16.mxu1 %v8855_v9 }
0x1d27   : > { %8059 = vmatmul.mubr.msk.bf16.vlgmr.msra.gmra.mrb[92].mxu1 %vm410_vm0, %v9413_v7 }
0x1d28   : > { %8070 = vmatprep.mubr.msk.bf16.mxu1 %vm8856_vm1, %v8855_v9 }
0x1dea   : > { %v3093_v27 = vpop.f32.mrb[84].mxu1 }
0x1deb   : > { %v3099_v35 = vpack.c.bf16 %v3093_v27, %v3093_v27  ;;  %v8030_v36 = vpop.f32.mrb[85].mxu1 }
0x1dec   : > { %v3096_v37 = vpop.f32.mrb[86].mxu1 }
0x1ded   : > { %v8031_v39 = vpop.f32.mrb[87].mxu1  ;;  %8035 = vmatmul.mubr.msk.bf16.vlgmr.msra.gmra.mrb[84].mxu0 %vm633_vm2, %v3099_v35 }
0x1dee   : > { %8047 = vmatpush3.bf16.msra.mxu0 %v8598_v32  ;;  %8050 = vmatprep.mubr.msk.bf16.mxu0 %vm8856_vm1, %v8855_v9 }
0x1def   : > { %8048 = vmatprep.subr.bf16.mxu0 %v8855_v9 }
0x1df2   : > { %v3197_v41 = vpop.f32.mrb[88].mxu1  ;;  %8049 = vmatpush3.bf16.msra.mxu0 %v8599_v40 }
0x1df3   : > { %v8044_v43 = vpop.f32.mrb[89].mxu1  ;;  %8062 = vmatprep.subr.bf16.mxu0 %v8855_v9  ;;  %v3198_v63 = vadd.f32 %v3197_v41, %v3150_v3 }
0x1df4   : > { %v3200_v44 = vpop.f32.mrb[90].mxu1  ;;  %v3476_v43 = vrot.slane %v9403_v60, %v9042_v57 }
0x1df5   : > { %v8045_v46 = vpop.f32.mrb[91].mxu1  ;;  %8051 = vmatmul.mubr.msk.bf16.vlgmr.msra.gmra.mrb[88].mxu0 %vm410_vm0, %v9413_v7 }
0x1df6   : > { %8064 = vmatprep.mubr.msk.bf16.mxu0 %vm8856_vm1, %v8855_v9 }
0x1dfa   : > { %v3309_v48 = vpop.f32.mrb[92].mxu1 }
0x1dfb   : > { %v3310_v4 = vadd.f32 %v3309_v48, %v3262_v2  ;;  %v8060_v50 = vpop.f32.mrb[93].mxu1 }
0x1dfc   : > { %v3312_v30 = vpop.f32.mrb[94].mxu1 }
0x1dfd   : > { %v3377_v52 = vpack.c.bf16 %v3310_v4, %v3310_v4  ;;  %v8061_v53 = vpop.f32.mrb[95].mxu1 }
0x1dfe   : > { %v8600_v53 = vld [vmem:[%s10487_s7 + $0x10] sm:$0xff]  }
0x1dff   : > { %v3382_v54 = vsel %vm1047_vm4, %v3377_v52, 0 }
0x1e00   : > { %8069 = vmatpush3.bf16.msra.mxu1 %v3382_v54 }
0x1e01   : > { %8080 = vmatprep.subr.bf16.mxu1 %v8855_v9 }
0x1ec0   : > { %v3140_v55 = vpop.f32.mrb[84].mxu0 }
0x1ec1   : > { %v3146_v7 = vadd.f32 %v3140_v55, %v9583_v42  ;;  %v8036_v56 = vpop.f32.mrb[85].mxu0  ;;  %v3315_v42 = vpack.c.bf16 %v3198_v63, %v3198_v63 }
0x1ec2   : > { %v3143_v58 = vpop.f32.mrb[86].mxu0 }
0x1ec3   : > { %v8037_v59 = vpop.f32.mrb[87].mxu0 }
0x1ec8   : > { %v3253_v45 = vpop.f32.mrb[88].mxu0 }
0x1ec9   : > { %v3254_v62 = vadd.f32 %v3253_v45, %v3206_v20  ;;  %v8052_v1 = vpop.f32.mrb[89].mxu0 }
0x1eca   : > { %v3256_v25 = vpop.f32.mrb[90].mxu0  ;;  %v3497_v1 = vrot.slane %v9403_v60, %v9200_v33 }
0x1ecb   : > { %v3316_v5 = vpack.c.bf16 %v3254_v62, %v3254_v62  ;;  %v8053_v61 = vpop.f32.mrb[91].mxu0 }
0x1ecd   : > { %v3321_v6 = vsel %vm633_vm2, %v3316_v5, 0  ;;  %v3502_v5 = vrot.slane %v9403_v60, %v9250_v38 }
0x1ece   : > { %8063 = vmatpush3.bf16.xpose.msra.mxu0 %v3321_v6 }
0x1ecf   : > { %8074 = vmatprep.subr.bf16.mxu0 %v8855_v9 }
0x1ed5   : > { %8065 = vmatmul.mubr.msk.bf16.vlgmr.msra.gmra.mrb[92].mxu0 %vm633_vm2, %v3315_v42  ;;  %v8602_v42 = vld [vmem:[%s10488_s8 + $0x40] sm:$0xff]  }
0x1ed6   : > { %8076 = vmatprep.mubr.msk.bf16.mxu0 %vm8856_vm1, %v8855_v9  ;;  %8075 = vmatpush3.bf16.msra.mxu0 %v3429_v21 }
0x1ed7   : > { %8088 = vmatprep.subr.bf16.mxu0 %v8855_v9 }
0x1fa8   : > { %v3357_v8 = vpop.f32.mrb[92].mxu0 }
0x1fa9   : > { %v3363_v24 = vmul.f32 0.35355338, %v3357_v8  ;;  %v8066_v10 = vpop.f32.mrb[93].mxu0  ;;  %v8603_v8 = vld [vmem:[%s10488_s8 + $0x48] sm:$0xff]  }
0x1faa   : > { %v3360_v28 = vpop.f32.mrb[94].mxu0  ;;  %v8605_v10 = vld [vmem:[%s10488_s8 + $0x58] sm:$0xff]  }
0x1fab   : > { %v8067_v31 = vpop.f32.mrb[95].mxu0  ;;  %v3364_v14 = vadd.f32 %v3363_v24, %v9488_v51  ;;  %v8604_v24 = vld [vmem:[%s10488_s8 + $0x50] sm:$0xff]   ;;  %v8606_v28 = vld [vmem:[%s10488_s8 + $0x60] sm:$0xff]  }
0x1fac   : > { %v8607_v31 = vld [vmem:[%s10488_s8 + $0x68] sm:$0xff]  }
0x1fad   : > { %v3365_v49 = vsel %vm633_vm2, %v3364_v14, -inf }
0x1fae   : > { %3366 = vmax.xlane.f32.xlu0 %v3365_v49  ;;  %v8609_v49 = vld [vmem:[%s10488_s8 + $0x78] sm:$0xff]  }
0x203b   : > { %v3367_v13 = vpop.xlane.xlu0 %3366 }
0x203c   : > { %v3368_v15 = vsub.f32 %v3364_v14, %v3367_v13  ;;  %v8608_v14 = vld [vmem:[%s10488_s8 + $0x70] sm:$0xff]   ;;  %v7141_v13 = vld [vmem:[%s10484_s4 + $0x1] ss:$0 sm:$0xff] }
0x203e   : > { %v3369_v16 = vmul.f32 1.442695, %v3368_v15 }
0x2040   : > { %8736 = vpow2.f32 %v3369_v16 }
0x204a   : > { %v8737_v17 = vpop.eup %8736 }
0x204b   : > { %v3371_v18 = vsel %vm633_vm2, %v8737_v17, 0.0 }
0x204c   : > { %3372 = vadd.xlane.f32.xlu1 %v3371_v18 }
0x20d9   : > { %v3373_v22 = vpop.xlane.xlu1 %3372 }
0x20da   : > { %8738 = vrcp.f32 %v3373_v22 }
0x20e4   : > { %v8739_v23 = vpop.eup %8738 }
0x20e5   : > { %v3375_v26 = vmul.f32 %v8739_v23, %v8737_v17 }
0x20e7   : > { %v3376_v27 = vpack.c.bf16 %v3375_v26, %v3375_v26 }
0x20e9   : > { %8071 = vmatmul.mubr.msk.bf16.vlgmr.msra.gmra.mrb[96].mxu1 %vm633_vm2, %v3376_v27 }
0x20ea   : > { %8084 = vmatprep.mubr.msk.bf16.mxu1 %vm8856_vm1, %v8855_v9  ;;  %8081 = vmatpush3.bf16.msra.mxu1 %v8600_v53 }
0x20eb   : > { %8082 = vmatprep.subr.bf16.mxu1 %v8855_v9 }
0x21bc   : > { %v3418_v32 = vpop.f32.mrb[96].mxu1 }
0x21bd   : > { %v3424_v35 = vpack.c.bf16 %v3418_v32, %v3418_v32  ;;  %v8072_v36 = vpop.f32.mrb[97].mxu1 }
0x21be   : > { %v3421_v37 = vpop.f32.mrb[98].mxu1 }
0x21bf   : > { %v8073_v39 = vpop.f32.mrb[99].mxu1  ;;  %8077 = vmatmul.mubr.msk.bf16.vlgmr.msra.gmra.mrb[96].mxu0 %vm633_vm2, %v3424_v35 }
0x21c0   : > { %8104 = vmatprep.mubr.msk.bf16.mxu0 %vm8856_vm1, %v8855_v9  ;;  %8089 = vmatpush3.bf16.msra.mxu0 %v8602_v42  ;;  %v8613_v42 = vld [vmem:[%s10485_s5 + $0x1c8] sm:$0xff]  }
0x21c1   : > { %8090 = vmatprep.subr.bf16.mxu0 %v8855_v9 }
0x21c4   : > { %8091 = vmatpush3.bf16.msra.mxu0 %v8603_v8  ;;  %v8614_v8 = vld [vmem:[%s10485_s5 + $0x200] sm:$0xff]  }
0x21c5   : > { %8092 = vmatprep.subr.bf16.mxu0 %v8855_v9 }
0x21c8   : > { %8093 = vmatpush3.bf16.msra.mxu0 %v8604_v24  ;;  %v8615_v24 = vld [vmem:[%s10485_s5 + $0x208] sm:$0xff]  }
0x21c9   : > { %8094 = vmatprep.subr.bf16.mxu0 %v8855_v9 }
0x21cc   : > { %8095 = vmatpush3.bf16.msra.mxu0 %v8605_v10 }
0x21cd   : > { %8096 = vmatprep.subr.bf16.mxu0 %v8855_v9 }
0x21d0   : > { %8097 = vmatpush3.bf16.msra.mxu0 %v8606_v28 }
0x21d1   : > { %8098 = vmatprep.subr.bf16.mxu0 %v8855_v9 }
0x21d4   : > { %8099 = vmatpush3.bf16.msra.mxu0 %v8607_v31 }
0x21d5   : > { %8100 = vmatprep.subr.bf16.mxu0 %v8855_v9 }
0x21d8   : > { %8101 = vmatpush3.bf16.msra.mxu0 %v8608_v14 }
0x21d9   : > { %8102 = vmatprep.subr.bf16.mxu0 %v8855_v9 }
0x21dc   : > { %8103 = vmatpush3.bf16.msra.mxu0 %v8609_v49  ;;  %v9796_v49 = vld [vmem:[%s10483_s3 + $0x20] sm:$0xff] }
0x21dd   : > { %8138 = vmatprep.subr.bf16.mxu0 %v8855_v9 }
0x2292   : > { %v3465_v40 = vpop.f32.mrb[96].mxu0 }
0x2293   : > { %v3471_v41 = vadd.f32 %v3465_v40, %v3146_v7  ;;  %v8078_v44 = vpop.f32.mrb[97].mxu0  ;;  %v3577_v40 = vrot.slane %v9403_v60, %v9120_v12  ;;  %v8610_v60 = vld [vmem:[%s10485_s5 + $0x180] sm:$0xff]  }
0x2294   : > { %v3468_v46 = vpop.f32.mrb[98].mxu0 }
0x2295   : > { %v3472_v2 = vadd.f32 %v3471_v41, %v9385_v47  ;;  %v8079_v48 = vpop.f32.mrb[99].mxu0  ;;  %v8601_v47 = vld [vmem:[%s10487_s7 + $0x18] sm:$0xff]  }
0x2296   : > { %8083 = vmatpush3.bf16.msra.mxu1 %v8601_v47 }
0x2297   : > { %v9675_v4 = vadd.f32 %v3476_v43, %v3472_v2  ;;  %8108 = vmatprep.subr.bf16.mxu1 %v8855_v9 }
0x2299   : > { %v3478_v50 = vsel %vm410_vm0, %v9675_v4, 0.0  ;;  %v3482_v30 = vmul.f32 %v9675_v4, %v9675_v4 }
0x229a   : > { %3479 = vadd.xlane.f32.xlu0 %v3478_v50 }
0x229b   : > { %v3483_v52 = vsel %vm410_vm0, %v3482_v30, 0.0 }
0x229c   : > { %3484 = vadd.xlane.f32.xlu1 %v3483_v52 }
0x2327   : > { %v3480_v54 = vpop.xlane.xlu0 %3479 }
0x2328   : > { %v3481_v55 = vmul.f32 0.03125, %v3480_v54 }
0x2329   : > { %v3485_v7 = vpop.xlane.xlu1 %3484 }
0x232a   : > { %v3487_v56 = vmul.f32 %v3481_v55, %v3481_v55  ;;  %v3486_v58 = vmul.f32 0.03125, %v3485_v7  ;;  %v3490_v62 = vsub.f32 %v9675_v4, %v3481_v55 }
0x232c   : > { %v3488_v59 = vsub.f32 %v3486_v58, %v3487_v56 }
0x232e   : > { %v3489_v20 = vmax.f32 %v3488_v59, 0.0 }
0x2330   : > { %v3491_v45 = vadd.f32 1e-05, %v3489_v20  ;;  %v9756_v20 = vld [vmem:[%s10482_s2 + $0x10] sm:$0xff] }
0x2332   : > { %8740 = vrsqrt.f32 %v3491_v45 }
0x233c   : > { %v8741_v25 = vpop.eup %8740 }
0x233d   : > { %v3493_v3 = vmul.f32 %v8741_v25, %v3490_v62  ;;  %v3768_v62 = vrot.slane %v9756_v20, %v8990_v29  ;;  %v3773_v25 = vrot.slane %v9756_v20, %v9000_v34 }
0x233f   : > { %v3498_v61 = vmul.f32 %v3497_v1, %v3493_v3 }
0x2341   : > { %v3503_v6 = vadd.f32 %v3502_v5, %v3498_v61 }
0x2343   : > { %v3504_v63 = vpack.c.bf16 %v3503_v6, %v3503_v6  ;;  %v8612_v6 = vld [vmem:[%s10485_s5 + $0x1c0] sm:$0xff]  }
0x2345   : > { %8085 = vmatmul.mubr.msk.bf16.vlgmr.msra.gmra.mrb[100].mxu1 %vm410_vm0, %v3504_v63 }
0x2346   : > { %8112 = vmatprep.mubr.msk.bf16.mxu1 %vm8856_vm1, %v8855_v9  ;;  %8109 = vmatpush3.bf16.msra.mxu1 %v8610_v60 }
0x2347   : > { %8110 = vmatprep.subr.bf16.mxu1 %v8855_v9 }
0x2418   : > { %v3558_v15 = vpop.f32.mrb[100].mxu1 }
0x2419   : > { %v3559_v16 = vadd.f32 %v7141_v13, %v3558_v15  ;;  %v8086_v17 = vpop.f32.mrb[101].mxu1  ;;  %v3838_v13 = vrot.slane %v9796_v49, %v9042_v57 }
0x241a   : > { %v3561_v18 = vpop.f32.mrb[102].mxu1 }
0x241b   : > { %v3564_v19 = vmul.f32 %v3559_v16, %v3559_v16  ;;  %v8087_v21 = vpop.f32.mrb[103].mxu1 }
0x241c   : > { %v3779_v21 = vrot.slane %v9796_v49, %v8990_v29 }
0x241d   : > { %v3565_v22 = vmul.f32 %v3564_v19, %v3559_v16  ;;  %v9803_v19 = vld [vmem:[%s10483_s3 + $0x28] sm:$0xf] }
0x241f   : > { %v3566_v23 = vmul.f32 0.044715, %v3565_v22 }
0x2421   : > { %v3567_v26 = vadd.f32 %v3566_v23, %v3559_v16 }
0x2423   : > { %v3568_v27 = vmul.f32 0.7978846, %v3567_v26 }
0x2425   : > { %8742 = vtanh.f32 %v3568_v27  ;;  %v3894_v27 = vrot.slane %v9803_v19, %v8990_v29 }
0x242f   : > { %v8743_v32 = vpop.eup %8742 }
0x2430   : > { %v3570_v35 = vadd.f32 1.0, %v8743_v32 }
0x2432   : > { %v3571_v36 = vmul.f32 0.5, %v3570_v35 }
0x2434   : > { %v3572_v37 = vmul.f32 %v3571_v36, %v3559_v16 }
0x2436   : > { %v3573_v39 = vpack.c.bf16 %v3572_v37, %v3572_v37 }
0x2438   : > { %8105 = vmatmul.mubr.bf16.vlgmr.msra.gmra.mrb[100].mxu0 %v3573_v39 }
0x2439   : > { %8140 = vmatprep.mubr.msk.bf16.mxu0 %vm8856_vm1, %v8855_v9 }
0x250b   : > { %v3660_v41 = vpop.f32.mrb[100].mxu0 }
0x250c   : > { %v3661_v43 = vadd.f32 %v3660_v41, %v3577_v40  ;;  %v8106_v44 = vpop.f32.mrb[101].mxu0  ;;  %v8616_v40 = vld [vmem:[%s10485_s5 + $0x190] sm:$0xff]  }
0x250d   : > { %v3663_v46 = vpop.f32.mrb[102].mxu0 }
0x250e   : > { %v9738_v2 = vadd.f32 %v3661_v43, %v9675_v4  ;;  %v8107_v48 = vpop.f32.mrb[103].mxu0  ;;  %v8611_v4 = vld [vmem:[%s10485_s5 + $0x188] sm:$0xff]  }
0x250f   : > { %8111 = vmatpush3.bf16.msra.mxu1 %v8611_v4  ;;  %v8617_v48 = vld [vmem:[%s10485_s5 + $0x198] sm:$0xff]  }
0x2510   : > { %v3749_v50 = vsel %vm410_vm0, %v9738_v2, 0.0  ;;  %v3753_v30 = vmul.f32 %v9738_v2, %v9738_v2  ;;  %8116 = vmatprep.subr.bf16.mxu1 %v8855_v9 }
0x2511   : > { %3750 = vadd.xlane.f32.xlu0 %v3749_v50  ;;  %v8618_v50 = vld [vmem:[%s10485_s5 + $0x210] sm:$0xff]  }
0x2512   : > { %v3754_v52 = vsel %vm410_vm0, %v3753_v30, 0.0  ;;  %v8619_v30 = vld [vmem:[%s10485_s5 + $0x218] sm:$0xff]  }
0x2513   : > { %3755 = vadd.xlane.f32.xlu1 %v3754_v52 }
0x259e   : > { %v3751_v53 = vpop.xlane.xlu0 %3750 }
0x259f   : > { %v3752_v47 = vmul.f32 0.03125, %v3751_v53 }
0x25a0   : > { %v3756_v54 = vpop.xlane.xlu1 %3755 }
0x25a1   : > { %v3758_v55 = vmul.f32 %v3752_v47, %v3752_v47  ;;  %v3757_v7 = vmul.f32 0.03125, %v3756_v54  ;;  %v3761_v45 = vsub.f32 %v9738_v2, %v3752_v47 }
0x25a3   : > { %v3759_v56 = vsub.f32 %v3757_v7, %v3758_v55 }
0x25a5   : > { %v3760_v58 = vmax.f32 %v3759_v56, 0.0 }
0x25a7   : > { %v3762_v59 = vadd.f32 1e-05, %v3760_v58 }
0x25a9   : > { %8744 = vrsqrt.f32 %v3762_v59 }
0x25b3   : > { %v8745_v1 = vpop.eup %8744 }
0x25b4   : > { %v3764_v3 = vmul.f32 %v8745_v1, %v3761_v45  ;;  %v4172_v45 = vrot.slane %v9803_v19, %v9000_v34 }
0x25b6   : > { %v3769_v5 = vmul.f32 %v3768_v62, %v3764_v3 }
0x25b8   : > { %v3774_v61 = vadd.f32 %v3773_v25, %v3769_v5 }
0x25ba   : > { %v9766_v63 = vpack.c.bf16 %v3774_v61, %v3774_v61 }
0x25bc   : > { %8113 = vmatmul.mubr.msk.bf16.vlgmr.msra.gmra.mrb[104].mxu1 %vm410_vm0, %v9766_v63 }
0x25bd   : > { %8117 = vmatpush3.bf16.msra.mxu1 %v8612_v6  ;;  %8120 = vmatprep.mubr.msk.bf16.mxu1 %vm8856_vm1, %v8855_v9 }
0x25be   : > { %8118 = vmatprep.subr.bf16.mxu1 %v8855_v9 }
0x25c1   : > { %8119 = vmatpush3.bf16.msra.mxu1 %v8613_v42 }
0x25c2   : > { %8124 = vmatprep.subr.bf16.mxu1 %v8855_v9 }
0x25c4   : > { %8121 = vmatmul.mubr.msk.bf16.vlgmr.msra.gmra.mrb[108].mxu1 %vm410_vm0, %v9766_v63 }
0x25c5   : > { %8125 = vmatpush3.bf16.msra.mxu1 %v8614_v8  ;;  %8128 = vmatprep.mubr.msk.bf16.mxu1 %vm8856_vm1, %v8855_v9 }
0x25c6   : > { %8126 = vmatprep.subr.bf16.mxu1 %v8855_v9 }
0x25c9   : > { %8127 = vmatpush3.bf16.msra.mxu1 %v8615_v24 }
0x25ca   : > { %8132 = vmatprep.subr.bf16.mxu1 %v8855_v9 }
0x25cc   : > { %8129 = vmatmul.mubr.msk.bf16.vlgmr.msra.gmra.mrb[112].mxu1 %vm410_vm0, %v9766_v63 }
0x25cd   : > { %8134 = vmatprep.mubr.msk.bf16.mxu1 %vm8856_vm1, %v8855_v9 }
0x268f   : > { %v3829_v10 = vpop.f32.mrb[104].mxu1 }
0x2690   : > { %v8114_v28 = vpop.f32.mrb[105].mxu1  ;;  %v3830_v32 = vadd.f32 %v3829_v10, %v3779_v21 }
0x2691   : > { %v3832_v31 = vpop.f32.mrb[106].mxu1 }
0x2692   : > { %v8115_v14 = vpop.f32.mrb[107].mxu1  ;;  %v3947_v41 = vpack.c.bf16 %v3830_v32, %v3830_v32 }
0x2697   : > { %v3885_v15 = vpop.f32.mrb[108].mxu1 }
0x2698   : > { %v3886_v16 = vadd.f32 %v3885_v15, %v3838_v13  ;;  %v8122_v17 = vpop.f32.mrb[109].mxu1  ;;  %v8620_v15 = vld [vmem:[%s10485_s5 + $0x1d0] sm:$0xff]  }
0x2699   : > { %v3888_v18 = vpop.f32.mrb[110].mxu1  ;;  %v8621_v17 = vld [vmem:[%s10485_s5 + $0x1d8] sm:$0xff]  }
0x269a   : > { %v3948_v22 = vpack.c.bf16 %v3886_v16, %v3886_v16  ;;  %v8123_v23 = vpop.f32.mrb[111].mxu1 }
0x269c   : > { %v3953_v26 = vsel %vm633_vm2, %v3948_v22, 0 }
0x269d   : > { %8133 = vmatpush3.bf16.xpose.msra.mxu1 %v3953_v26  ;;  %v4116_v26 = vrot.slane %v9796_v49, %v9120_v12 }
0x269e   : > { %8144 = vmatprep.subr.bf16.mxu1 %v8855_v9 }
0x269f   : > { %v3941_v35 = vpop.f32.mrb[112].mxu1 }
0x26a0   : > { %v3942_v36 = vadd.f32 %v3941_v35, %v3894_v27  ;;  %v8130_v37 = vpop.f32.mrb[113].mxu1 }
0x26a1   : > { %v3944_v39 = vpop.f32.mrb[114].mxu1  ;;  %v4060_v37 = vrot.slane %v9796_v49, %v9000_v34 }
0x26a2   : > { %v4009_v43 = vpack.c.bf16 %v3942_v36, %v3942_v36  ;;  %v8131_v44 = vpop.f32.mrb[115].mxu1 }
0x26a4   : > { %v4014_v46 = vsel %vm1047_vm4, %v4009_v43, 0  ;;  %8135 = vmatmul.mubr.msk.bf16.vlgmr.msra.gmra.mrb[116].mxu1 %vm633_vm2, %v3947_v41 }
0x26a5   : > { %8139 = vmatpush3.bf16.msra.mxu0 %v4014_v46  ;;  %8145 = vmatpush3.bf16.msra.mxu1 %v8616_v40 }
0x26a6   : > { %8146 = vmatprep.subr.bf16.mxu1 %v8855_v9  ;;  %8148 = vmatprep.mubr.msk.bf16.mxu1 %vm8856_vm1, %v8855_v9 }
0x26a7   : > { %8152 = vmatprep.subr.bf16.mxu0 %v8855_v9 }
0x26a9   : > { %8147 = vmatpush3.bf16.msra.mxu1 %v8617_v48 }
0x26aa   : > { %8160 = vmatprep.subr.bf16.mxu1 %v8855_v9 }
0x26ac   : > { %8149 = vmatmul.mubr.msk.bf16.vlgmr.msra.gmra.mrb[120].mxu1 %vm410_vm0, %v9766_v63 }
0x26ad   : > { %8161 = vmatpush3.bf16.msra.mxu1 %v8618_v50  ;;  %8164 = vmatprep.mubr.msk.bf16.mxu1 %vm8856_vm1, %v8855_v9 }
0x26ae   : > { %8162 = vmatprep.subr.bf16.mxu1 %v8855_v9 }
0x26b1   : > { %8163 = vmatpush3.bf16.msra.mxu1 %v8619_v30 }
0x26b2   : > { %8174 = vmatprep.subr.bf16.mxu1 %v8855_v9 }
0x26b4   : > { %8165 = vmatmul.mubr.msk.bf16.vlgmr.msra.gmra.mrb[124].mxu1 %vm410_vm0, %v9766_v63 }
0x26b5   : > { %8176 = vmatprep.mubr.msk.bf16.mxu1 %vm8856_vm1, %v8855_v9 }
0x2777   : > { %v3989_v52 = vpop.f32.mrb[116].mxu1 }
0x2778   : > { %v3995_v60 = vmul.f32 0.35355338, %v3989_v52  ;;  %v8136_v4 = vpop.f32.mrb[117].mxu1 }
0x2779   : > { %v3992_v53 = vpop.f32.mrb[118].mxu1 }
0x277a   : > { %v8137_v47 = vpop.f32.mrb[119].mxu1  ;;  %v3996_v54 = vadd.f32 %v3995_v60, %v9488_v51 }
0x277c   : > { %v3997_v55 = vsel %vm633_vm2, %v3996_v54, -inf }
0x277d   : > { %3998 = vmax.xlane.f32.xlu0 %v3997_v55 }
0x277f   : > { %v4107_v7 = vpop.f32.mrb[120].mxu1 }
0x2780   : > { %v8150_v56 = vpop.f32.mrb[121].mxu1  ;;  %v4108_v43 = vadd.f32 %v4107_v7, %v4060_v37 }
0x2781   : > { %v4110_v58 = vpop.f32.mrb[122].mxu1  ;;  %v7205_v56 = vld [vmem:[%s10486_s6 + $0x24] sm:$0xf] }
0x2782   : > { %v8151_v59 = vpop.f32.mrb[123].mxu1  ;;  %v4225_v44 = vpack.c.bf16 %v4108_v43, %v4108_v43  ;;  %v4339_v58 = vsel %vm1047_vm4, %v7205_v56, 0 }
0x2787   : > { %v4219_v62 = vpop.f32.mrb[124].mxu1 }
0x2788   : > { %v4220_v1 = vadd.f32 %v4219_v62, %v4172_v45  ;;  %v8166_v25 = vpop.f32.mrb[125].mxu1  ;;  %v7204_v62 = vld [vmem:[%s10486_s6 + $0x20] sm:$0xf] }
0x2789   : > { %v4222_v3 = vpop.f32.mrb[126].mxu1 }
0x278a   : > { %v4287_v5 = vpack.c.bf16 %v4220_v1, %v4220_v1  ;;  %v8167_v61 = vpop.f32.mrb[127].mxu1  ;;  %v4385_v3 = vsel %vm1047_vm4, %v7204_v62, 0 }
0x278c   : > { %v4292_v6 = vsel %vm1047_vm4, %v4287_v5, 0  ;;  %v8622_v5 = vld [vmem:[%s10485_s5 + $0x1e0] sm:$0xff]  }
0x278d   : > { %8175 = vmatpush3.bf16.msra.mxu1 %v4292_v6  ;;  %v8623_v6 = vld [vmem:[%s10485_s5 + $0x1e8] sm:$0xff]  }
0x278e   : > { %8186 = vmatprep.subr.bf16.mxu1 %v8855_v9 }
0x280a   : > { %v3999_v42 = vpop.xlane.xlu0 %3998 }
0x280b   : > { %v4000_v8 = vsub.f32 %v3996_v54, %v3999_v42 }
0x280d   : > { %v4001_v24 = vmul.f32 1.442695, %v4000_v8  ;;  %v8624_v8 = vld [vmem:[%s10485_s5 + $0x1a0] sm:$0xff]  }
0x280f   : > { %8746 = vpow2.f32 %v4001_v24 }
0x2819   : > { %v8747_v10 = vpop.eup %8746 }
0x281a   : > { %v4003_v28 = vsel %vm633_vm2, %v8747_v10, 0.0 }
0x281b   : > { %4004 = vadd.xlane.f32.xlu1 %v4003_v28 }
0x28a8   : > { %v4005_v31 = vpop.xlane.xlu1 %4004 }
0x28a9   : > { %8748 = vrcp.f32 %v4005_v31 }
0x28b3   : > { %v8749_v14 = vpop.eup %8748 }
0x28b4   : > { %v4007_v13 = vmul.f32 %v8749_v14, %v8747_v10  ;;  %v8625_v14 = vld [vmem:[%s10485_s5 + $0x1a8] sm:$0xff]  }
0x28b6   : > { %v4008_v16 = vpack.c.bf16 %v4007_v13, %v4007_v13 }
0x28b8   : > { %8141 = vmatmul.mubr.msk.bf16.vlgmr.msra.gmra.mrb[104].mxu0 %vm633_vm2, %v4008_v16 }
0x28b9   : > { %8153 = vmatpush3.bf16.msra.mxu0 %v8620_v15  ;;  %8156 = vmatprep.mubr.msk.bf16.mxu0 %vm8856_vm1, %v8855_v9  ;;  %v8626_v15 = vld [vmem:[%s10485_s5 + $0x220] sm:$0xff]  }
0x28ba   : > { %8154 = vmatprep.subr.bf16.mxu0 %v8855_v9 }
0x28bd   : > { %8155 = vmatpush3.bf16.msra.mxu0 %v8621_v17 }
0x28be   : > { %8168 = vmatprep.subr.bf16.mxu0 %v8855_v9 }
0x28c0   : > { %8157 = vmatmul.mubr.msk.bf16.vlgmr.msra.gmra.mrb[108].mxu0 %vm410_vm0, %v9766_v63 }
0x28c1   : > { %8170 = vmatprep.mubr.msk.bf16.mxu0 %vm8856_vm1, %v8855_v9 }
0x298b   : > { %v4050_v18 = vpop.f32.mrb[104].mxu0 }
0x298c   : > { %v8142_v21 = vpop.f32.mrb[105].mxu0  ;;  %v4056_v61 = vpack.c.bf16 %v4050_v18, %v4050_v18 }
0x298d   : > { %v4053_v22 = vpop.f32.mrb[106].mxu0  ;;  %v8627_v21 = vld [vmem:[%s10485_s5 + $0x228] sm:$0xff]  }
0x298e   : > { %v8143_v23 = vpop.f32.mrb[107].mxu0  ;;  %v4486_v22 = vrot.slane %v9796_v49, %v9176_v11 }
0x2993   : > { %v4163_v27 = vpop.f32.mrb[108].mxu0 }
0x2994   : > { %v4164_v32 = vadd.f32 %v4163_v27, %v4116_v26  ;;  %v8158_v35 = vpop.f32.mrb[109].mxu0 }
0x2995   : > { %v4166_v36 = vpop.f32.mrb[110].mxu0 }
0x2996   : > { %v4226_v39 = vpack.c.bf16 %v4164_v32, %v4164_v32  ;;  %v8159_v40 = vpop.f32.mrb[111].mxu0 }
0x2998   : > { %v4231_v41 = vsel %vm633_vm2, %v4226_v39, 0 }
0x2999   : > { %8169 = vmatpush3.bf16.xpose.msra.mxu0 %v4231_v41 }
0x299a   : > { %8180 = vmatprep.subr.bf16.mxu0 %v8855_v9 }
0x29a0   : > { %8171 = vmatmul.mubr.msk.bf16.vlgmr.msra.gmra.mrb[112].mxu0 %vm633_vm2, %v4225_v44 }
0x29a1   : > { %8182 = vmatprep.mubr.msk.bf16.mxu0 %vm8856_vm1, %v8855_v9  ;;  %8181 = vmatpush3.bf16.msra.mxu0 %v4339_v58 }
0x29a2   : > { %8192 = vmatprep.subr.bf16.mxu0 %v8855_v9 }
0x2a73   : > { %v4267_v46 = vpop.f32.mrb[112].mxu0 }
0x2a74   : > { %v4273_v48 = vmul.f32 0.35355338, %v4267_v46  ;;  %v8172_v50 = vpop.f32.mrb[113].mxu0  ;;  %v4430_v46 = vrot.slane %v9796_v49, %v9200_v33 }
0x2a75   : > { %v4270_v30 = vpop.f32.mrb[114].mxu0 }
0x2a76   : > { %v8173_v52 = vpop.f32.mrb[115].mxu0  ;;  %v4274_v60 = vadd.f32 %v4273_v48, %v9488_v51 }
0x2a78   : > { %v4275_v4 = vsel %vm633_vm2, %v4274_v60, -inf }
0x2a79   : > { %4276 = vmax.xlane.f32.xlu0 %v4275_v4 }
0x2b06   : > { %v4277_v53 = vpop.xlane.xlu0 %4276 }
0x2b07   : > { %v4278_v47 = vsub.f32 %v4274_v60, %v4277_v53  ;;  %v4542_v53 = vrot.slane %v9803_v19, %v9200_v33 }
0x2b09   : > { %v4279_v54 = vmul.f32 1.442695, %v4278_v47 }
0x2b0b   : > { %8750 = vpow2.f32 %v4279_v54 }
0x2b15   : > { %v8751_v55 = vpop.eup %8750 }
0x2b16   : > { %v4281_v7 = vsel %vm633_vm2, %v8751_v55, 0.0 }
0x2b17   : > { %4282 = vadd.xlane.f32.xlu1 %v4281_v7 }
0x2ba4   : > { %v4283_v59 = vpop.xlane.xlu1 %4282 }
0x2ba5   : > { %8752 = vrcp.f32 %v4283_v59 }
0x2baf   : > { %v8753_v45 = vpop.eup %8752 }
0x2bb0   : > { %v4285_v1 = vmul.f32 %v8753_v45, %v8751_v55 }
0x2bb2   : > { %v4286_v25 = vpack.c.bf16 %v4285_v1, %v4285_v1 }
0x2bb4   : > { %8177 = vmatmul.mubr.msk.bf16.vlgmr.msra.gmra.mrb[128].mxu1 %vm633_vm2, %v4286_v25 }
0x2bb5   : > { %8187 = vmatpush3.bf16.msra.mxu1 %v4385_v3  ;;  %8188 = vmatprep.mubr.msk.bf16.mxu1 %vm8856_vm1, %v8855_v9 }
0x2bb6   : > { %8200 = vmatprep.subr.bf16.mxu1 %v8855_v9 }
0x2bbc   : > { %8189 = vmatmul.mubr.msk.bf16.vlgmr.msra.gmra.mrb[132].mxu1 %vm633_vm2, %v4056_v61 }
0x2bbd   : > { %8201 = vmatpush3.bf16.msra.mxu1 %v8622_v5  ;;  %8204 = vmatprep.mubr.msk.bf16.mxu1 %vm8856_vm1, %v8855_v9 }
0x2bbe   : > { %8202 = vmatprep.subr.bf16.mxu1 %v8855_v9 }
0x2bc1   : > { %8203 = vmatpush3.bf16.msra.mxu1 %v8623_v6 }
0x2bc2   : > { %8216 = vmatprep.subr.bf16.mxu1 %v8855_v9 }
0x2bc4   : > { %8205 = vmatmul.mubr.msk.bf16.vlgmr.msra.gmra.mrb[136].mxu1 %vm410_vm0, %v9766_v63 }
0x2bc5   : > { %8218 = vmatprep.mubr.msk.bf16.mxu1 %vm8856_vm1, %v8855_v9 }
0x2c87   : > { %v4328_v42 = vpop.f32.mrb[128].mxu1 }
0x2c88   : > { %v4334_v24 = vpack.c.bf16 %v4328_v42, %v4328_v42  ;;  %v8178_v10 = vpop.f32.mrb[129].mxu1 }
0x2c89   : > { %v4331_v28 = vpop.f32.mrb[130].mxu1 }
0x2c8a   : > { %v8179_v31 = vpop.f32.mrb[131].mxu1  ;;  %8183 = vmatmul.mubr.msk.bf16.vlgmr.msra.gmra.mrb[116].mxu0 %vm633_vm2, %v4334_v24  ;;  %v7206_v28 = vld [vmem:[%s10486_s6 + $0x28] sm:$0xf] }
0x2c8b   : > { %8193 = vmatpush3.bf16.msra.mxu0 %v8624_v8  ;;  %8196 = vmatprep.mubr.msk.bf16.mxu0 %vm8856_vm1, %v8855_v9  ;;  %v4709_v31 = vsel %vm1047_vm4, %v7206_v28, 0 }
0x2c8c   : > { %8194 = vmatprep.subr.bf16.mxu0 %v8855_v9 }
0x2c8f   : > { %v4421_v13 = vpop.f32.mrb[132].mxu1  ;;  %8195 = vmatpush3.bf16.msra.mxu0 %v8625_v14 }
0x2c90   : > { %v8190_v16 = vpop.f32.mrb[133].mxu1  ;;  %8208 = vmatprep.subr.bf16.mxu0 %v8855_v9 }
0x2c91   : > { %v4424_v17 = vpop.f32.mrb[134].mxu1  ;;  %v8628_v16 = vld [vmem:[%s10485_s5 + $0x1b0] sm:$0xff]  }
0x2c92   : > { %v8191_v18 = vpop.f32.mrb[135].mxu1  ;;  %8197 = vmatmul.mubr.msk.bf16.vlgmr.msra.gmra.mrb[120].mxu0 %vm410_vm0, %v9766_v63 }
0x2c93   : > { %8209 = vmatpush3.bf16.msra.mxu0 %v8626_v15  ;;  %8212 = vmatprep.mubr.msk.bf16.mxu0 %vm8856_vm1, %v8855_v9  ;;  %v8629_v18 = vld [vmem:[%s10485_s5 + $0x1b8] sm:$0xff]  }
0x2c94   : > { %8210 = vmatprep.subr.bf16.mxu0 %v8855_v9 }
0x2c97   : > { %v4533_v23 = vpop.f32.mrb[136].mxu1  ;;  %8211 = vmatpush3.bf16.msra.mxu0 %v8627_v21  ;;  %v8630_v21 = vld [vmem:[%s10485_s5 + $0x230] sm:$0xff]  }
0x2c98   : > { %v4534_v26 = vadd.f32 %v4533_v23, %v4486_v22  ;;  %v8206_v27 = vpop.f32.mrb[137].mxu1  ;;  %8222 = vmatprep.subr.bf16.mxu0 %v8855_v9  ;;  %v8631_v22 = vld [vmem:[%s10485_s5 + $0x238] sm:$0xff]  }
0x2c99   : > { %v4536_v32 = vpop.f32.mrb[138].mxu1 }
0x2c9a   : > { %v4596_v35 = vpack.c.bf16 %v4534_v26, %v4534_v26  ;;  %v8207_v36 = vpop.f32.mrb[139].mxu1  ;;  %8213 = vmatmul.mubr.msk.bf16.vlgmr.msra.gmra.mrb[124].mxu0 %vm410_vm0, %v9766_v63  ;;  %v8632_v26 = vld [vmem:[%s10485_s5 + $0x1f0] sm:$0xff]  }
0x2c9b   : > { %8224 = vmatprep.mubr.msk.bf16.mxu0 %vm8856_vm1, %v8855_v9 }
0x2c9c   : > { %v4601_v37 = vsel %vm633_vm2, %v4596_v35, 0 }
0x2c9d   : > { %8217 = vmatpush3.bf16.xpose.msra.mxu1 %v4601_v37  ;;  %v8633_v37 = vld [vmem:[%s10485_s5 + $0x1f8] sm:$0xff]  }
0x2c9e   : > { %8228 = vmatprep.subr.bf16.mxu1 %v8855_v9 }
0x2d5d   : > { %v4375_v39 = vpop.f32.mrb[116].mxu0 }
0x2d5e   : > { %v9933_v40 = vadd.f32 %v4421_v13, %v4375_v39  ;;  %v8184_v41 = vpop.f32.mrb[117].mxu0 }
0x2d5f   : > { %v4378_v43 = vpop.f32.mrb[118].mxu0 }
0x2d60   : > { %v8185_v44 = vpop.f32.mrb[119].mxu0 }
0x2d65   : > { %v4477_v48 = vpop.f32.mrb[120].mxu0 }
0x2d66   : > { %v4478_v50 = vadd.f32 %v4477_v48, %v4430_v46  ;;  %v8198_v30 = vpop.f32.mrb[121].mxu0  ;;  %v4867_v46 = vrot.slane %v9803_v19, %v9250_v38  ;;  %v4811_v19 = vrot.slane %v9796_v49, %v9276_v0 }
0x2d67   : > { %v4480_v52 = vpop.f32.mrb[122].mxu0 }
0x2d68   : > { %v4595_v60 = vpack.c.bf16 %v4478_v50, %v4478_v50  ;;  %v8199_v4 = vpop.f32.mrb[123].mxu0 }
0x2d6a   : > { %8219 = vmatmul.mubr.msk.bf16.vlgmr.msra.gmra.mrb[140].mxu1 %vm633_vm2, %v4595_v60 }
0x2d6b   : > { %8230 = vmatprep.mubr.msk.bf16.mxu1 %vm8856_vm1, %v8855_v9  ;;  %8229 = vmatpush3.bf16.msra.mxu1 %v4709_v31 }
0x2d6c   : > { %8242 = vmatprep.subr.bf16.mxu1 %v8855_v9 }
0x2d6d   : > { %v4589_v47 = vpop.f32.mrb[124].mxu0 }
0x2d6e   : > { %v4590_v54 = vadd.f32 %v4589_v47, %v4542_v53  ;;  %v8214_v55 = vpop.f32.mrb[125].mxu0 }
0x2d6f   : > { %v4592_v7 = vpop.f32.mrb[126].mxu0 }
0x2d70   : > { %v4657_v56 = vpack.c.bf16 %v4590_v54, %v4590_v54  ;;  %v8215_v58 = vpop.f32.mrb[127].mxu0 }
0x2d72   : > { %v4662_v59 = vsel %vm1047_vm4, %v4657_v56, 0 }
0x2d73   : > { %8223 = vmatpush3.bf16.msra.mxu0 %v4662_v59 }
0x2d74   : > { %8234 = vmatprep.subr.bf16.mxu0 %v8855_v9 }
0x2e3d   : > { %v4637_v45 = vpop.f32.mrb[140].mxu1 }
0x2e3e   : > { %v4643_v62 = vmul.f32 0.35355338, %v4637_v45  ;;  %v8220_v1 = vpop.f32.mrb[141].mxu1 }
0x2e3f   : > { %v4640_v25 = vpop.f32.mrb[142].mxu1 }
0x2e40   : > { %v8221_v3 = vpop.f32.mrb[143].mxu1  ;;  %v4644_v5 = vadd.f32 %v4643_v62, %v9488_v51  ;;  %v4755_v62 = vrot.slane %v9796_v49, %v9250_v38 }
0x2e42   : > { %v4645_v61 = vsel %vm633_vm2, %v4644_v5, -inf }
0x2e43   : > { %4646 = vmax.xlane.f32.xlu0 %v4645_v61 }
0x2ed0   : > { %v4647_v6 = vpop.xlane.xlu0 %4646 }
0x2ed1   : > { %v4648_v42 = vsub.f32 %v4644_v5, %v4647_v6 }
0x2ed3   : > { %v4649_v8 = vmul.f32 1.442695, %v4648_v42 }
0x2ed5   : > { %8754 = vpow2.f32 %v4649_v8 }
0x2edf   : > { %v8755_v24 = vpop.eup %8754 }
0x2ee0   : > { %v4651_v10 = vsel %vm633_vm2, %v8755_v24, 0.0 }
0x2ee1   : > { %4652 = vadd.xlane.f32.xlu1 %v4651_v10 }
0x2f6e   : > { %v4653_v14 = vpop.xlane.xlu1 %4652 }
0x2f6f   : > { %8756 = vrcp.f32 %v4653_v14 }
0x2f79   : > { %v8757_v13 = vpop.eup %8756 }
0x2f7a   : > { %v4655_v15 = vmul.f32 %v8757_v13, %v8755_v24 }
0x2f7c   : > { %v4656_v17 = vpack.c.bf16 %v4655_v15, %v4655_v15 }
0x2f7e   : > { %8225 = vmatmul.mubr.msk.bf16.vlgmr.msra.gmra.mrb[128].mxu0 %vm633_vm2, %v4656_v17 }
0x2f7f   : > { %8235 = vmatpush3.bf16.msra.mxu0 %v8628_v16  ;;  %8238 = vmatprep.mubr.msk.bf16.mxu0 %vm8856_vm1, %v8855_v9  ;;  %v7207_v16 = vld [vmem:[%s10486_s6 + $0x2c] sm:$0xf] }
0x2f80   : > { %8236 = vmatprep.subr.bf16.mxu0 %v8855_v9  ;;  %v5034_v17 = vsel %vm1047_vm4, %v7207_v16, 0 }
0x2f83   : > { %8237 = vmatpush3.bf16.msra.mxu0 %v8629_v18 }
0x2f84   : > { %8250 = vmatprep.subr.bf16.mxu0 %v8855_v9 }
0x2f86   : > { %8239 = vmatmul.mubr.msk.bf16.vlgmr.msra.gmra.mrb[132].mxu0 %vm410_vm0, %v9766_v63 }
0x2f87   : > { %8251 = vmatpush3.bf16.msra.mxu0 %v8630_v21  ;;  %8254 = vmatprep.mubr.msk.bf16.mxu0 %vm8856_vm1, %v8855_v9 }
0x2f88   : > { %8252 = vmatprep.subr.bf16.mxu0 %v8855_v9 }
0x2f8b   : > { %8253 = vmatpush3.bf16.msra.mxu0 %v8631_v22 }
0x2f8c   : > { %8264 = vmatprep.subr.bf16.mxu0 %v8855_v9 }
0x2f8e   : > { %8255 = vmatmul.mubr.msk.bf16.vlgmr.msra.gmra.mrb[136].mxu0 %vm410_vm0, %v9766_v63 }
0x2f8f   : > { %8266 = vmatprep.mubr.msk.bf16.mxu0 %vm8856_vm1, %v8855_v9 }
0x3051   : > { %v4698_v23 = vpop.f32.mrb[128].mxu0 }
0x3052   : > { %v4704_v27 = vpack.c.bf16 %v4698_v23, %v4698_v23  ;;  %v8226_v32 = vpop.f32.mrb[129].mxu0 }
0x3053   : > { %v4701_v35 = vpop.f32.mrb[130].mxu0 }
0x3054   : > { %v8227_v36 = vpop.f32.mrb[131].mxu0  ;;  %8231 = vmatmul.mubr.msk.bf16.vlgmr.msra.gmra.mrb[144].mxu1 %vm633_vm2, %v4704_v27 }
0x3055   : > { %8243 = vmatpush3.bf16.msra.mxu1 %v8632_v26  ;;  %8246 = vmatprep.mubr.msk.bf16.mxu1 %vm8856_vm1, %v8855_v9 }
0x3056   : > { %8244 = vmatprep.subr.bf16.mxu1 %v8855_v9 }
0x3059   : > { %v4802_v39 = vpop.f32.mrb[132].mxu0  ;;  %8245 = vmatpush3.bf16.msra.mxu1 %v8633_v37 }
0x305a   : > { %v8240_v41 = vpop.f32.mrb[133].mxu0  ;;  %8258 = vmatprep.subr.bf16.mxu1 %v8855_v9  ;;  %v4803_v5 = vadd.f32 %v4802_v39, %v4755_v62 }
0x305b   : > { %v4805_v43 = vpop.f32.mrb[134].mxu0  ;;  %v5081_v41 = vrot.slane %v9756_v20, %v9042_v57 }
0x305c   : > { %v8241_v44 = vpop.f32.mrb[135].mxu0  ;;  %8247 = vmatmul.mubr.msk.bf16.vlgmr.msra.gmra.mrb[148].mxu1 %vm410_vm0, %v9766_v63 }
0x305d   : > { %8260 = vmatprep.mubr.msk.bf16.mxu1 %vm8856_vm1, %v8855_v9 }
0x3061   : > { %v4914_v48 = vpop.f32.mrb[136].mxu0 }
0x3062   : > { %v4915_v50 = vadd.f32 %v4914_v48, %v4867_v46  ;;  %v8256_v30 = vpop.f32.mrb[137].mxu0 }
0x3063   : > { %v4917_v52 = vpop.f32.mrb[138].mxu0 }
0x3064   : > { %v4982_v60 = vpack.c.bf16 %v4915_v50, %v4915_v50  ;;  %v8257_v4 = vpop.f32.mrb[139].mxu0 }
0x3065   : > { %v8634_v4 = vld [vmem:[%s10487_s7 + $0x20] sm:$0xff]  }
0x3066   : > { %v4987_v53 = vsel %vm1047_vm4, %v4982_v60, 0 }
0x3067   : > { %8265 = vmatpush3.bf16.msra.mxu0 %v4987_v53 }
0x3068   : > { %8276 = vmatprep.subr.bf16.mxu0 %v8855_v9 }
0x3127   : > { %v4745_v47 = vpop.f32.mrb[144].mxu1 }
0x3128   : > { %v4751_v63 = vadd.f32 %v4745_v47, %v9933_v40  ;;  %v8232_v54 = vpop.f32.mrb[145].mxu1  ;;  %v4920_v40 = vpack.c.bf16 %v4803_v5, %v4803_v5 }
0x3129   : > { %v4748_v55 = vpop.f32.mrb[146].mxu1 }
0x312a   : > { %v8233_v7 = vpop.f32.mrb[147].mxu1 }
0x312f   : > { %v4858_v56 = vpop.f32.mrb[148].mxu1 }
0x3130   : > { %v4859_v58 = vadd.f32 %v4858_v56, %v4811_v19  ;;  %v8248_v59 = vpop.f32.mrb[149].mxu1 }
0x3131   : > { %v4861_v45 = vpop.f32.mrb[150].mxu1  ;;  %v5102_v59 = vrot.slane %v9756_v20, %v9200_v33 }
0x3132   : > { %v4921_v1 = vpack.c.bf16 %v4859_v58, %v4859_v58  ;;  %v8249_v25 = vpop.f32.mrb[151].mxu1 }
0x3134   : > { %v4926_v3 = vsel %vm633_vm2, %v4921_v1, 0  ;;  %v5107_v1 = vrot.slane %v9756_v20, %v9250_v38 }
0x3135   : > { %8259 = vmatpush3.bf16.xpose.msra.mxu1 %v4926_v3 }
0x3136   : > { %8270 = vmatprep.subr.bf16.mxu1 %v8855_v9 }
0x313c   : > { %8261 = vmatmul.mubr.msk.bf16.vlgmr.msra.gmra.mrb[152].mxu1 %vm633_vm2, %v4920_v40  ;;  %v8636_v40 = vld [vmem:[%s10488_s8 + $0x80] sm:$0xff]  }
0x313d   : > { %8272 = vmatprep.mubr.msk.bf16.mxu1 %vm8856_vm1, %v8855_v9  ;;  %8271 = vmatpush3.bf16.msra.mxu1 %v5034_v17 }
0x313e   : > { %8284 = vmatprep.subr.bf16.mxu1 %v8855_v9 }
0x320f   : > { %v4962_v61 = vpop.f32.mrb[152].mxu1 }
0x3210   : > { %v4968_v6 = vmul.f32 0.35355338, %v4962_v61  ;;  %v8262_v42 = vpop.f32.mrb[153].mxu1  ;;  %v8637_v61 = vld [vmem:[%s10488_s8 + $0x88] sm:$0xff]  }
0x3211   : > { %v4965_v8 = vpop.f32.mrb[154].mxu1  ;;  %v8639_v42 = vld [vmem:[%s10488_s8 + $0x98] sm:$0xff]  }
0x3212   : > { %v8263_v24 = vpop.f32.mrb[155].mxu1  ;;  %v4969_v49 = vadd.f32 %v4968_v6, %v9488_v51  ;;  %v8638_v6 = vld [vmem:[%s10488_s8 + $0x90] sm:$0xff]   ;;  %v8640_v8 = vld [vmem:[%s10488_s8 + $0xa0] sm:$0xff]  }
0x3213   : > { %v8641_v24 = vld [vmem:[%s10488_s8 + $0xa8] sm:$0xff]  }
0x3214   : > { %v4970_v10 = vsel %vm633_vm2, %v4969_v49, -inf }
0x3215   : > { %4971 = vmax.xlane.f32.xlu0 %v4970_v10  ;;  %v8643_v10 = vld [vmem:[%s10488_s8 + $0xb8] sm:$0xff]  }
0x32a2   : > { %v4972_v28 = vpop.xlane.xlu0 %4971 }
0x32a3   : > { %v4973_v31 = vsub.f32 %v4969_v49, %v4972_v28  ;;  %v8642_v49 = vld [vmem:[%s10488_s8 + $0xb0] sm:$0xff]   ;;  %v7276_v28 = vld [vmem:[%s10484_s4 + $0x2] ss:$0 sm:$0xff] }
0x32a5   : > { %v4974_v14 = vmul.f32 1.442695, %v4973_v31 }
0x32a7   : > { %8758 = vpow2.f32 %v4974_v14 }
0x32b1   : > { %v8759_v13 = vpop.eup %8758 }
0x32b2   : > { %v4976_v15 = vsel %vm633_vm2, %v8759_v13, 0.0 }
0x32b3   : > { %4977 = vadd.xlane.f32.xlu1 %v4976_v15 }
0x3340   : > { %v4978_v18 = vpop.xlane.xlu1 %4977 }
0x3341   : > { %8760 = vrcp.f32 %v4978_v18 }
0x334b   : > { %v8761_v21 = vpop.eup %8760 }
0x334c   : > { %v4980_v22 = vmul.f32 %v8761_v21, %v8759_v13 }
0x334e   : > { %v4981_v23 = vpack.c.bf16 %v4980_v22, %v4980_v22 }
0x3350   : > { %8267 = vmatmul.mubr.msk.bf16.vlgmr.msra.gmra.mrb[140].mxu0 %vm633_vm2, %v4981_v23 }
0x3351   : > { %8280 = vmatprep.mubr.msk.bf16.mxu0 %vm8856_vm1, %v8855_v9  ;;  %8277 = vmatpush3.bf16.msra.mxu0 %v8634_v4 }
0x3352   : > { %8278 = vmatprep.subr.bf16.mxu0 %v8855_v9 }
0x3423   : > { %v5023_v26 = vpop.f32.mrb[140].mxu0 }
0x3424   : > { %v5029_v27 = vpack.c.bf16 %v5023_v26, %v5023_v26  ;;  %v8268_v32 = vpop.f32.mrb[141].mxu0 }
0x3425   : > { %v5026_v35 = vpop.f32.mrb[142].mxu0 }
0x3426   : > { %v8269_v36 = vpop.f32.mrb[143].mxu0  ;;  %8273 = vmatmul.mubr.msk.bf16.vlgmr.msra.gmra.mrb[156].mxu1 %vm633_vm2, %v5029_v27 }
0x3427   : > { %8300 = vmatprep.mubr.msk.bf16.mxu1 %vm8856_vm1, %v8855_v9  ;;  %8285 = vmatpush3.bf16.msra.mxu1 %v8636_v40  ;;  %v8647_v40 = vld [vmem:[%s10485_s5 + $0x288] sm:$0xff]  }
0x3428   : > { %8286 = vmatprep.subr.bf16.mxu1 %v8855_v9 }
0x342b   : > { %8287 = vmatpush3.bf16.msra.mxu1 %v8637_v61  ;;  %v8648_v61 = vld [vmem:[%s10485_s5 + $0x2c0] sm:$0xff]  }
0x342c   : > { %8288 = vmatprep.subr.bf16.mxu1 %v8855_v9 }
0x342f   : > { %8289 = vmatpush3.bf16.msra.mxu1 %v8638_v6  ;;  %v8649_v6 = vld [vmem:[%s10485_s5 + $0x2c8] sm:$0xff]  }
0x3430   : > { %8290 = vmatprep.subr.bf16.mxu1 %v8855_v9 }
0x3433   : > { %8291 = vmatpush3.bf16.msra.mxu1 %v8639_v42 }
0x3434   : > { %8292 = vmatprep.subr.bf16.mxu1 %v8855_v9 }
0x3437   : > { %8293 = vmatpush3.bf16.msra.mxu1 %v8640_v8 }
0x3438   : > { %8294 = vmatprep.subr.bf16.mxu1 %v8855_v9 }
0x343b   : > { %8295 = vmatpush3.bf16.msra.mxu1 %v8641_v24 }
0x343c   : > { %8296 = vmatprep.subr.bf16.mxu1 %v8855_v9 }
0x343f   : > { %8297 = vmatpush3.bf16.msra.mxu1 %v8642_v49 }
0x3440   : > { %8298 = vmatprep.subr.bf16.mxu1 %v8855_v9 }
0x3443   : > { %8299 = vmatpush3.bf16.msra.mxu1 %v8643_v10  ;;  %v10146_v10 = vld [vmem:[%s10483_s3 + $0x30] sm:$0xff] }
0x3444   : > { %8334 = vmatprep.subr.bf16.mxu1 %v8855_v9 }
0x34f9   : > { %v5070_v37 = vpop.f32.mrb[156].mxu1 }
0x34fa   : > { %v5076_v39 = vadd.f32 %v5070_v37, %v4751_v63  ;;  %v8274_v43 = vpop.f32.mrb[157].mxu1  ;;  %v5182_v37 = vrot.slane %v9756_v20, %v9120_v12  ;;  %v8644_v20 = vld [vmem:[%s10485_s5 + $0x240] sm:$0xff]  }
0x34fb   : > { %v5073_v44 = vpop.f32.mrb[158].mxu1 }
0x34fc   : > { %v5077_v46 = vadd.f32 %v5076_v39, %v9738_v2  ;;  %v8275_v48 = vpop.f32.mrb[159].mxu1  ;;  %v8635_v2 = vld [vmem:[%s10487_s7 + $0x28] sm:$0xff]  }
0x34fd   : > { %8279 = vmatpush3.bf16.msra.mxu0 %v8635_v2 }
0x34fe   : > { %v10025_v50 = vadd.f32 %v5081_v41, %v5077_v46  ;;  %8304 = vmatprep.subr.bf16.mxu0 %v8855_v9 }
0x3500   : > { %v5083_v30 = vsel %vm410_vm0, %v10025_v50, 0.0  ;;  %v5087_v52 = vmul.f32 %v10025_v50, %v10025_v50 }
0x3501   : > { %5084 = vadd.xlane.f32.xlu0 %v5083_v30 }
0x3502   : > { %v5088_v60 = vsel %vm410_vm0, %v5087_v52, 0.0 }
0x3503   : > { %5089 = vadd.xlane.f32.xlu1 %v5088_v60 }
0x358e   : > { %v5085_v53 = vpop.xlane.xlu0 %5084 }
0x358f   : > { %v5086_v47 = vmul.f32 0.03125, %v5085_v53 }
0x3590   : > { %v5090_v63 = vpop.xlane.xlu1 %5089 }
0x3591   : > { %v5092_v54 = vmul.f32 %v5086_v47, %v5086_v47  ;;  %v5091_v55 = vmul.f32 0.03125, %v5090_v63  ;;  %v5095_v58 = vsub.f32 %v10025_v50, %v5086_v47 }
0x3593   : > { %v5093_v7 = vsub.f32 %v5091_v55, %v5092_v54 }
0x3595   : > { %v5094_v19 = vmax.f32 %v5093_v7, 0.0 }
0x3597   : > { %v5096_v56 = vadd.f32 1e-05, %v5094_v19  ;;  %v10106_v19 = vld [vmem:[%s10482_s2 + $0x18] sm:$0xff] }
0x3599   : > { %8762 = vrsqrt.f32 %v5096_v56 }
0x35a3   : > { %v8763_v45 = vpop.eup %8762 }
0x35a4   : > { %v5098_v62 = vmul.f32 %v8763_v45, %v5095_v58  ;;  %v5373_v58 = vrot.slane %v10106_v19, %v8990_v29  ;;  %v5378_v45 = vrot.slane %v10106_v19, %v9000_v34 }
0x35a6   : > { %v5103_v25 = vmul.f32 %v5102_v59, %v5098_v62 }
0x35a8   : > { %v5108_v3 = vadd.f32 %v5107_v1, %v5103_v25 }
0x35aa   : > { %v5109_v5 = vpack.c.bf16 %v5108_v3, %v5108_v3  ;;  %v8646_v3 = vld [vmem:[%s10485_s5 + $0x280] sm:$0xff]  }
0x35ac   : > { %8281 = vmatmul.mubr.msk.bf16.vlgmr.msra.gmra.mrb[144].mxu0 %vm410_vm0, %v5109_v5 }
0x35ad   : > { %8308 = vmatprep.mubr.msk.bf16.mxu0 %vm8856_vm1, %v8855_v9  ;;  %8305 = vmatpush3.bf16.msra.mxu0 %v8644_v20 }
0x35ae   : > { %8306 = vmatprep.subr.bf16.mxu0 %v8855_v9 }
0x367f   : > { %v5163_v31 = vpop.f32.mrb[144].mxu0 }
0x3680   : > { %v5164_v14 = vadd.f32 %v7276_v28, %v5163_v31  ;;  %v8282_v13 = vpop.f32.mrb[145].mxu0  ;;  %v5443_v28 = vrot.slane %v10146_v10, %v9042_v57 }
0x3681   : > { %v5166_v15 = vpop.f32.mrb[146].mxu0 }
0x3682   : > { %v5169_v16 = vmul.f32 %v5164_v14, %v5164_v14  ;;  %v8283_v17 = vpop.f32.mrb[147].mxu0 }
0x3683   : > { %v5384_v17 = vrot.slane %v10146_v10, %v8990_v29 }
0x3684   : > { %v5170_v18 = vmul.f32 %v5169_v16, %v5164_v14  ;;  %v10153_v16 = vld [vmem:[%s10483_s3 + $0x38] sm:$0xf] }
0x3686   : > { %v5171_v21 = vmul.f32 0.044715, %v5170_v18 }
0x3688   : > { %v5172_v22 = vadd.f32 %v5171_v21, %v5164_v14 }
0x368a   : > { %v5173_v23 = vmul.f32 0.7978846, %v5172_v22 }
0x368c   : > { %8764 = vtanh.f32 %v5173_v23  ;;  %v5499_v23 = vrot.slane %v10153_v16, %v8990_v29  ;;  %v8651_v29 = vld [vmem:[%s10485_s5 + $0x258] sm:$0xff]  }
0x3696   : > { %v8765_v26 = vpop.eup %8764 }
0x3697   : > { %v5175_v27 = vadd.f32 1.0, %v8765_v26 }
0x3699   : > { %v5176_v32 = vmul.f32 0.5, %v5175_v27 }
0x369b   : > { %v5177_v35 = vmul.f32 %v5176_v32, %v5164_v14 }
0x369d   : > { %v5178_v36 = vpack.c.bf16 %v5177_v35, %v5177_v35 }
0x369f   : > { %8301 = vmatmul.mubr.bf16.vlgmr.msra.gmra.mrb[160].mxu1 %v5178_v36 }
0x36a0   : > { %8336 = vmatprep.mubr.msk.bf16.mxu1 %vm8856_vm1, %v8855_v9 }
0x3772   : > { %v5265_v39 = vpop.f32.mrb[160].mxu1 }
0x3773   : > { %v5266_v41 = vadd.f32 %v5265_v39, %v5182_v37  ;;  %v8302_v43 = vpop.f32.mrb[161].mxu1  ;;  %v8650_v37 = vld [vmem:[%s10485_s5 + $0x250] sm:$0xff]  }
0x3774   : > { %v5268_v44 = vpop.f32.mrb[162].mxu1 }
0x3775   : > { %v10088_v46 = vadd.f32 %v5266_v41, %v10025_v50  ;;  %v8303_v48 = vpop.f32.mrb[163].mxu1  ;;  %v8645_v50 = vld [vmem:[%s10485_s5 + $0x248] sm:$0xff]  }
0x3776   : > { %8307 = vmatpush3.bf16.msra.mxu0 %v8645_v50  ;;  %v8652_v48 = vld [vmem:[%s10485_s5 + $0x2d0] sm:$0xff]  }
0x3777   : > { %v5354_v30 = vsel %vm410_vm0, %v10088_v46, 0.0  ;;  %v5358_v52 = vmul.f32 %v10088_v46, %v10088_v46  ;;  %8312 = vmatprep.subr.bf16.mxu0 %v8855_v9 }
0x3778   : > { %5355 = vadd.xlane.f32.xlu0 %v5354_v30  ;;  %v8653_v30 = vld [vmem:[%s10485_s5 + $0x2d8] sm:$0xff]  }
0x3779   : > { %v5359_v60 = vsel %vm410_vm0, %v5358_v52, 0.0 }
0x377a   : > { %5360 = vadd.xlane.f32.xlu1 %v5359_v60 }
0x3805   : > { %v5356_v4 = vpop.xlane.xlu0 %5355 }
0x3806   : > { %v5357_v2 = vmul.f32 0.03125, %v5356_v4 }
0x3807   : > { %v5361_v53 = vpop.xlane.xlu1 %5360 }
0x3808   : > { %v5363_v47 = vmul.f32 %v5357_v2, %v5357_v2  ;;  %v5362_v63 = vmul.f32 0.03125, %v5361_v53  ;;  %v5366_v56 = vsub.f32 %v10088_v46, %v5357_v2 }
0x380a   : > { %v5364_v54 = vsub.f32 %v5362_v63, %v5363_v47 }
0x380c   : > { %v5365_v55 = vmax.f32 %v5364_v54, 0.0 }
0x380e   : > { %v5367_v7 = vadd.f32 1e-05, %v5365_v55 }
0x3810   : > { %8766 = vrsqrt.f32 %v5367_v7  ;;  %v5777_v7 = vrot.slane %v10153_v16, %v9000_v34 }
0x381a   : > { %v8767_v59 = vpop.eup %8766 }
0x381b   : > { %v5369_v62 = vmul.f32 %v8767_v59, %v5366_v56 }
0x381d   : > { %v5374_v1 = vmul.f32 %v5373_v58, %v5369_v62 }
0x381f   : > { %v5379_v25 = vadd.f32 %v5378_v45, %v5374_v1 }
0x3821   : > { %v10116_v5 = vpack.c.bf16 %v5379_v25, %v5379_v25 }
0x3823   : > { %8309 = vmatmul.mubr.msk.bf16.vlgmr.msra.gmra.mrb[148].mxu0 %vm410_vm0, %v10116_v5 }
0x3824   : > { %8313 = vmatpush3.bf16.msra.mxu0 %v8646_v3  ;;  %8316 = vmatprep.mubr.msk.bf16.mxu0 %vm8856_vm1, %v8855_v9 }
0x3825   : > { %8314 = vmatprep.subr.bf16.mxu0 %v8855_v9 }
0x3828   : > { %8315 = vmatpush3.bf16.msra.mxu0 %v8647_v40 }
0x3829   : > { %8320 = vmatprep.subr.bf16.mxu0 %v8855_v9 }
0x382b   : > { %8317 = vmatmul.mubr.msk.bf16.vlgmr.msra.gmra.mrb[152].mxu0 %vm410_vm0, %v10116_v5 }
0x382c   : > { %8321 = vmatpush3.bf16.msra.mxu0 %v8648_v61  ;;  %8324 = vmatprep.mubr.msk.bf16.mxu0 %vm8856_vm1, %v8855_v9 }
0x382d   : > { %8322 = vmatprep.subr.bf16.mxu0 %v8855_v9 }
0x3830   : > { %8323 = vmatpush3.bf16.msra.mxu0 %v8649_v6 }
0x3831   : > { %8328 = vmatprep.subr.bf16.mxu0 %v8855_v9 }
0x3833   : > { %8325 = vmatmul.mubr.msk.bf16.vlgmr.msra.gmra.mrb[156].mxu0 %vm410_vm0, %v10116_v5 }
0x3834   : > { %8330 = vmatprep.mubr.msk.bf16.mxu0 %vm8856_vm1, %v8855_v9 }
0x38f6   : > { %v5434_v42 = vpop.f32.mrb[148].mxu0 }
0x38f7   : > { %v8310_v8 = vpop.f32.mrb[149].mxu0  ;;  %v5435_v26 = vadd.f32 %v5434_v42, %v5384_v17 }
0x38f8   : > { %v5437_v24 = vpop.f32.mrb[150].mxu0 }
0x38f9   : > { %v8311_v49 = vpop.f32.mrb[151].mxu0  ;;  %v5552_v39 = vpack.c.bf16 %v5435_v26, %v5435_v26 }
0x38fe   : > { %v5490_v31 = vpop.f32.mrb[152].mxu0 }
0x38ff   : > { %v5491_v14 = vadd.f32 %v5490_v31, %v5443_v28  ;;  %v8318_v13 = vpop.f32.mrb[153].mxu0  ;;  %v8654_v28 = vld [vmem:[%s10485_s5 + $0x290] sm:$0xff]  }
0x3900   : > { %v5493_v15 = vpop.f32.mrb[154].mxu0 }
0x3901   : > { %v5553_v18 = vpack.c.bf16 %v5491_v14, %v5491_v14  ;;  %v8319_v21 = vpop.f32.mrb[155].mxu0  ;;  %v8655_v14 = vld [vmem:[%s10485_s5 + $0x298] sm:$0xff]  }
0x3902   : > { %v5721_v21 = vrot.slane %v10146_v10, %v9120_v12 }
0x3903   : > { %v5558_v22 = vsel %vm633_vm2, %v5553_v18, 0 }
0x3904   : > { %8329 = vmatpush3.bf16.xpose.msra.mxu0 %v5558_v22 }
0x3905   : > { %8340 = vmatprep.subr.bf16.mxu0 %v8855_v9 }
0x3906   : > { %v5546_v27 = vpop.f32.mrb[156].mxu0 }
0x3907   : > { %v5547_v32 = vadd.f32 %v5546_v27, %v5499_v23  ;;  %v8326_v35 = vpop.f32.mrb[157].mxu0 }
0x3908   : > { %v5549_v36 = vpop.f32.mrb[158].mxu0 }
0x3909   : > { %v5614_v41 = vpack.c.bf16 %v5547_v32, %v5547_v32  ;;  %v8327_v43 = vpop.f32.mrb[159].mxu0  ;;  %v5665_v32 = vrot.slane %v10146_v10, %v9000_v34 }
0x390b   : > { %v5619_v44 = vsel %vm1047_vm4, %v5614_v41, 0  ;;  %8331 = vmatmul.mubr.msk.bf16.vlgmr.msra.gmra.mrb[160].mxu0 %vm633_vm2, %v5552_v39 }
0x390c   : > { %8335 = vmatpush3.bf16.msra.mxu1 %v5619_v44  ;;  %8341 = vmatpush3.bf16.msra.mxu0 %v8650_v37 }
0x390d   : > { %8342 = vmatprep.subr.bf16.mxu0 %v8855_v9  ;;  %8344 = vmatprep.mubr.msk.bf16.mxu0 %vm8856_vm1, %v8855_v9 }
0x390e   : > { %8348 = vmatprep.subr.bf16.mxu1 %v8855_v9 }
0x3910   : > { %8343 = vmatpush3.bf16.msra.mxu0 %v8651_v29 }
0x3911   : > { %8356 = vmatprep.subr.bf16.mxu0 %v8855_v9 }
0x3913   : > { %8345 = vmatmul.mubr.msk.bf16.vlgmr.msra.gmra.mrb[164].mxu0 %vm410_vm0, %v10116_v5 }
0x3914   : > { %8357 = vmatpush3.bf16.msra.mxu0 %v8652_v48  ;;  %8360 = vmatprep.mubr.msk.bf16.mxu0 %vm8856_vm1, %v8855_v9 }
0x3915   : > { %8358 = vmatprep.subr.bf16.mxu0 %v8855_v9 }
0x3918   : > { %8359 = vmatpush3.bf16.msra.mxu0 %v8653_v30 }
0x3919   : > { %8370 = vmatprep.subr.bf16.mxu0 %v8855_v9 }
0x391b   : > { %8361 = vmatmul.mubr.msk.bf16.vlgmr.msra.gmra.mrb[168].mxu0 %vm410_vm0, %v10116_v5 }
0x391c   : > { %8372 = vmatprep.mubr.msk.bf16.mxu0 %vm8856_vm1, %v8855_v9 }
0x39de   : > { %v5594_v52 = vpop.f32.mrb[160].mxu0 }
0x39df   : > { %v5600_v60 = vmul.f32 0.35355338, %v5594_v52  ;;  %v8332_v20 = vpop.f32.mrb[161].mxu0 }
0x39e0   : > { %v5597_v50 = vpop.f32.mrb[162].mxu0 }
0x39e1   : > { %v8333_v4 = vpop.f32.mrb[163].mxu0  ;;  %v5601_v2 = vadd.f32 %v5600_v60, %v9488_v51 }
0x39e3   : > { %v5602_v53 = vsel %vm633_vm2, %v5601_v2, -inf }
0x39e4   : > { %5603 = vmax.xlane.f32.xlu0 %v5602_v53  ;;  %v7340_v53 = vld [vmem:[%s10486_s6 + $0x34] sm:$0xf] }
0x39e6   : > { %v5712_v47 = vpop.f32.mrb[164].mxu0 }
0x39e7   : > { %v8346_v63 = vpop.f32.mrb[165].mxu0  ;;  %v5713_v39 = vadd.f32 %v5712_v47, %v5665_v32  ;;  %v5944_v47 = vsel %vm1047_vm4, %v7340_v53, 0 }
0x39e8   : > { %v5715_v54 = vpop.f32.mrb[166].mxu0 }
0x39e9   : > { %v8347_v55 = vpop.f32.mrb[167].mxu0  ;;  %v5830_v41 = vpack.c.bf16 %v5713_v39, %v5713_v39 }
0x39ea   : > { %v7339_v55 = vld [vmem:[%s10486_s6 + $0x30] sm:$0xf] }
0x39ee   : > { %v5824_v56 = vpop.f32.mrb[168].mxu0 }
0x39ef   : > { %v5825_v58 = vadd.f32 %v5824_v56, %v5777_v7  ;;  %v8362_v59 = vpop.f32.mrb[169].mxu0 }
0x39f0   : > { %v5827_v45 = vpop.f32.mrb[170].mxu0  ;;  %v8656_v59 = vld [vmem:[%s10485_s5 + $0x2a0] sm:$0xff]  }
0x39f1   : > { %v5892_v62 = vpack.c.bf16 %v5825_v58, %v5825_v58  ;;  %v8363_v1 = vpop.f32.mrb[171].mxu0  ;;  %v5990_v58 = vsel %vm1047_vm4, %v7339_v55, 0 }
0x39f3   : > { %v5897_v25 = vsel %vm1047_vm4, %v5892_v62, 0  ;;  %v8657_v62 = vld [vmem:[%s10485_s5 + $0x2a8] sm:$0xff]  }
0x39f4   : > { %8371 = vmatpush3.bf16.msra.mxu0 %v5897_v25  ;;  %v8658_v25 = vld [vmem:[%s10485_s5 + $0x260] sm:$0xff]  }
0x39f5   : > { %8382 = vmatprep.subr.bf16.mxu0 %v8855_v9 }
0x3a71   : > { %v5604_v3 = vpop.xlane.xlu0 %5603 }
0x3a72   : > { %v5605_v40 = vsub.f32 %v5601_v2, %v5604_v3 }
0x3a74   : > { %v5606_v61 = vmul.f32 1.442695, %v5605_v40 }
0x3a76   : > { %8768 = vpow2.f32 %v5606_v61 }
0x3a80   : > { %v8769_v6 = vpop.eup %8768 }
0x3a81   : > { %v5608_v42 = vsel %vm633_vm2, %v8769_v6, 0.0 }
0x3a82   : > { %5609 = vadd.xlane.f32.xlu1 %v5608_v42  ;;  %v8659_v42 = vld [vmem:[%s10485_s5 + $0x268] sm:$0xff]  }
0x3b0f   : > { %v5610_v8 = vpop.xlane.xlu1 %5609 }
0x3b10   : > { %8770 = vrcp.f32 %v5610_v8 }
0x3b1a   : > { %v8771_v24 = vpop.eup %8770 }
0x3b1b   : > { %v5612_v49 = vmul.f32 %v8771_v24, %v8769_v6  ;;  %v8660_v24 = vld [vmem:[%s10485_s5 + $0x2e0] sm:$0xff]  }
0x3b1d   : > { %v5613_v31 = vpack.c.bf16 %v5612_v49, %v5612_v49 }
0x3b1f   : > { %8337 = vmatmul.mubr.msk.bf16.vlgmr.msra.gmra.mrb[164].mxu1 %vm633_vm2, %v5613_v31 }
0x3b20   : > { %8349 = vmatpush3.bf16.msra.mxu1 %v8654_v28  ;;  %8352 = vmatprep.mubr.msk.bf16.mxu1 %vm8856_vm1, %v8855_v9 }
0x3b21   : > { %8350 = vmatprep.subr.bf16.mxu1 %v8855_v9 }
0x3b24   : > { %8351 = vmatpush3.bf16.msra.mxu1 %v8655_v14  ;;  %v8661_v14 = vld [vmem:[%s10485_s5 + $0x2e8] sm:$0xff]  }
0x3b25   : > { %8364 = vmatprep.subr.bf16.mxu1 %v8855_v9 }
0x3b27   : > { %8353 = vmatmul.mubr.msk.bf16.vlgmr.msra.gmra.mrb[168].mxu1 %vm410_vm0, %v10116_v5 }
0x3b28   : > { %8366 = vmatprep.mubr.msk.bf16.mxu1 %vm8856_vm1, %v8855_v9 }
0x3bf2   : > { %v5655_v13 = vpop.f32.mrb[164].mxu1 }
0x3bf3   : > { %v8338_v15 = vpop.f32.mrb[165].mxu1  ;;  %v5661_v45 = vpack.c.bf16 %v5655_v13, %v5655_v13  ;;  %v6091_v13 = vrot.slane %v10146_v10, %v9176_v11 }
0x3bf4   : > { %v5658_v17 = vpop.f32.mrb[166].mxu1 }
0x3bf5   : > { %v8339_v18 = vpop.f32.mrb[167].mxu1 }
0x3bfa   : > { %v5768_v22 = vpop.f32.mrb[168].mxu1 }
0x3bfb   : > { %v5769_v23 = vadd.f32 %v5768_v22, %v5721_v21  ;;  %v8354_v26 = vpop.f32.mrb[169].mxu1 }
0x3bfc   : > { %v5771_v27 = vpop.f32.mrb[170].mxu1 }
0x3bfd   : > { %v5831_v35 = vpack.c.bf16 %v5769_v23, %v5769_v23  ;;  %v8355_v36 = vpop.f32.mrb[171].mxu1 }
0x3bff   : > { %v5836_v37 = vsel %vm633_vm2, %v5831_v35, 0 }
0x3c00   : > { %8365 = vmatpush3.bf16.xpose.msra.mxu1 %v5836_v37  ;;  %v6035_v37 = vrot.slane %v10146_v10, %v9200_v33 }
0x3c01   : > { %8376 = vmatprep.subr.bf16.mxu1 %v8855_v9 }
0x3c07   : > { %8367 = vmatmul.mubr.msk.bf16.vlgmr.msra.gmra.mrb[172].mxu1 %vm633_vm2, %v5830_v41 }
0x3c08   : > { %8378 = vmatprep.mubr.msk.bf16.mxu1 %vm8856_vm1, %v8855_v9  ;;  %8377 = vmatpush3.bf16.msra.mxu1 %v5944_v47 }
0x3c09   : > { %8388 = vmatprep.subr.bf16.mxu1 %v8855_v9 }
0x3cda   : > { %v5872_v43 = vpop.f32.mrb[172].mxu1 }
0x3cdb   : > { %v5878_v44 = vmul.f32 0.35355338, %v5872_v43  ;;  %v8368_v29 = vpop.f32.mrb[173].mxu1 }
0x3cdc   : > { %v5875_v48 = vpop.f32.mrb[174].mxu1 }
0x3cdd   : > { %v8369_v30 = vpop.f32.mrb[175].mxu1  ;;  %v5879_v34 = vadd.f32 %v5878_v44, %v9488_v51 }
0x3cde   : > { %v6147_v30 = vrot.slane %v10153_v16, %v9200_v33 }
0x3cdf   : > { %v5880_v52 = vsel %vm633_vm2, %v5879_v34, -inf }
0x3ce0   : > { %5881 = vmax.xlane.f32.xlu0 %v5880_v52 }
0x3d6d   : > { %v5882_v60 = vpop.xlane.xlu0 %5881 }
0x3d6e   : > { %v5883_v20 = vsub.f32 %v5879_v34, %v5882_v60 }
0x3d70   : > { %v5884_v50 = vmul.f32 1.442695, %v5883_v20 }
0x3d72   : > { %8772 = vpow2.f32 %v5884_v50 }
0x3d7c   : > { %v8773_v4 = vpop.eup %8772 }
0x3d7d   : > { %v5886_v2 = vsel %vm633_vm2, %v8773_v4, 0.0 }
0x3d7e   : > { %5887 = vadd.xlane.f32.xlu1 %v5886_v2 }
0x3e0b   : > { %v5888_v63 = vpop.xlane.xlu1 %5887 }
0x3e0c   : > { %8774 = vrcp.f32 %v5888_v63 }
0x3e16   : > { %v8775_v54 = vpop.eup %8774 }
0x3e17   : > { %v5890_v7 = vmul.f32 %v8775_v54, %v8773_v4 }
0x3e19   : > { %v5891_v56 = vpack.c.bf16 %v5890_v7, %v5890_v7 }
0x3e1b   : > { %8373 = vmatmul.mubr.msk.bf16.vlgmr.msra.gmra.mrb[172].mxu0 %vm633_vm2, %v5891_v56 }
0x3e1c   : > { %8383 = vmatpush3.bf16.msra.mxu0 %v5990_v58  ;;  %8384 = vmatprep.mubr.msk.bf16.mxu0 %vm8856_vm1, %v8855_v9 }
0x3e1d   : > { %8396 = vmatprep.subr.bf16.mxu0 %v8855_v9 }
0x3e23   : > { %8385 = vmatmul.mubr.msk.bf16.vlgmr.msra.gmra.mrb[176].mxu0 %vm633_vm2, %v5661_v45 }
0x3e24   : > { %8397 = vmatpush3.bf16.msra.mxu0 %v8656_v59  ;;  %8400 = vmatprep.mubr.msk.bf16.mxu0 %vm8856_vm1, %v8855_v9 }
0x3e25   : > { %8398 = vmatprep.subr.bf16.mxu0 %v8855_v9 }
0x3e28   : > { %8399 = vmatpush3.bf16.msra.mxu0 %v8657_v62 }
0x3e29   : > { %8412 = vmatprep.subr.bf16.mxu0 %v8855_v9 }
0x3e2b   : > { %8401 = vmatmul.mubr.msk.bf16.vlgmr.msra.gmra.mrb[180].mxu0 %vm410_vm0, %v10116_v5 }
0x3e2c   : > { %8414 = vmatprep.mubr.msk.bf16.mxu0 %vm8856_vm1, %v8855_v9 }
0x3eee   : > { %v5933_v1 = vpop.f32.mrb[172].mxu0 }
0x3eef   : > { %v5939_v3 = vpack.c.bf16 %v5933_v1, %v5933_v1  ;;  %v8374_v40 = vpop.f32.mrb[173].mxu0 }
0x3ef0   : > { %v5936_v61 = vpop.f32.mrb[174].mxu0 }
0x3ef1   : > { %v8375_v6 = vpop.f32.mrb[175].mxu0  ;;  %8379 = vmatmul.mubr.msk.bf16.vlgmr.msra.gmra.mrb[176].mxu1 %vm633_vm2, %v5939_v3 }
0x3ef2   : > { %8389 = vmatpush3.bf16.msra.mxu1 %v8658_v25  ;;  %8392 = vmatprep.mubr.msk.bf16.mxu1 %vm8856_vm1, %v8855_v9  ;;  %v7341_v25 = vld [vmem:[%s10486_s6 + $0x38] sm:$0xf] }
0x3ef3   : > { %8390 = vmatprep.subr.bf16.mxu1 %v8855_v9  ;;  %v6314_v3 = vsel %vm1047_vm4, %v7341_v25, 0 }
0x3ef6   : > { %v6026_v8 = vpop.f32.mrb[176].mxu0  ;;  %8391 = vmatpush3.bf16.msra.mxu1 %v8659_v42  ;;  %v8662_v42 = vld [vmem:[%s10485_s5 + $0x270] sm:$0xff]  }
0x3ef7   : > { %v8386_v49 = vpop.f32.mrb[177].mxu0  ;;  %8404 = vmatprep.subr.bf16.mxu1 %v8855_v9 }
0x3ef8   : > { %v6029_v28 = vpop.f32.mrb[178].mxu0  ;;  %v8664_v49 = vld [vmem:[%s10485_s5 + $0x2f0] sm:$0xff]  }
0x3ef9   : > { %v8387_v31 = vpop.f32.mrb[179].mxu0  ;;  %8393 = vmatmul.mubr.msk.bf16.vlgmr.msra.gmra.mrb[180].mxu1 %vm410_vm0, %v10116_v5  ;;  %v8665_v28 = vld [vmem:[%s10485_s5 + $0x2f8] sm:$0xff]  }
0x3efa   : > { %8405 = vmatpush3.bf16.msra.mxu1 %v8660_v24  ;;  %8408 = vmatprep.mubr.msk.bf16.mxu1 %vm8856_vm1, %v8855_v9  ;;  %v8663_v24 = vld [vmem:[%s10485_s5 + $0x278] sm:$0xff]  }
0x3efb   : > { %8406 = vmatprep.subr.bf16.mxu1 %v8855_v9 }
0x3efe   : > { %v6138_v15 = vpop.f32.mrb[180].mxu0  ;;  %8407 = vmatpush3.bf16.msra.mxu1 %v8661_v14  ;;  %v8666_v14 = vld [vmem:[%s10485_s5 + $0x2b0] sm:$0xff]  }
0x3eff   : > { %v6139_v17 = vadd.f32 %v6138_v15, %v6091_v13  ;;  %v8402_v18 = vpop.f32.mrb[181].mxu0  ;;  %8418 = vmatprep.subr.bf16.mxu1 %v8855_v9 }
0x3f00   : > { %v6141_v21 = vpop.f32.mrb[182].mxu0 }
0x3f01   : > { %v6201_v22 = vpack.c.bf16 %v6139_v17, %v6139_v17  ;;  %v8403_v23 = vpop.f32.mrb[183].mxu0  ;;  %8409 = vmatmul.mubr.msk.bf16.vlgmr.msra.gmra.mrb[184].mxu1 %vm410_vm0, %v10116_v5  ;;  %v8667_v21 = vld [vmem:[%s10485_s5 + $0x2b8] sm:$0xff]  }
0x3f02   : > { %8420 = vmatprep.mubr.msk.bf16.mxu1 %vm8856_vm1, %v8855_v9 }
0x3f03   : > { %v6206_v26 = vsel %vm633_vm2, %v6201_v22, 0 }
0x3f04   : > { %8413 = vmatpush3.bf16.xpose.msra.mxu0 %v6206_v26 }
0x3f05   : > { %8424 = vmatprep.subr.bf16.mxu0 %v8855_v9 }
0x3fc4   : > { %v5980_v11 = vpop.f32.mrb[176].mxu1 }
0x3fc5   : > { %v10283_v27 = vadd.f32 %v6026_v8, %v5980_v11  ;;  %v8380_v32 = vpop.f32.mrb[177].mxu1 }
0x3fc6   : > { %v5983_v35 = vpop.f32.mrb[178].mxu1  ;;  %v6472_v32 = vrot.slane %v10153_v16, %v9250_v38  ;;  %v6416_v16 = vrot.slane %v10146_v10, %v9276_v0 }
0x3fc7   : > { %v8381_v36 = vpop.f32.mrb[179].mxu1 }
0x3fcc   : > { %v6082_v39 = vpop.f32.mrb[180].mxu1 }
0x3fcd   : > { %v6083_v41 = vadd.f32 %v6082_v39, %v6035_v37  ;;  %v8394_v43 = vpop.f32.mrb[181].mxu1 }
0x3fce   : > { %v6085_v44 = vpop.f32.mrb[182].mxu1 }
0x3fcf   : > { %v6200_v29 = vpack.c.bf16 %v6083_v41, %v6083_v41  ;;  %v8395_v48 = vpop.f32.mrb[183].mxu1 }
0x3fd1   : > { %8415 = vmatmul.mubr.msk.bf16.vlgmr.msra.gmra.mrb[184].mxu0 %vm633_vm2, %v6200_v29 }
0x3fd2   : > { %8426 = vmatprep.mubr.msk.bf16.mxu0 %vm8856_vm1, %v8855_v9  ;;  %8425 = vmatpush3.bf16.msra.mxu0 %v6314_v3  ;;  %v7342_v3 = vld [vmem:[%s10486_s6 + $0x3c] sm:$0xf] }
0x3fd3   : > { %8438 = vmatprep.subr.bf16.mxu0 %v8855_v9 }
0x3fd4   : > { %v6194_v34 = vpop.f32.mrb[184].mxu1 }
0x3fd5   : > { %v6195_v52 = vadd.f32 %v6194_v34, %v6147_v30  ;;  %v8410_v60 = vpop.f32.mrb[185].mxu1 }
0x3fd6   : > { %v6197_v20 = vpop.f32.mrb[186].mxu1 }
0x3fd7   : > { %v6262_v50 = vpack.c.bf16 %v6195_v52, %v6195_v52  ;;  %v8411_v4 = vpop.f32.mrb[187].mxu1 }
0x3fd8   : > { %v6360_v4 = vrot.slane %v10146_v10, %v9250_v38 }
0x3fd9   : > { %v6267_v2 = vsel %vm1047_vm4, %v6262_v50, 0 }
0x3fda   : > { %8419 = vmatpush3.bf16.msra.mxu1 %v6267_v2 }
0x3fdb   : > { %8430 = vmatprep.subr.bf16.mxu1 %v8855_v9 }
0x40a4   : > { %v6242_v53 = vpop.f32.mrb[184].mxu0 }
0x40a5   : > { %v6248_v47 = vmul.f32 0.35355338, %v6242_v53  ;;  %v8416_v63 = vpop.f32.mrb[185].mxu0 }
0x40a6   : > { %v6245_v54 = vpop.f32.mrb[186].mxu0 }
0x40a7   : > { %v8417_v55 = vpop.f32.mrb[187].mxu0  ;;  %v6249_v7 = vadd.f32 %v6248_v47, %v9488_v51 }
0x40a9   : > { %v6250_v56 = vsel %vm633_vm2, %v6249_v7, -inf }
0x40aa   : > { %6251 = vmax.xlane.f32.xlu0 %v6250_v56 }
0x4137   : > { %v6252_v58 = vpop.xlane.xlu0 %6251 }
0x4138   : > { %v6253_v59 = vsub.f32 %v6249_v7, %v6252_v58 }
0x413a   : > { %v6254_v45 = vmul.f32 1.442695, %v6253_v59 }
0x413c   : > { %8776 = vpow2.f32 %v6254_v45 }
0x4146   : > { %v8777_v62 = vpop.eup %8776 }
0x4147   : > { %v6256_v1 = vsel %vm633_vm2, %v8777_v62, 0.0 }
0x4148   : > { %6257 = vadd.xlane.f32.xlu1 %v6256_v1 }
0x41d5   : > { %v6258_v40 = vpop.xlane.xlu1 %6257 }
0x41d6   : > { %8778 = vrcp.f32 %v6258_v40  ;;  %v6639_v40 = vsel %vm1047_vm4, %v7342_v3, 0 }
0x41e0   : > { %v8779_v61 = vpop.eup %8778 }
0x41e1   : > { %v6260_v6 = vmul.f32 %v8779_v61, %v8777_v62 }
0x41e3   : > { %v6261_v8 = vpack.c.bf16 %v6260_v6, %v6260_v6 }
0x41e5   : > { %8421 = vmatmul.mubr.msk.bf16.vlgmr.msra.gmra.mrb[188].mxu1 %vm633_vm2, %v6261_v8 }
0x41e6   : > { %8431 = vmatpush3.bf16.msra.mxu1 %v8662_v42  ;;  %8434 = vmatprep.mubr.msk.bf16.mxu1 %vm8856_vm1, %v8855_v9 }
0x41e7   : > { %8432 = vmatprep.subr.bf16.mxu1 %v8855_v9 }
0x41ea   : > { %8433 = vmatpush3.bf16.msra.mxu1 %v8663_v24 }
0x41eb   : > { %8446 = vmatprep.subr.bf16.mxu1 %v8855_v9 }
0x41ed   : > { %8435 = vmatmul.mubr.msk.bf16.vlgmr.msra.gmra.mrb[192].mxu1 %vm410_vm0, %v10116_v5 }
0x41ee   : > { %8447 = vmatpush3.bf16.msra.mxu1 %v8664_v49  ;;  %8450 = vmatprep.mubr.msk.bf16.mxu1 %vm8856_vm1, %v8855_v9 }
0x41ef   : > { %8448 = vmatprep.subr.bf16.mxu1 %v8855_v9 }
0x41f2   : > { %8449 = vmatpush3.bf16.msra.mxu1 %v8665_v28 }
0x41f3   : > { %8460 = vmatprep.subr.bf16.mxu1 %v8855_v9 }
0x41f5   : > { %8451 = vmatmul.mubr.msk.bf16.vlgmr.msra.gmra.mrb[196].mxu1 %vm410_vm0, %v10116_v5 }
0x41f6   : > { %8462 = vmatprep.mubr.msk.bf16.mxu1 %vm8856_vm1, %v8855_v9 }
0x42b8   : > { %v6303_v31 = vpop.f32.mrb[188].mxu1 }
0x42b9   : > { %v6309_v13 = vpack.c.bf16 %v6303_v31, %v6303_v31  ;;  %v8422_v15 = vpop.f32.mrb[189].mxu1 }
0x42ba   : > { %v6306_v17 = vpop.f32.mrb[190].mxu1  ;;  %v6686_v15 = vrot.slane %v10106_v19, %v9042_v57  ;;  %v8668_v57 = vld [vmem:[%s10487_s7 + $0x30] sm:$0xff]  }
0x42bb   : > { %v8423_v18 = vpop.f32.mrb[191].mxu1  ;;  %8427 = vmatmul.mubr.msk.bf16.vlgmr.msra.gmra.mrb[188].mxu0 %vm633_vm2, %v6309_v13 }
0x42bc   : > { %8439 = vmatpush3.bf16.msra.mxu0 %v8666_v14  ;;  %8442 = vmatprep.mubr.msk.bf16.mxu0 %vm8856_vm1, %v8855_v9 }
0x42bd   : > { %8440 = vmatprep.subr.bf16.mxu0 %v8855_v9 }
0x42c0   : > { %v6407_v22 = vpop.f32.mrb[192].mxu1  ;;  %8441 = vmatpush3.bf16.msra.mxu0 %v8667_v21 }
0x42c1   : > { %v8436_v23 = vpop.f32.mrb[193].mxu1  ;;  %8454 = vmatprep.subr.bf16.mxu0 %v8855_v9  ;;  %v6408_v63 = vadd.f32 %v6407_v22, %v6360_v4  ;;  %v8673_v4 = vld [vmem:[%s10488_s8 + $0xd8] sm:$0xff]  }
0x42c2   : > { %v6410_v26 = vpop.f32.mrb[194].mxu1 }
0x42c3   : > { %v8437_v11 = vpop.f32.mrb[195].mxu1  ;;  %8443 = vmatmul.mubr.msk.bf16.vlgmr.msra.gmra.mrb[192].mxu0 %vm410_vm0, %v10116_v5 }
0x42c4   : > { %8456 = vmatprep.mubr.msk.bf16.mxu0 %vm8856_vm1, %v8855_v9 }
0x42c8   : > { %v6519_v35 = vpop.f32.mrb[196].mxu1 }
0x42c9   : > { %v6520_v36 = vadd.f32 %v6519_v35, %v6472_v32  ;;  %v8452_v37 = vpop.f32.mrb[197].mxu1 }
0x42ca   : > { %v6522_v39 = vpop.f32.mrb[198].mxu1 }
0x42cb   : > { %v6587_v41 = vpack.c.bf16 %v6520_v36, %v6520_v36  ;;  %v8453_v43 = vpop.f32.mrb[199].mxu1 }
0x42cd   : > { %v6592_v44 = vsel %vm1047_vm4, %v6587_v41, 0 }
0x42ce   : > { %8461 = vmatpush3.bf16.msra.mxu1 %v6592_v44 }
0x42cf   : > { %8472 = vmatprep.subr.bf16.mxu1 %v8855_v9 }
0x438e   : > { %v6350_v29 = vpop.f32.mrb[188].mxu0 }
0x438f   : > { %v6356_v5 = vadd.f32 %v6350_v29, %v10283_v27  ;;  %v8428_v48 = vpop.f32.mrb[189].mxu0  ;;  %v6525_v27 = vpack.c.bf16 %v6408_v63, %v6408_v63  ;;  %v8677_v63 = vld [vmem:[%s10488_s8 + $0xf8] sm:$0xff]  }
0x4390   : > { %v6353_v30 = vpop.f32.mrb[190].mxu0  ;;  %v6707_v48 = vrot.slane %v10106_v19, %v9200_v33  ;;  %v8671_v33 = vld [vmem:[%s10488_s8 + $0xc8] sm:$0xff]  }
0x4391   : > { %v8429_v34 = vpop.f32.mrb[191].mxu0 }
0x4396   : > { %v6463_v52 = vpop.f32.mrb[192].mxu0 }
0x4397   : > { %v6464_v60 = vadd.f32 %v6463_v52, %v6416_v16  ;;  %v8444_v20 = vpop.f32.mrb[193].mxu0  ;;  %v6712_v16 = vrot.slane %v10106_v19, %v9250_v38  ;;  %v8672_v38 = vld [vmem:[%s10488_s8 + $0xd0] sm:$0xff]  }
0x4398   : > { %v6466_v50 = vpop.f32.mrb[194].mxu0 }
0x4399   : > { %v6526_v2 = vpack.c.bf16 %v6464_v60, %v6464_v60  ;;  %v8445_v53 = vpop.f32.mrb[195].mxu0  ;;  %v8670_v50 = vld [vmem:[%s10488_s8 + $0xc0] sm:$0xff]  }
0x439a   : > { %v8675_v53 = vld [vmem:[%s10488_s8 + $0xe8] sm:$0xff]  }
0x439b   : > { %v6531_v47 = vsel %vm633_vm2, %v6526_v2, 0  ;;  %v8674_v2 = vld [vmem:[%s10488_s8 + $0xe0] sm:$0xff]  }
0x439c   : > { %8455 = vmatpush3.bf16.xpose.msra.mxu0 %v6531_v47  ;;  %v8676_v47 = vld [vmem:[%s10488_s8 + $0xf0] sm:$0xff]  }
0x439d   : > { %8466 = vmatprep.subr.bf16.mxu0 %v8855_v9 }
0x43a3   : > { %8457 = vmatmul.mubr.msk.bf16.vlgmr.msra.gmra.mrb[196].mxu0 %vm633_vm2, %v6525_v27  ;;  %v7411_v27 = vld [vmem:[%s10484_s4 + $0x3] ss:$0 sm:$0xff] }
0x43a4   : > { %8468 = vmatprep.mubr.msk.bf16.mxu0 %vm8856_vm1, %v8855_v9  ;;  %8467 = vmatpush3.bf16.msra.mxu0 %v6639_v40 }
0x43a5   : > { %8480 = vmatprep.subr.bf16.mxu0 %v8855_v9 }
0x4476   : > { %v6567_v0 = vpop.f32.mrb[196].mxu0 }
0x4477   : > { %v6573_v54 = vmul.f32 0.35355338, %v6567_v0  ;;  %v8458_v55 = vpop.f32.mrb[197].mxu0 }
0x4478   : > { %v6570_v7 = vpop.f32.mrb[198].mxu0 }
0x4479   : > { %v8459_v56 = vpop.f32.mrb[199].mxu0  ;;  %v6574_v10 = vadd.f32 %v6573_v54, %v9488_v51 }
0x447b   : > { %v6575_v58 = vsel %vm633_vm2, %v6574_v10, -inf }
0x447c   : > { %6576 = vmax.xlane.f32.xlu0 %v6575_v58 }
0x4509   : > { %v6577_v59 = vpop.xlane.xlu0 %6576 }
0x450a   : > { %v6578_v45 = vsub.f32 %v6574_v10, %v6577_v59 }
0x450c   : > { %v6579_v62 = vmul.f32 1.442695, %v6578_v45 }
0x450e   : > { %8780 = vpow2.f32 %v6579_v62 }
0x4518   : > { %v8781_v1 = vpop.eup %8780 }
0x4519   : > { %v6581_v25 = vsel %vm633_vm2, %v8781_v1, 0.0 }
0x451a   : > { %6582 = vadd.xlane.f32.xlu1 %v6581_v25 }
0x45a7   : > { %v6583_v51 = vpop.xlane.xlu1 %6582 }
0x45a8   : > { %8782 = vrcp.f32 %v6583_v51  ;;  %v6787_v51 = vrot.slane %v10106_v19, %v9120_v12 }
0x45b2   : > { %v8783_v61 = vpop.eup %8782 }
0x45b3   : > { %v6585_v6 = vmul.f32 %v8783_v61, %v8781_v1 }
0x45b5   : > { %v6586_v42 = vpack.c.bf16 %v6585_v6, %v6585_v6 }
0x45b7   : > { %8463 = vmatmul.mubr.msk.bf16.vlgmr.msra.gmra.mrb[200].mxu1 %vm633_vm2, %v6586_v42 }
0x45b8   : > { %8476 = vmatprep.mubr.msk.bf16.mxu1 %vm8856_vm1, %v8855_v9  ;;  %8473 = vmatpush3.bf16.msra.mxu1 %v8668_v57 }
0x45b9   : > { %8474 = vmatprep.subr.bf16.mxu1 %v8855_v9 }
0x468a   : > { %v6628_v8 = vpop.f32.mrb[200].mxu1 }
0x468b   : > { %v6634_v24 = vpack.c.bf16 %v6628_v8, %v6628_v8  ;;  %v8464_v49 = vpop.f32.mrb[201].mxu1 }
0x468c   : > { %v6631_v28 = vpop.f32.mrb[202].mxu1 }
0x468d   : > { %v8465_v31 = vpop.f32.mrb[203].mxu1  ;;  %8469 = vmatmul.mubr.msk.bf16.vlgmr.msra.gmra.mrb[200].mxu0 %vm633_vm2, %v6634_v24 }
0x468e   : > { %8496 = vmatprep.mubr.msk.bf16.mxu0 %vm8856_vm1, %v8855_v9  ;;  %8481 = vmatpush3.bf16.msra.mxu0 %v8670_v50 }
0x468f   : > { %8482 = vmatprep.subr.bf16.mxu0 %v8855_v9 }
0x4692   : > { %8483 = vmatpush3.bf16.msra.mxu0 %v8671_v33 }
0x4693   : > { %8484 = vmatprep.subr.bf16.mxu0 %v8855_v9 }
0x4696   : > { %8485 = vmatpush3.bf16.msra.mxu0 %v8672_v38 }
0x4697   : > { %8486 = vmatprep.subr.bf16.mxu0 %v8855_v9 }
0x469a   : > { %8487 = vmatpush3.bf16.msra.mxu0 %v8673_v4 }
0x469b   : > { %8488 = vmatprep.subr.bf16.mxu0 %v8855_v9 }
0x469e   : > { %8489 = vmatpush3.bf16.msra.mxu0 %v8674_v2 }
0x469f   : > { %8490 = vmatprep.subr.bf16.mxu0 %v8855_v9 }
0x46a2   : > { %8491 = vmatpush3.bf16.msra.mxu0 %v8675_v53 }
0x46a3   : > { %8492 = vmatprep.subr.bf16.mxu0 %v8855_v9 }
0x46a6   : > { %8493 = vmatpush3.bf16.msra.mxu0 %v8676_v47 }
0x46a7   : > { %8494 = vmatprep.subr.bf16.mxu0 %v8855_v9 }
0x46aa   : > { %8495 = vmatpush3.bf16.msra.mxu0 %v8677_v63 }
0x4760   : > { %v6675_v14 = vpop.f32.mrb[200].mxu0 }
0x4761   : > { %v6681_v13 = vadd.f32 %v6675_v14, %v6356_v5  ;;  %v8470_v17 = vpop.f32.mrb[201].mxu0 }
0x4762   : > { %v6678_v18 = vpop.f32.mrb[202].mxu0 }
0x4763   : > { %v6682_v21 = vadd.f32 %v6681_v13, %v10088_v46  ;;  %v8471_v22 = vpop.f32.mrb[203].mxu0  ;;  %v8669_v46 = vld [vmem:[%s10487_s7 + $0x38] sm:$0xff]  }
0x4764   : > { %8475 = vmatpush3.bf16.msra.mxu1 %v8669_v46 }
0x4765   : > { %v10375_v23 = vadd.f32 %v6686_v15, %v6682_v21 }
0x4767   : > { %v6688_v26 = vsel %vm410_vm0, %v10375_v23, 0.0  ;;  %v6692_v11 = vmul.f32 %v10375_v23, %v10375_v23 }
0x4768   : > { %6689 = vadd.xlane.f32.xlu0 %v6688_v26 }
0x4769   : > { %v6693_v32 = vsel %vm410_vm0, %v6692_v11, 0.0 }
0x476a   : > { %6694 = vadd.xlane.f32.xlu1 %v6693_v32 }
0x47f5   : > { %v6690_v35 = vpop.xlane.xlu0 %6689 }
0x47f6   : > { %v6691_v36 = vmul.f32 0.03125, %v6690_v35 }
0x47f7   : > { %v6695_v37 = vpop.xlane.xlu1 %6694 }
0x47f8   : > { %v6697_v39 = vmul.f32 %v6691_v36, %v6691_v36  ;;  %v6696_v41 = vmul.f32 0.03125, %v6695_v37  ;;  %v6700_v5 = vsub.f32 %v10375_v23, %v6691_v36 }
0x47fa   : > { %v6698_v43 = vsub.f32 %v6696_v41, %v6697_v39 }
0x47fc   : > { %v6699_v44 = vmax.f32 %v6698_v43, 0.0 }
0x47fe   : > { %v6701_v29 = vadd.f32 1e-05, %v6699_v44 }
0x4800   : > { %8784 = vrsqrt.f32 %v6701_v29 }
0x480a   : > { %v8785_v30 = vpop.eup %8784 }
0x480b   : > { %v6703_v34 = vmul.f32 %v8785_v30, %v6700_v5 }
0x480d   : > { %v6708_v52 = vmul.f32 %v6707_v48, %v6703_v34 }
0x480f   : > { %v6713_v60 = vadd.f32 %v6712_v16, %v6708_v52 }
0x4811   : > { %v6714_v20 = vpack.c.bf16 %v6713_v60, %v6713_v60 }
0x4813   : > { %8477 = vmatmul.mubr.msk.bf16.vlgmr.msra.gmra.mrb[204].mxu1 %vm410_vm0, %v6714_v20 }
0x48e6   : > { %v6768_v0 = vpop.f32.mrb[204].mxu1 }
0x48e7   : > { %v6769_v54 = vadd.f32 %v7411_v27, %v6768_v0  ;;  %v8478_v55 = vpop.f32.mrb[205].mxu1 }
0x48e8   : > { %v6771_v7 = vpop.f32.mrb[206].mxu1 }
0x48e9   : > { %v6774_v56 = vmul.f32 %v6769_v54, %v6769_v54  ;;  %v8479_v10 = vpop.f32.mrb[207].mxu1 }
0x48eb   : > { %v6775_v58 = vmul.f32 %v6774_v56, %v6769_v54 }
0x48ed   : > { %v6776_v59 = vmul.f32 0.044715, %v6775_v58 }
0x48ef   : > { %v6777_v45 = vadd.f32 %v6776_v59, %v6769_v54 }
0x48f1   : > { %v6778_v62 = vmul.f32 0.7978846, %v6777_v45 }
0x48f3   : > { %8786 = vtanh.f32 %v6778_v62 }
0x48fd   : > { %v8787_v1 = vpop.eup %8786 }
0x48fe   : > { %v6780_v9 = vadd.f32 1.0, %v8787_v1 }
0x4900   : > { %v6781_v25 = vmul.f32 0.5, %v6780_v9 }
0x4902   : > { %v6782_v3 = vmul.f32 %v6781_v25, %v6769_v54 }
0x4904   : > { %v6783_v40 = vpack.c.bf16 %v6782_v3, %v6782_v3 }
0x4906   : > { %8497 = vmatmul.mubr.bf16.vlgmr.msra.gmra.mrb[204].mxu0 %v6783_v40 }
0x49d9   : > { %v6870_v61 = vpop.f32.mrb[204].mxu0 }
0x49da   : > { %v6871_v6 = vadd.f32 %v6870_v61, %v6787_v51  ;;  %v8498_v42 = vpop.f32.mrb[205].mxu0 }
0x49db   : > { %v6873_v8 = vpop.f32.mrb[206].mxu0 }
0x49dc   : > { %v6876_v24 = vadd.f32 %v6871_v6, %v10375_v23  ;;  %v8499_v49 = vpop.f32.mrb[207].mxu0 }
0x49de   : > { %6877 = vst.msk [vmem:[%s325_s26] sm:$0xff] %vm410_vm0, %v6876_v24 }
0x49df   : > { %8804 = shalt.err (!%p8801_p3)
}
0x49e0   : > { %s8805_s22 = scalar_lea.hbm %s10437_s14, 128  ;;  %s8809_s26 = scalar_lea.hbm %s10489_s9, 256 }
0x49e1   : > { %p8806_p4 = scmp.ne.s32.totalorder %s10437_s14, %s8805_s22  ;;  %p8810_p9 = scmp.lt.u32.totalorder %s10437_s14, %s10489_s9 }
0x49e2   : > { %p8811_p10 = scmp.lt.u32.totalorder %s8809_s26, %s8805_s22  ;;  %p8813_p12 = scmp.lt.u32.totalorder %s8805_s22, %s10437_s14 }
0x49e3   : > { %p8807_p7 = pnand %p8806_p4, %p8947_p5 }
0x49e4   : > { %p8812_p11 = por %p8811_p10, %p8810_p9 }
0x49e5   : > { %p8808_p8 = pneg %p8807_p7 }
0x49e6   : > { %p8814_p13 = por %p8813_p12, %p8812_p11 }
0x49e8   : > { %p8815_p0 = pnand %p8814_p13, %p8808_p8 }
0x49ea   : > { %8818 = shalt.err (!%p8815_p0)
}
0x49eb   : > { %8500 = dma.vmem_to_hbm [thread:$0]  (%p8947_p5), %s10439_s27, 128, %s10437_s14, %s6879_s13  }
0x49ec PF: > { %p8506_p1 = scmp.ge.s32.totalorder %s8853_s12, 2  ;;  %s6904_s16 = sand.u32 1, %s8841_s30  }
0x49ed   : > { %s6905_s17 = scalar_lea.sflag [#allocation4], %s6904_s16 }
0x49ee   : > { %p8503_p2 = pnand %p8506_p1, %p8951_p6 }
0x49f0   : > { %8836 = dma.done.wait (!%p8503_p2), %s6905_s17, 128  }
0x49f1   : > { %8838 = vsyncadd (!%p8503_p2), %s6905_s17, 4294967168  ;;  %p19_p3 = scmp.ge.s32.totalorder %s8934_s15, 4   ;;  %s10492_s30 = smov %s8845_s10 }
0x49f2   : > { %s10493_s10 = smov %s8849_s11  ;;  %s10494_s11 = smov %s8945_s18 }
0x49f3   : > { %s10495_s12 = smov %s8934_s15  ;;  %21 = sbr.rel (!%p19_p3) target bundleno = 3 (0x3), region = 111 }
0x49fa   :  { %6910 = vsyncpa [#allocation4], 1 }
0x49fb   :  { %6912 = vsyncpa [#allocation4 + $0x1], 1 }

</bundles_post_ra>
